<compile_context>
chip_gen: v6e
topology: v6e:2x2x1
jax: 0.10.0
libtpu: 0.0.40
codegen_flags: <defaults>
</compile_context>

<pallas_src>
import functools
import math

import jax
import jax.numpy as jnp
from jax.experimental import pallas as pl
from jax.experimental.pallas import tpu as pltpu


# --------------------------------------------------------------------------
# Generation-aware VMEM budget & tile helpers
# --------------------------------------------------------------------------

def _vmem_budget():
    cap = 64 * 1024 * 1024
    try:
        info = pltpu.get_tpu_info()
        cap = int(getattr(info, "vmem_capacity_bytes", cap) or cap)
    except Exception:
        pass
    return min(int(cap * 3 // 4), 100 * 1024 * 1024)


_VMEM_BUDGET = _vmem_budget()
_LARGE_VMEM = _VMEM_BUDGET >= 72 * 1024 * 1024        # v5e/v6e (128 MiB) vs v7x (64 MiB)


def _round_up(x, m):
    return ((x + m - 1) // m) * m


def _pad_to(x, shape):
    if tuple(x.shape) == tuple(shape):
        return x
    pads = [(0, t - s) for s, t in zip(x.shape, shape)]
    return jnp.pad(x, pads)


def _tile_or_pad(dim, target, align):
    """Pick (tile, padded_dim) with tile | padded_dim.  Prefers exact divisors."""
    if dim <= target:
        return dim, dim
    t = max(align, (target // align) * align)
    c = t
    while c >= max(align, t // 2):
        if dim % c == 0:
            return c, dim
        c -= align
    return t, _round_up(dim, t)


def _tile_no_pad(dim, target, align):
    """Largest multiple of `align` <= target dividing dim; else the full dim."""
    if dim <= target or dim % align != 0:
        return dim
    c = (target // align) * align
    while c >= align:
        if dim % c == 0:
            return c
        c -= align
    return dim


# --------------------------------------------------------------------------
# Tiled linear (bias fused)
# --------------------------------------------------------------------------

def _matmul_bias_kernel(x_ref, w_ref, b_ref, o_ref, acc_ref):
    @pl.when(pl.program_id(2) == 0)
    def _():
        acc_ref[...] = jnp.zeros_like(acc_ref)

    acc_ref[...] += jnp.dot(x_ref[...], w_ref[...],
                            preferred_element_type=jnp.float32)

    @pl.when(pl.program_id(2) == pl.num_programs(2) - 1)
    def _():
        y = acc_ref[...] + b_ref[...].astype(jnp.float32)
        o_ref[...] = y.astype(o_ref.dtype)


def tiled_linear(x, w, b, *, tm=1024, tn=1024, tk=1024):
    """(..., K) @ (K, N) + (N,) -> (..., N), tiled over (M, N, K)."""
    *lead, K = x.shape
    N = w.shape[1]
    M = int(math.prod(lead)) if lead else 1
    x2 = x.reshape(M, K)

    tm, m_pad = _tile_or_pad(M, tm, 8)
    tn, n_pad = _tile_or_pad(N, tn, 128)
    tk = _tile_no_pad(K, tk, 128)

    x2 = _pad_to(x2, (m_pad, K))
    wp = _pad_to(w, (K, n_pad))
    bp = _pad_to(b.reshape(1, N), (1, n_pad))

    out = pl.pallas_call(
        _matmul_bias_kernel,
        out_shape=jax.ShapeDtypeStruct((m_pad, n_pad), x.dtype),
        grid=(m_pad // tm, n_pad // tn, K // tk),
        in_specs=[pl.BlockSpec((tm, tk), lambda i, j, k: (i, k)),
                  pl.BlockSpec((tk, tn), lambda i, j, k: (k, j)),
                  pl.BlockSpec((1, tn), lambda i, j, k: (0, j))],
        out_specs=pl.BlockSpec((tm, tn), lambda i, j, k: (i, j)),
        scratch_shapes=[pltpu.VMEM((tm, tn), jnp.float32)],
        compiler_params=pltpu.CompilerParams(
            dimension_semantics=("parallel", "parallel", "arbitrary"),
            vmem_limit_bytes=_VMEM_BUDGET),
    )(x2, wp, bp)
    if m_pad != M or n_pad != N:
        out = out[:M, :N]
    return out.reshape(*lead, N)


# --------------------------------------------------------------------------
# Tiled linear with fused `gate * (x @ w + b) + residual` epilogue
# --------------------------------------------------------------------------

def _matmul_gated_res_kernel(x_ref, w_ref, b_ref, g_ref, r_ref, o_ref, acc_ref):
    @pl.when(pl.program_id(3) == 0)
    def _():
        acc_ref[...] = jnp.zeros_like(acc_ref)

    acc_ref[...] += jnp.dot(x_ref[...][0], w_ref[...],
                            preferred_element_type=jnp.float32)

    @pl.when(pl.program_id(3) == pl.num_programs(3) - 1)
    def _():
        y = acc_ref[...] + b_ref[...].astype(jnp.float32)
        y = g_ref[...][0].astype(jnp.float32) * y + r_ref[...][0].astype(jnp.float32)
        o_ref[...] = y[None].astype(o_ref.dtype)


def linear_gated_residual(x, w, b, gate, residual, *, tm=1024, tn=1024, tk=1024):
    """gate * (x @ w + b) + residual.  x,residual: (B,S,*); gate: (B,1,N)."""
    B, S, K = x.shape
    N = w.shape[1]
    tm, s_pad = _tile_or_pad(S, tm, 8)
    tn, n_pad = _tile_or_pad(N, tn, 128)
    tk = _tile_no_pad(K, tk, 128)

    xp = _pad_to(x, (B, s_pad, K))
    wp = _pad_to(w, (K, n_pad))
    bp = _pad_to(b.reshape(1, N), (1, n_pad))
    gp = _pad_to(gate, (B, 1, n_pad))
    rp = _pad_to(residual, (B, s_pad, n_pad))

    out = pl.pallas_call(
        _matmul_gated_res_kernel,
        out_shape=jax.ShapeDtypeStruct((B, s_pad, n_pad), x.dtype),
        grid=(B, s_pad // tm, n_pad // tn, K // tk),
        in_specs=[pl.BlockSpec((1, tm, tk), lambda b, i, j, k: (b, i, k)),
                  pl.BlockSpec((tk, tn), lambda b, i, j, k: (k, j)),
                  pl.BlockSpec((1, tn), lambda b, i, j, k: (0, j)),
                  pl.BlockSpec((1, 1, tn), lambda b, i, j, k: (b, 0, j)),
                  pl.BlockSpec((1, tm, tn), lambda b, i, j, k: (b, i, j))],
        out_specs=pl.BlockSpec((1, tm, tn), lambda b, i, j, k: (b, i, j)),
        scratch_shapes=[pltpu.VMEM((tm, tn), jnp.float32)],
        compiler_params=pltpu.CompilerParams(
            dimension_semantics=("parallel", "parallel", "parallel", "arbitrary"),
            vmem_limit_bytes=_VMEM_BUDGET),
    )(xp, wp, bp, gp, rp)
    if s_pad != S or n_pad != N:
        out = out[:, :S, :N]
    return out


# --------------------------------------------------------------------------
# LayerNorm(eps=1e-6, no affine) + adaLN modulation, row-tiled
# --------------------------------------------------------------------------

def _ln_modulate_kernel(x_ref, scale_ref, shift_ref, o_ref):
    x = x_ref[...][0].astype(jnp.float32)                 # (tm, D)
    mean = jnp.mean(x, axis=-1, keepdims=True)
    var = jnp.mean(jnp.square(x - mean), axis=-1, keepdims=True)
    xn = (x - mean) * jax.lax.rsqrt(var + 1e-6)
    sc = scale_ref[...][0].astype(jnp.float32)            # (1, D)
    sh = shift_ref[...][0].astype(jnp.float32)
    o_ref[...] = (xn * (1.0 + sc) + sh)[None].astype(o_ref.dtype)


def layernorm_modulate(x, scale, shift, *, tm=1024):
    B, S, D = x.shape
    tm, s_pad = _tile_or_pad(S, tm, 8)
    xp = _pad_to(x, (B, s_pad, D))
    out = pl.pallas_call(
        _ln_modulate_kernel,
        out_shape=jax.ShapeDtypeStruct((B, s_pad, D), x.dtype),
        grid=(B, s_pad // tm),
        in_specs=[pl.BlockSpec((1, tm, D), lambda b, i: (b, i, 0)),
                  pl.BlockSpec((1, 1, D), lambda b, i: (b, 0, 0)),
                  pl.BlockSpec((1, 1, D), lambda b, i: (b, 0, 0))],
        out_specs=pl.BlockSpec((1, tm, D), lambda b, i: (b, i, 0)),
        compiler_params=pltpu.CompilerParams(
            dimension_semantics=("parallel", "parallel"),
            vmem_limit_bytes=_VMEM_BUDGET),
    )(xp, scale, shift)
    return out[:, :S] if s_pad != S else out


# --------------------------------------------------------------------------
# RMSNorm(eps=1e-5) over inner_dim, row-tiled (optional fused scalar scale)
# --------------------------------------------------------------------------

def _rmsnorm_kernel(x_ref, w_ref, o_ref, *, eps, scale):
    x = x_ref[...][0].astype(jnp.float32)                 # (tm, D)
    ms = jnp.mean(jnp.square(x), axis=-1, keepdims=True)
    w = w_ref[...].astype(jnp.float32) * scale
    y = x * jax.lax.rsqrt(ms + eps) * w
    o_ref[...] = y[None].astype(o_ref.dtype)


def rmsnorm(x, w, *, scale=1.0, eps=1e-5, tm=1024):
    B, S, D = x.shape
    tm, s_pad = _tile_or_pad(S, tm, 8)
    xp = _pad_to(x, (B, s_pad, D))
    out = pl.pallas_call(
        functools.partial(_rmsnorm_kernel, eps=eps, scale=scale),
        out_shape=jax.ShapeDtypeStruct((B, s_pad, D), x.dtype),
        grid=(B, s_pad // tm),
        in_specs=[pl.BlockSpec((1, tm, D), lambda b, i: (b, i, 0)),
                  pl.BlockSpec((1, D), lambda b, i: (0, 0))],
        out_specs=pl.BlockSpec((1, tm, D), lambda b, i: (b, i, 0)),
        compiler_params=pltpu.CompilerParams(
            dimension_semantics=("parallel", "parallel"),
            vmem_limit_bytes=_VMEM_BUDGET),
    )(xp, w.reshape(1, D))
    return out[:, :S] if s_pad != S else out


# --------------------------------------------------------------------------
# Flash-style joint attention (online softmax, KV-tiled, head indexed by lane block)
# --------------------------------------------------------------------------

def _flash_attn_kernel(q_ref, k_ref, v_ref, o_ref, m_sc, l_sc, acc_sc, *,
                       valid_len, blk_k, needs_mask):
    ki = pl.program_id(3)

    @pl.when(ki == 0)
    def _():
        m_sc[...] = jnp.full_like(m_sc, -jnp.inf)
        l_sc[...] = jnp.zeros_like(l_sc)
        acc_sc[...] = jnp.zeros_like(acc_sc)

    q = q_ref[...][0]                                      # (tq, hd), already 1/sqrt(hd)-scaled
    k = k_ref[...][0]                                      # (tk, hd)
    v = v_ref[...][0]
    # contraction on the last axis of both operands: no k transpose materialized
    s = jax.lax.dot_general(q, k, (((1,), (1,)), ((), ())),
                            preferred_element_type=jnp.float32)   # (tq, tk)
    if needs_mask:
        col = jax.lax.broadcasted_iota(jnp.int32, s.shape, 1) + ki * blk_k
        s = jnp.where(col < valid_len, s, -jnp.inf)

    m_prev = m_sc[...]
    m_new = jnp.maximum(m_prev, s.max(axis=-1, keepdims=True))
    alpha = jnp.exp(m_prev - m_new)
    # TODO(synk): bf16 exp / MXU ones-column row-sum on v6e/v7x (kept f32 for parity).
    p = jnp.exp(s - m_new)
    l_sc[...] = alpha * l_sc[...] + p.sum(axis=-1, keepdims=True)
    acc_sc[...] = alpha * acc_sc[...] + jnp.dot(
        p.astype(v.dtype), v, preferred_element_type=jnp.float32)
    m_sc[...] = m_new

    @pl.when(ki == pl.num_programs(3) - 1)
    def _():
        o = acc_sc[...] * pl.reciprocal(l_sc[...], approx=False)
        o_ref[...] = o[None].astype(o_ref.dtype)


def flash_attention(q, k, v, heads, head_dim, *, tq_target=512, tk_target=1024):
    """q, k, v, out: (B, S, heads*head_dim); q must already carry the 1/sqrt(hd) scale."""
    B, S, inner = q.shape

    if heads > 1 and head_dim % 128 != 0:
        # Fallback for non-lane-aligned head_dim (production HiDream uses head_dim=128).
        def to_hm(x):
            return (x.reshape(B, S, heads, head_dim).transpose(0, 2, 1, 3)
                     .reshape(B * heads, S, head_dim))
        o = flash_attention(to_hm(q), to_hm(k), to_hm(v), 1, head_dim,
                            tq_target=tq_target, tk_target=tk_target)
        return (o.reshape(B, heads, S, head_dim).transpose(0, 2, 1, 3)
                 .reshape(B, S, inner))

    if S <= tq_target:
        tq = tk = s_pad = S
    else:
        tq, s_pad = _tile_or_pad(S, tq_target, 8)
        tk = max(8, (tk_target // 8) * 8)
        while s_pad % tk != 0:
            tk -= 8
    needs_mask = s_pad != S

    qp = _pad_to(q, (B, s_pad, inner))
    kp = _pad_to(k, (B, s_pad, inner))
    vp = _pad_to(v, (B, s_pad, inner))

    q_spec = pl.BlockSpec((1, tq, head_dim), lambda b, h, qi, ki: (b, qi, h))
    kv_spec = pl.BlockSpec((1, tk, head_dim), lambda b, h, qi, ki: (b, ki, h))
    out = pl.pallas_call(
        functools.partial(_flash_attn_kernel, valid_len=S, blk_k=tk,
                          needs_mask=needs_mask),
        out_shape=jax.ShapeDtypeStruct((B, s_pad, inner), q.dtype),
        grid=(B, heads, s_pad // tq, s_pad // tk),
        in_specs=[q_spec, kv_spec, kv_spec],
        out_specs=q_spec,
        scratch_shapes=[pltpu.VMEM((tq, 1), jnp.float32),
                        pltpu.VMEM((tq, 1), jnp.float32),
                        pltpu.VMEM((tq, head_dim), jnp.float32)],
        compiler_params=pltpu.CompilerParams(
            dimension_semantics=("parallel", "parallel", "parallel", "arbitrary"),
            vmem_limit_bytes=_VMEM_BUDGET),
    )(qp, kp, vp)
    return out[:, :S] if needs_mask else out


# --------------------------------------------------------------------------
# SwiGLU FFN with fused `gate * (token_w * swiglu(x)) + residual` epilogue
# --------------------------------------------------------------------------

def _swiglu_fused_kernel(x_ref, w1_ref, w3_ref, w2_ref, g_ref, tw_ref, r_ref,
                         o_ref, acc_ref):
    j = pl.program_id(2)

    @pl.when(j == 0)
    def _():
        acc_ref[...] = jnp.zeros_like(acc_ref)

    x = x_ref[...][0]                                      # (tm, D)
    h1 = jnp.dot(x, w1_ref[...], preferred_element_type=jnp.float32)
    h3 = jnp.dot(x, w3_ref[...], preferred_element_type=jnp.float32)
    h = (h1 * jax.nn.sigmoid(h1)) * h3                     # SiLU(w1 x) * (w3 x)
    acc_ref[...] += jnp.dot(h.astype(x.dtype), w2_ref[...],
                            preferred_element_type=jnp.float32)

    @pl.when(j == pl.num_programs(2) - 1)
    def _():
        y = acc_ref[...] * tw_ref[...][0].astype(jnp.float32)     # (tm,1) token weight
        y = g_ref[...][0].astype(jnp.float32) * y + r_ref[...][0].astype(jnp.float32)
        o_ref[...] = y[None].astype(o_ref.dtype)


def swiglu_gated_residual(x, w1, w3, w2, gate, residual, token_w=None,
                          *, tm=None, th=512):
    """gate * (token_w * swiglu(x)) + residual; hidden dim tiled + accumulated."""
    B, S, D = x.shape
    Hd = w1.shape[1]
    if tm is None:
        tm = 1024 if _LARGE_VMEM else 512                 # v7x (64 MiB VMEM) caps at 512
    tm, s_pad = _tile_or_pad(S, tm, 8)
    th = _tile_no_pad(Hd, th, 128)
    if token_w is None:
        token_w = jnp.ones((B, S), jnp.float32)

    xp = _pad_to(x, (B, s_pad, D))
    rp = _pad_to(residual, (B, s_pad, D))
    twp = _pad_to(token_w.reshape(B, S, 1).astype(jnp.float32), (B, s_pad, 1))

    out = pl.pallas_call(
        _swiglu_fused_kernel,
        out_shape=jax.ShapeDtypeStruct((B, s_pad, D), x.dtype),
        grid=(B, s_pad // tm, Hd // th),
        in_specs=[pl.BlockSpec((1, tm, D), lambda b, i, j: (b, i, 0)),
                  pl.BlockSpec((D, th), lambda b, i, j: (0, j)),
                  pl.BlockSpec((D, th), lambda b, i, j: (0, j)),
                  pl.BlockSpec((th, D), lambda b, i, j: (j, 0)),
                  pl.BlockSpec((1, 1, D), lambda b, i, j: (b, 0, 0)),
                  pl.BlockSpec((1, tm, 1), lambda b, i, j: (b, i, 0)),
                  pl.BlockSpec((1, tm, D), lambda b, i, j: (b, i, 0))],
        out_specs=pl.BlockSpec((1, tm, D), lambda b, i, j: (b, i, 0)),
        scratch_shapes=[pltpu.VMEM((tm, D), jnp.float32)],
        compiler_params=pltpu.CompilerParams(
            dimension_semantics=("parallel", "parallel", "arbitrary"),
            vmem_limit_bytes=_VMEM_BUDGET),
    )(xp, w1, w3, w2, gate, twp, rp)
    return out[:, :S] if s_pad != S else out


# --------------------------------------------------------------------------
# JAX glue
# --------------------------------------------------------------------------

def apply_rope(xq, xk, freqs_cis):
    # xq/xk: (B, S, H, hd); freqs_cis: (B, S, 1, hd//2, 2, 2)
    # TODO(synk): fuse the rotation into the flash-attention prologue to avoid
    # the f32 q/k HBM round trip.
    xq_ = xq.astype(jnp.float32).reshape(*xq.shape[:-1], -1, 1, 2)
    xk_ = xk.astype(jnp.float32).reshape(*xk.shape[:-1], -1, 1, 2)
    xq_out = freqs_cis[..., 0] * xq_[..., 0] + freqs_cis[..., 1] * xq_[..., 1]
    xk_out = freqs_cis[..., 0] * xk_[..., 0] + freqs_cis[..., 1] * xk_[..., 1]
    return (xq_out.reshape(xq.shape).astype(xq.dtype),
            xk_out.reshape(xk.shape).astype(xk.dtype))


def moe_ffn(x, moe, gate, residual):
    """MOEFeedForwardSwiGLU (eval path): routed top-k mixture + shared expert.

    out = gate * (sum_e route_w_e * expert_e(x) + shared(x)) + residual,
    with routing weight / gate / accumulation fused into the expert epilogues.
    """
    # TODO(synk): grouped-matmul MoE (token sort + PrefetchScalarGridSpec) so each
    # routed expert only processes its own tokens instead of a dense all-token pass.
    B, S, D = x.shape
    xf = x.reshape(-1, D).astype(jnp.float32)
    logits = xf @ moe['gate_w'].T.astype(jnp.float32)       # (N, E) - tiny, in JAX
    scores = jax.nn.softmax(logits, axis=-1)
    topk_w, topk_idx = jax.lax.top_k(scores, moe['top_k'])
    E = moe['gate_w'].shape[0]
    onehot = jax.nn.one_hot(topk_idx, E, dtype=scores.dtype)     # (N, k, E)
    dense_w = jnp.sum(onehot * topk_w[..., None], axis=1).reshape(B, S, E)

    y = residual
    for e in range(E):
        w1, w3, w2 = moe['experts'][e]
        y = swiglu_gated_residual(x, w1, w3, w2, gate, y, token_w=dense_w[..., e])
    sw1, sw3, sw2 = moe['shared']
    y = swiglu_gated_residual(x, sw1, sw3, sw2, gate, y)
    return y


def hidream_block_forward(params, heads, head_dim, image_tokens,
                          image_tokens_masks=None, text_tokens=None,
                          adaln_input=None, rope=None):
    wtype = image_tokens.dtype
    B, S_i, D = image_tokens.shape
    S_t = text_tokens.shape[1]
    inner = heads * head_dim
    softmax_scale = 1.0 / math.sqrt(head_dim)

    # --- adaLN modulation: Linear(SiLU(adaln)).chunk(12) ---
    ada = jax.nn.silu(adaln_input.astype(jnp.float32)).astype(wtype)
    mod = tiled_linear(ada, params['adaln_w'], params['adaln_b'])       # (B, 12D)
    (shift_msa_i, scale_msa_i, gate_msa_i, shift_mlp_i, scale_mlp_i, gate_mlp_i,
     shift_msa_t, scale_msa_t, gate_msa_t, shift_mlp_t, scale_mlp_t, gate_mlp_t) = \
        [m[:, None, :] for m in jnp.split(mod, 12, axis=-1)]

    norm_i = layernorm_modulate(image_tokens, scale_msa_i, shift_msa_i)
    norm_t = layernorm_modulate(text_tokens, scale_msa_t, shift_msa_t)

    # --- HiDreamAttention (dual-stream joint attention), fused QKV projections ---
    a = params['attn']
    qkv_i = tiled_linear(norm_i, a['qkv_i_w'], a['qkv_i_b'])            # (B,S_i,3*inner)
    q_i, k_i, v_i = jnp.split(qkv_i, 3, axis=-1)
    q_i = rmsnorm(q_i, a['q_rms_w'], scale=softmax_scale)   # softmax scale folded here
    k_i = rmsnorm(k_i, a['k_rms_w'])

    qkv_t = tiled_linear(norm_t, a['qkv_t_w'], a['qkv_t_b'])            # (B,S_t,3*inner)
    q_t, k_t, v_t = jnp.split(qkv_t, 3, axis=-1)
    q_t = rmsnorm(q_t, a['q_rms_t_w'], scale=softmax_scale)
    k_t = rmsnorm(k_t, a['k_rms_t_w'])

    if image_tokens_masks is not None:
        # matches the HiDream flash-attn processor (keys scaled by the mask)
        k_i = k_i * image_tokens_masks.reshape(B, -1, 1).astype(k_i.dtype)

    S_tot = S_i + S_t
    q = jnp.concatenate([q_i, q_t], axis=1)
    k = jnp.concatenate([k_i, k_t], axis=1)
    v = jnp.concatenate([v_i, v_t], axis=1)

    qh = q.reshape(B, S_tot, heads, head_dim)
    kh = k.reshape(B, S_tot, heads, head_dim)
    if head_dim == rope.shape[-3] * 2:
        qh, kh = apply_rope(qh, kh, rope)
    else:
        q1, q2 = jnp.split(qh, 2, axis=-1)
        k1, k2 = jnp.split(kh, 2, axis=-1)
        q1, k1 = apply_rope(q1, k1, rope)
        qh = jnp.concatenate([q1, q2], axis=-1)
        kh = jnp.concatenate([k1, k2], axis=-1)
    q = qh.reshape(B, S_tot, inner)
    k = kh.reshape(B, S_tot, inner)

    # no (B,H,S,hd) transposes: heads are indexed through the lane block
    o = flash_attention(q, k, v, heads, head_dim)           # (B, S_tot, inner)

    # to_out projections with fused gate + residual epilogue
    image_tokens = linear_gated_residual(o[:, :S_i], a['to_out_w'], a['to_out_b'],
                                         gate_msa_i, image_tokens)
    text_tokens = linear_gated_residual(o[:, S_i:], a['to_out_t_w'], a['to_out_t_b'],
                                        gate_msa_t, text_tokens)

    # --- Feed-forward blocks (gate + residual fused into FFN epilogues) ---
    norm_i = layernorm_modulate(image_tokens, scale_mlp_i, shift_mlp_i)
    norm_t = layernorm_modulate(text_tokens, scale_mlp_t, shift_mlp_t)

    image_tokens = moe_ffn(norm_i, params['ff_i'], gate_mlp_i, image_tokens)
    text_tokens = swiglu_gated_residual(norm_t, *params['ff_t'],
                                        gate=gate_mlp_t, residual=text_tokens)
    return image_tokens, text_tokens


# --------------------------------------------------------------------------
# Deterministic parameter init (shapes match the torch module __init__)
# --------------------------------------------------------------------------

def swiglu_hidden(hidden_dim, multiple_of=256):
    h = int(2 * hidden_dim / 3)
    return multiple_of * ((h + multiple_of - 1) // multiple_of)


def init_params(key, dim, heads, head_dim, num_routed_experts,
                num_activated_experts, dtype=jnp.bfloat16):
    inner = heads * head_dim
    ks = iter(jax.random.split(key, 64))

    def lin(din, dout, scale=0.02):
        w = scale * jax.random.normal(next(ks), (din, dout), jnp.float32)
        b = scale * jax.random.normal(next(ks), (dout,), jnp.float32)
        return w.astype(dtype), b.astype(dtype)

    def ff(d, hidden):
        h = swiglu_hidden(hidden)
        return ((0.02 * jax.random.normal(next(ks), (d, h), jnp.float32)).astype(dtype),  # w1
                (0.02 * jax.random.normal(next(ks), (d, h), jnp.float32)).astype(dtype),  # w3
                (0.02 * jax.random.normal(next(ks), (h, d), jnp.float32)).astype(dtype))  # w2

    # NOTE: the torch module zero-inits adaLN weights; random values here
    # exercise the full data path (semantics identical).
    adaln_w, adaln_b = lin(dim, 12 * dim)

    attn = {}
    for stream in ('i', 't'):
        qw, qb = lin(dim, inner)
        kw, kb = lin(dim, inner)
        vw, vb = lin(dim, inner)
        attn[f'qkv_{stream}_w'] = jnp.concatenate([qw, kw, vw], axis=1)
        attn[f'qkv_{stream}_b'] = jnp.concatenate([qb, kb, vb], axis=0)
    attn['to_out_w'], attn['to_out_b'] = lin(inner, dim)
    attn['to_out_t_w'], attn['to_out_t_b'] = lin(inner, dim)
    for n in ('q_rms_w', 'k_rms_w', 'q_rms_t_w', 'k_rms_t_w'):
        attn[n] = jnp.ones((inner,), dtype)

    ff_i = {
        'gate_w': (0.02 * jax.random.normal(next(ks), (num_routed_experts, dim),
                                            jnp.float32)).astype(dtype),
        'experts': [ff(dim, 4 * dim) for _ in range(num_routed_experts)],
        'shared': ff(dim, (4 * dim) // 2),
        'top_k': num_activated_experts,
    }
    ff_t = ff(dim, 4 * dim)

    return {'adaln_w': adaln_w, 'adaln_b': adaln_b, 'attn': attn,
            'ff_i': ff_i, 'ff_t': ff_t}


def make_rope(B, S, head_dim, theta=10000.0, dtype=jnp.float32):
    half = head_dim // 2
    pos = jnp.arange(S, dtype=jnp.float32)[:, None]
    freqs = 1.0 / (theta ** (jnp.arange(half, dtype=jnp.float32) / half))
    ang = pos * freqs[None, :]                              # (S, half)
    cos, sin = jnp.cos(ang), jnp.sin(ang)
    rot = jnp.stack([jnp.stack([cos, -sin], axis=-1),
                     jnp.stack([sin, cos], axis=-1)], axis=-2)   # (S, half, 2, 2)
    return jnp.broadcast_to(rot[None, :, None], (B, S, 1, half, 2, 2)).astype(dtype)


# --------------------------------------------------------------------------

if __name__ == "__main__":
    # small demo shapes; head_dim=128 matches production HiDream and keeps the
    # attention lane blocks 128-wide.
    DIM, HEADS, HEAD_DIM = 128, 2, 128          # inner_dim = 256
    B, S_IMG, S_TXT = 2, 16, 8
    N_ROUTED, N_ACTIVE = 4, 2
    DTYPE = jnp.bfloat16

    key = jax.random.PRNGKey(0)
    kp, ki, kt, ka = jax.random.split(key, 4)
    params = init_params(kp, DIM, HEADS, HEAD_DIM, N_ROUTED, N_ACTIVE, dtype=DTYPE)

    image_tokens = jax.random.normal(ki, (B, S_IMG, DIM), jnp.float32).astype(DTYPE)
    text_tokens = jax.random.normal(kt, (B, S_TXT, DIM), jnp.float32).astype(DTYPE)
    adaln_input = jax.random.normal(ka, (B, DIM), jnp.float32).astype(DTYPE)
    rope = make_rope(B, S_IMG + S_TXT, HEAD_DIM)

    fwd = jax.jit(functools.partial(hidream_block_forward, params, HEADS, HEAD_DIM))
    out_i, out_t = fwd(image_tokens, None, text_tokens, adaln_input, rope)
    jax.block_until_ready((out_i, out_t))

    assert out_i.shape == (B, S_IMG, DIM) and out_i.dtype == DTYPE
    assert out_t.shape == (B, S_TXT, DIM) and out_t.dtype == DTYPE
    assert bool(jnp.isfinite(out_i.astype(jnp.float32)).all())
    assert bool(jnp.isfinite(out_t.astype(jnp.float32)).all())
    print("KERNEL_OK")
</pallas_src>

<mosaic_0001>
module attributes {stable_mosaic.version = 11 : i64} {
  func.func @_matmul_bias_kernel(%arg0: i32, %arg1: i32, %arg2: i32, %arg3: memref<2x128xbf16, #tpu.memory_space<vmem>>, %arg4: memref<128x768xbf16, #tpu.memory_space<vmem>>, %arg5: memref<1x768xbf16, #tpu.memory_space<vmem>>, %arg6: memref<2x768xbf16, #tpu.memory_space<vmem>>, %arg7: memref<2x768xf32, #tpu.memory_space<vmem>>) attributes {dimension_semantics = [#tpu.dimension_semantics<parallel>, #tpu.dimension_semantics<parallel>, #tpu.dimension_semantics<arbitrary>], iteration_bounds = array<i64: 1, 2, 1>, scalar_prefetch = 0 : i64, scratch_operands = 1 : i64, tpu.core_type = #tpu.core_type<tc>, window_params = [{transform_indices = @transform_0, window_bounds = array<i64: 2, 128>}, {transform_indices = @transform_1, window_bounds = array<i64: 128, 768>}, {transform_indices = @transform_2, window_bounds = array<i64: 1, 768>}, {transform_indices = @transform_3, window_bounds = array<i64: 2, 768>}]} {
    %c0_i32 = arith.constant 0 : i32
    %0 = arith.cmpi eq, %arg2, %c0_i32 : i32
    %1 = arith.extui %0 : i1 to i32
    %c0_i32_0 = arith.constant 0 : i32
    %2 = arith.cmpi ne, %1, %c0_i32_0 : i32
    scf.if %2 {
      %cst_10 = arith.constant 0.000000e+00 : f32
      %12 = vector.broadcast %cst_10 : f32 to vector<2x768xf32>
      %c0_11 = arith.constant 0 : index
      %c0_12 = arith.constant 0 : index
      %13 = vector.load %arg7[%c0_11, %c0_12] : memref<2x768xf32, #tpu.memory_space<vmem>>, vector<2x768xf32>
      tpu.vector_store %arg7[%c0_11, %c0_12], %12 {strides = array<i32>} : memref<2x768xf32, #tpu.memory_space<vmem>>, vector<2x768xf32>,
    } else {
    }
    %c0 = arith.constant 0 : index
    %c0_1 = arith.constant 0 : index
    %3 = vector.load %arg7[%c0, %c0_1] : memref<2x768xf32, #tpu.memory_space<vmem>>, vector<2x768xf32>
    %c0_2 = arith.constant 0 : index
    %c0_3 = arith.constant 0 : index
    %4 = vector.load %arg3[%c0_2, %c0_3] : memref<2x128xbf16, #tpu.memory_space<vmem>>, vector<2x128xbf16>
    %c0_4 = arith.constant 0 : index
    %c0_5 = arith.constant 0 : index
    %5 = vector.load %arg4[%c0_4, %c0_5] : memref<128x768xbf16, #tpu.memory_space<vmem>>, vector<128x768xbf16>
    %cst = arith.constant dense<0.000000e+00> : vector<2x768xf32>
    %6 = tpu.matmul %4, %5, %cst {dimension_numbers = #tpu.dot_dimension_numbers<[1], [0], [0], [1], [0, 0, 1, 1], [], []>} : vector<2x128xbf16>, vector<128x768xbf16>, vector<2x768xf32> -> vector<2x768xf32>
    %7 = arith.addf %3, %6 : vector<2x768xf32>
    %c0_6 = arith.constant 0 : index
    %c0_7 = arith.constant 0 : index
    %8 = vector.load %arg7[%c0_6, %c0_7] : memref<2x768xf32, #tpu.memory_space<vmem>>, vector<2x768xf32>
    tpu.vector_store %arg7[%c0_6, %c0_7], %7 {strides = array<i32>} : memref<2x768xf32, #tpu.memory_space<vmem>>, vector<2x768xf32>,
    %c0_i32_8 = arith.constant 0 : i32
    %9 = arith.cmpi eq, %arg2, %c0_i32_8 : i32
    %10 = arith.extui %9 : i1 to i32
    %c0_i32_9 = arith.constant 0 : i32
    %11 = arith.cmpi ne, %10, %c0_i32_9 : i32
    scf.if %11 {
      %c0_10 = arith.constant 0 : index
      %c0_11 = arith.constant 0 : index
      %12 = vector.load %arg7[%c0_10, %c0_11] : memref<2x768xf32, #tpu.memory_space<vmem>>, vector<2x768xf32>
      %c0_12 = arith.constant 0 : index
      %c0_13 = arith.constant 0 : index
      %13 = vector.load %arg5[%c0_12, %c0_13] : memref<1x768xbf16, #tpu.memory_space<vmem>>, vector<1x768xbf16>
      %14 = arith.extf %13 : vector<1x768xbf16> to vector<1x768xf32>
      %15 = vector.broadcast %14 : vector<1x768xf32> to vector<2x768xf32>
      %16 = arith.addf %12, %15 : vector<2x768xf32>
      %17 = arith.truncf %16 : vector<2x768xf32> to vector<2x768xbf16>
      %c0_14 = arith.constant 0 : index
      %c0_15 = arith.constant 0 : index
      %18 = vector.load %arg6[%c0_14, %c0_15] : memref<2x768xbf16, #tpu.memory_space<vmem>>, vector<2x768xbf16>
      tpu.vector_store %arg6[%c0_14, %c0_15], %17 {strides = array<i32>} : memref<2x768xbf16, #tpu.memory_space<vmem>>, vector<2x768xbf16>,
    } else {
    }
    return
  }
  func.func @transform_0(%arg0: i32, %arg1: i32, %arg2: i32) -> (i32, i32) {
    %c0_i32 = arith.constant 0 : i32
    return %arg0, %arg2 : i32, i32
  }
  func.func @transform_1(%arg0: i32, %arg1: i32, %arg2: i32) -> (i32, i32) {
    %c0_i32 = arith.constant 0 : i32
    return %arg2, %arg1 : i32, i32
  }
  func.func @transform_2(%arg0: i32, %arg1: i32, %arg2: i32) -> (i32, i32) {
    %c0_i32 = arith.constant 0 : i32
    %c0_i32_0 = arith.constant 0 : i32
    return %c0_i32, %arg1 : i32, i32
  }
  func.func @transform_3(%arg0: i32, %arg1: i32, %arg2: i32) -> (i32, i32) {
    %c0_i32 = arith.constant 0 : i32
    return %arg0, %arg1 : i32, i32
  }
}

module attributes {stable_mosaic.version = 11 : i64} {
  func.func @_matmul_bias_kernel(%arg0: i32, %arg1: i32, %arg2: i32, %arg3: memref<32x128xbf16, #tpu.memory_space<vmem>>, %arg4: memref<128x768xbf16, #tpu.memory_space<vmem>>, %arg5: memref<1x768xbf16, #tpu.memory_space<vmem>>, %arg6: memref<32x768xbf16, #tpu.memory_space<vmem>>, %arg7: memref<32x768xf32, #tpu.memory_space<vmem>>) attributes {dimension_semantics = [#tpu.dimension_semantics<parallel>, #tpu.dimension_semantics<parallel>, #tpu.dimension_semantics<arbitrary>], iteration_bounds = array<i64: 1, 1, 1>, scalar_prefetch = 0 : i64, scratch_operands = 1 : i64, tpu.core_type = #tpu.core_type<tc>, window_params = [{transform_indices = @transform_0, window_bounds = array<i64: 32, 128>}, {transform_indices = @transform_1, window_bounds = array<i64: 128, 768>}, {transform_indices = @transform_2, window_bounds = array<i64: 1, 768>}, {transform_indices = @transform_3, window_bounds = array<i64: 32, 768>}]} {
    %c0_i32 = arith.constant 0 : i32
    %0 = arith.cmpi eq, %arg2, %c0_i32 : i32
    %1 = arith.extui %0 : i1 to i32
    %c0_i32_0 = arith.constant 0 : i32
    %2 = arith.cmpi ne, %1, %c0_i32_0 : i32
    scf.if %2 {
      %cst_10 = arith.constant 0.000000e+00 : f32
      %12 = vector.broadcast %cst_10 : f32 to vector<32x768xf32>
      %c0_11 = arith.constant 0 : index
      %c0_12 = arith.constant 0 : index
      %13 = vector.load %arg7[%c0_11, %c0_12] : memref<32x768xf32, #tpu.memory_space<vmem>>, vector<32x768xf32>
      tpu.vector_store %arg7[%c0_11, %c0_12], %12 {strides = array<i32>} : memref<32x768xf32, #tpu.memory_space<vmem>>, vector<32x768xf32>,
    } else {
    }
    %c0 = arith.constant 0 : index
    %c0_1 = arith.constant 0 : index
    %3 = vector.load %arg7[%c0, %c0_1] : memref<32x768xf32, #tpu.memory_space<vmem>>, vector<32x768xf32>
    %c0_2 = arith.constant 0 : index
    %c0_3 = arith.constant 0 : index
    %4 = vector.load %arg3[%c0_2, %c0_3] : memref<32x128xbf16, #tpu.memory_space<vmem>>, vector<32x128xbf16>
    %c0_4 = arith.constant 0 : index
    %c0_5 = arith.constant 0 : index
    %5 = vector.load %arg4[%c0_4, %c0_5] : memref<128x768xbf16, #tpu.memory_space<vmem>>, vector<128x768xbf16>
    %cst = arith.constant dense<0.000000e+00> : vector<32x768xf32>
    %6 = tpu.matmul %4, %5, %cst {dimension_numbers = #tpu.dot_dimension_numbers<[1], [0], [0], [1], [0, 0, 1, 1], [], []>} : vector<32x128xbf16>, vector<128x768xbf16>, vector<32x768xf32> -> vector<32x768xf32>
    %7 = arith.addf %3, %6 : vector<32x768xf32>
    %c0_6 = arith.constant 0 : index
    %c0_7 = arith.constant 0 : index
    %8 = vector.load %arg7[%c0_6, %c0_7] : memref<32x768xf32, #tpu.memory_space<vmem>>, vector<32x768xf32>
    tpu.vector_store %arg7[%c0_6, %c0_7], %7 {strides = array<i32>} : memref<32x768xf32, #tpu.memory_space<vmem>>, vector<32x768xf32>,
    %c0_i32_8 = arith.constant 0 : i32
    %9 = arith.cmpi eq, %arg2, %c0_i32_8 : i32
    %10 = arith.extui %9 : i1 to i32
    %c0_i32_9 = arith.constant 0 : i32
    %11 = arith.cmpi ne, %10, %c0_i32_9 : i32
    scf.if %11 {
      %c0_10 = arith.constant 0 : index
      %c0_11 = arith.constant 0 : index
      %12 = vector.load %arg7[%c0_10, %c0_11] : memref<32x768xf32, #tpu.memory_space<vmem>>, vector<32x768xf32>
      %c0_12 = arith.constant 0 : index
      %c0_13 = arith.constant 0 : index
      %13 = vector.load %arg5[%c0_12, %c0_13] : memref<1x768xbf16, #tpu.memory_space<vmem>>, vector<1x768xbf16>
      %14 = arith.extf %13 : vector<1x768xbf16> to vector<1x768xf32>
      %15 = vector.broadcast %14 : vector<1x768xf32> to vector<32x768xf32>
      %16 = arith.addf %12, %15 : vector<32x768xf32>
      %17 = arith.truncf %16 : vector<32x768xf32> to vector<32x768xbf16>
      %c0_14 = arith.constant 0 : index
      %c0_15 = arith.constant 0 : index
      %18 = vector.load %arg6[%c0_14, %c0_15] : memref<32x768xbf16, #tpu.memory_space<vmem>>, vector<32x768xbf16>
      tpu.vector_store %arg6[%c0_14, %c0_15], %17 {strides = array<i32>} : memref<32x768xbf16, #tpu.memory_space<vmem>>, vector<32x768xbf16>,
    } else {
    }
    return
  }
  func.func @transform_0(%arg0: i32, %arg1: i32, %arg2: i32) -> (i32, i32) {
    %c0_i32 = arith.constant 0 : i32
    return %arg0, %arg2 : i32, i32
  }
  func.func @transform_1(%arg0: i32, %arg1: i32, %arg2: i32) -> (i32, i32) {
    %c0_i32 = arith.constant 0 : i32
    return %arg2, %arg1 : i32, i32
  }
  func.func @transform_2(%arg0: i32, %arg1: i32, %arg2: i32) -> (i32, i32) {
    %c0_i32 = arith.constant 0 : i32
    %c0_i32_0 = arith.constant 0 : i32
    return %c0_i32, %arg1 : i32, i32
  }
  func.func @transform_3(%arg0: i32, %arg1: i32, %arg2: i32) -> (i32, i32) {
    %c0_i32 = arith.constant 0 : i32
    return %arg0, %arg1 : i32, i32
  }
}

module attributes {stable_mosaic.version = 11 : i64} {
  func.func @_ln_modulate_kernel(%arg0: i32, %arg1: i32, %arg2: memref<1x16x128xbf16, #tpu.memory_space<vmem>>, %arg3: memref<1x1x128xbf16, #tpu.memory_space<vmem>>, %arg4: memref<1x1x128xbf16, #tpu.memory_space<vmem>>, %arg5: memref<1x16x128xbf16, #tpu.memory_space<vmem>>) attributes {dimension_semantics = [#tpu.dimension_semantics<parallel>, #tpu.dimension_semantics<parallel>], iteration_bounds = array<i64: 2, 1>, scalar_prefetch = 0 : i64, scratch_operands = 0 : i64, tpu.core_type = #tpu.core_type<tc>, window_params = [{transform_indices = @transform_0, window_bounds = array<i64: 1, 16, 128>}, {transform_indices = @transform_1, window_bounds = array<i64: 1, 1, 128>}, {transform_indices = @transform_2, window_bounds = array<i64: 1, 1, 128>}, {transform_indices = @transform_3, window_bounds = array<i64: 1, 16, 128>}]} {
    %c0 = arith.constant 0 : index
    %c0_0 = arith.constant 0 : index
    %c0_1 = arith.constant 0 : index
    %0 = vector.load %arg2[%c0, %c0_0, %c0_1] : memref<1x16x128xbf16, #tpu.memory_space<vmem>>, vector<1x16x128xbf16>
    %1 = vector.shape_cast %0 : vector<1x16x128xbf16> to vector<16x128xbf16>
    %2 = arith.extf %1 : vector<16x128xbf16> to vector<16x128xf32>
    %cst = arith.constant dense<0.000000e+00> : vector<16xf32>
    %3 = vector.multi_reduction <add>, %2, %cst [1] : vector<16x128xf32> to vector<16xf32>
    %4 = vector.shape_cast %3 : vector<16xf32> to vector<16x1xf32>
    %cst_2 = arith.constant 1.280000e+02 : f32
    %5 = vector.broadcast %cst_2 : f32 to vector<16x1xf32>
    %6 = arith.divf %4, %5 : vector<16x1xf32>
    %7 = vector.broadcast %6 : vector<16x1xf32> to vector<16x128xf32>
    %8 = arith.subf %2, %7 : vector<16x128xf32>
    %9 = arith.mulf %8, %8 : vector<16x128xf32>
    %cst_3 = arith.constant dense<0.000000e+00> : vector<16xf32>
    %10 = vector.multi_reduction <add>, %9, %cst_3 [1] : vector<16x128xf32> to vector<16xf32>
    %11 = vector.shape_cast %10 : vector<16xf32> to vector<16x1xf32>
    %cst_4 = arith.constant 1.280000e+02 : f32
    %12 = vector.broadcast %cst_4 : f32 to vector<16x1xf32>
    %13 = arith.divf %11, %12 : vector<16x1xf32>
    %14 = vector.broadcast %6 : vector<16x1xf32> to vector<16x128xf32>
    %15 = arith.subf %2, %14 : vector<16x128xf32>
    %cst_5 = arith.constant 9.99999997E-7 : f32
    %16 = vector.broadcast %cst_5 : f32 to vector<16x1xf32>
    %17 = arith.addf %13, %16 : vector<16x1xf32>
    %18 = math.rsqrt %17 : vector<16x1xf32>
    %19 = vector.broadcast %18 : vector<16x1xf32> to vector<16x128xf32>
    %20 = arith.mulf %15, %19 : vector<16x128xf32>
    %c0_6 = arith.constant 0 : index
    %c0_7 = arith.constant 0 : index
    %c0_8 = arith.constant 0 : index
    %21 = vector.load %arg3[%c0_6, %c0_7, %c0_8] : memref<1x1x128xbf16, #tpu.memory_space<vmem>>, vector<1x1x128xbf16>
    %22 = vector.shape_cast %21 : vector<1x1x128xbf16> to vector<1x128xbf16>
    %23 = arith.extf %22 : vector<1x128xbf16> to vector<1x128xf32>
    %c0_9 = arith.constant 0 : index
    %c0_10 = arith.constant 0 : index
    %c0_11 = arith.constant 0 : index
    %24 = vector.load %arg4[%c0_9, %c0_10, %c0_11] : memref<1x1x128xbf16, #tpu.memory_space<vmem>>, vector<1x1x128xbf16>
    %25 = vector.shape_cast %24 : vector<1x1x128xbf16> to vector<1x128xbf16>
    %26 = arith.extf %25 : vector<1x128xbf16> to vector<1x128xf32>
    %cst_12 = arith.constant 1.000000e+00 : f32
    %27 = vector.broadcast %cst_12 : f32 to vector<1x128xf32>
    %28 = arith.addf %27, %23 : vector<1x128xf32>
    %29 = vector.broadcast %28 : vector<1x128xf32> to vector<16x128xf32>
    %30 = arith.mulf %20, %29 : vector<16x128xf32>
    %31 = vector.broadcast %26 : vector<1x128xf32> to vector<16x128xf32>
    %32 = arith.addf %30, %31 : vector<16x128xf32>
    %33 = vector.shape_cast %32 : vector<16x128xf32> to vector<1x16x128xf32>
    %34 = arith.truncf %33 : vector<1x16x128xf32> to vector<1x16x128xbf16>
    %c0_13 = arith.constant 0 : index
    %c0_14 = arith.constant 0 : index
    %c0_15 = arith.constant 0 : index
    %35 = vector.load %arg5[%c0_13, %c0_14, %c0_15] : memref<1x16x128xbf16, #tpu.memory_space<vmem>>, vector<1x16x128xbf16>
    tpu.vector_store %arg5[%c0_13, %c0_14, %c0_15], %34 {strides = array<i32>} : memref<1x16x128xbf16, #tpu.memory_space<vmem>>, vector<1x16x128xbf16>,
    return
  }
  func.func @transform_0(%arg0: i32, %arg1: i32) -> (i32, i32, i32) {
    %c0_i32 = arith.constant 0 : i32
    %c0_i32_0 = arith.constant 0 : i32
    return %arg0, %arg1, %c0_i32 : i32, i32, i32
  }
  func.func @transform_1(%arg0: i32, %arg1: i32) -> (i32, i32, i32) {
    %c0_i32 = arith.constant 0 : i32
    %c0_i32_0 = arith.constant 0 : i32
    %c0_i32_1 = arith.constant 0 : i32
    return %arg0, %c0_i32, %c0_i32_0 : i32, i32, i32
  }
  func.func @transform_2(%arg0: i32, %arg1: i32) -> (i32, i32, i32) {
    %c0_i32 = arith.constant 0 : i32
    %c0_i32_0 = arith.constant 0 : i32
    %c0_i32_1 = arith.constant 0 : i32
    return %arg0, %c0_i32, %c0_i32_0 : i32, i32, i32
  }
  func.func @transform_3(%arg0: i32, %arg1: i32) -> (i32, i32, i32) {
    %c0_i32 = arith.constant 0 : i32
    %c0_i32_0 = arith.constant 0 : i32
    return %arg0, %arg1, %c0_i32 : i32, i32, i32
  }
}

module attributes {stable_mosaic.version = 11 : i64} {
  func.func @_rmsnorm_kernel(%arg0: i32, %arg1: i32, %arg2: memref<1x16x256xbf16, #tpu.memory_space<vmem>>, %arg3: memref<1x256xbf16, #tpu.memory_space<vmem>>, %arg4: memref<1x16x256xbf16, #tpu.memory_space<vmem>>) attributes {dimension_semantics = [#tpu.dimension_semantics<parallel>, #tpu.dimension_semantics<parallel>], iteration_bounds = array<i64: 2, 1>, scalar_prefetch = 0 : i64, scratch_operands = 0 : i64, tpu.core_type = #tpu.core_type<tc>, window_params = [{transform_indices = @transform_0, window_bounds = array<i64: 1, 16, 256>}, {pipeline_mode = #tpu.pipeline_mode<synchronous>, transform_indices = @transform_1, window_bounds = array<i64: 1, 256>}, {transform_indices = @transform_2, window_bounds = array<i64: 1, 16, 256>}]} {
    %c0 = arith.constant 0 : index
    %c0_0 = arith.constant 0 : index
    %c0_1 = arith.constant 0 : index
    %0 = vector.load %arg2[%c0, %c0_0, %c0_1] : memref<1x16x256xbf16, #tpu.memory_space<vmem>>, vector<1x16x256xbf16>
    %1 = vector.shape_cast %0 : vector<1x16x256xbf16> to vector<16x256xbf16>
    %2 = arith.extf %1 : vector<16x256xbf16> to vector<16x256xf32>
    %3 = arith.mulf %2, %2 : vector<16x256xf32>
    %cst = arith.constant dense<0.000000e+00> : vector<16xf32>
    %4 = vector.multi_reduction <add>, %3, %cst [1] : vector<16x256xf32> to vector<16xf32>
    %5 = vector.shape_cast %4 : vector<16xf32> to vector<16x1xf32>
    %cst_2 = arith.constant 2.560000e+02 : f32
    %6 = vector.broadcast %cst_2 : f32 to vector<16x1xf32>
    %7 = arith.divf %5, %6 : vector<16x1xf32>
    %c0_3 = arith.constant 0 : index
    %c0_4 = arith.constant 0 : index
    %8 = vector.load %arg3[%c0_3, %c0_4] : memref<1x256xbf16, #tpu.memory_space<vmem>>, vector<1x256xbf16>
    %9 = arith.extf %8 : vector<1x256xbf16> to vector<1x256xf32>
    %cst_5 = arith.constant 0.0883883461 : f32
    %10 = vector.broadcast %cst_5 : f32 to vector<1x256xf32>
    %11 = arith.mulf %9, %10 : vector<1x256xf32>
    %cst_6 = arith.constant 9.99999974E-6 : f32
    %12 = vector.broadcast %cst_6 : f32 to vector<16x1xf32>
    %13 = arith.addf %7, %12 : vector<16x1xf32>
    %14 = math.rsqrt %13 : vector<16x1xf32>
    %15 = vector.broadcast %14 : vector<16x1xf32> to vector<16x256xf32>
    %16 = arith.mulf %2, %15 : vector<16x256xf32>
    %17 = vector.broadcast %11 : vector<1x256xf32> to vector<16x256xf32>
    %18 = arith.mulf %16, %17 : vector<16x256xf32>
    %19 = vector.shape_cast %18 : vector<16x256xf32> to vector<1x16x256xf32>
    %20 = arith.truncf %19 : vector<1x16x256xf32> to vector<1x16x256xbf16>
    %c0_7 = arith.constant 0 : index
    %c0_8 = arith.constant 0 : index
    %c0_9 = arith.constant 0 : index
    %21 = vector.load %arg4[%c0_7, %c0_8, %c0_9] : memref<1x16x256xbf16, #tpu.memory_space<vmem>>, vector<1x16x256xbf16>
    tpu.vector_store %arg4[%c0_7, %c0_8, %c0_9], %20 {strides = array<i32>} : memref<1x16x256xbf16, #tpu.memory_space<vmem>>, vector<1x16x256xbf16>,
    return
  }
  func.func @transform_0(%arg0: i32, %arg1: i32) -> (i32, i32, i32) {
    %c0_i32 = arith.constant 0 : i32
    %c0_i32_0 = arith.constant 0 : i32
    return %arg0, %arg1, %c0_i32 : i32, i32, i32
  }
  func.func @transform_1(%arg0: i32, %arg1: i32) -> (i32, i32) {
    %c0_i32 = arith.constant 0 : i32
    %c0_i32_0 = arith.constant 0 : i32
    %c0_i32_1 = arith.constant 0 : i32
    return %c0_i32, %c0_i32_0 : i32, i32
  }
  func.func @transform_2(%arg0: i32, %arg1: i32) -> (i32, i32, i32) {
    %c0_i32 = arith.constant 0 : i32
    %c0_i32_0 = arith.constant 0 : i32
    return %arg0, %arg1, %c0_i32 : i32, i32, i32
  }
}

module attributes {stable_mosaic.version = 11 : i64} {
  func.func @_ln_modulate_kernel(%arg0: i32, %arg1: i32, %arg2: memref<1x8x128xbf16, #tpu.memory_space<vmem>>, %arg3: memref<1x1x128xbf16, #tpu.memory_space<vmem>>, %arg4: memref<1x1x128xbf16, #tpu.memory_space<vmem>>, %arg5: memref<1x8x128xbf16, #tpu.memory_space<vmem>>) attributes {dimension_semantics = [#tpu.dimension_semantics<parallel>, #tpu.dimension_semantics<parallel>], iteration_bounds = array<i64: 2, 1>, scalar_prefetch = 0 : i64, scratch_operands = 0 : i64, tpu.core_type = #tpu.core_type<tc>, window_params = [{transform_indices = @transform_0, window_bounds = array<i64: 1, 8, 128>}, {transform_indices = @transform_1, window_bounds = array<i64: 1, 1, 128>}, {transform_indices = @transform_2, window_bounds = array<i64: 1, 1, 128>}, {transform_indices = @transform_3, window_bounds = array<i64: 1, 8, 128>}]} {
    %c0 = arith.constant 0 : index
    %c0_0 = arith.constant 0 : index
    %c0_1 = arith.constant 0 : index
    %0 = vector.load %arg2[%c0, %c0_0, %c0_1] : memref<1x8x128xbf16, #tpu.memory_space<vmem>>, vector<1x8x128xbf16>
    %1 = vector.shape_cast %0 : vector<1x8x128xbf16> to vector<8x128xbf16>
    %2 = arith.extf %1 : vector<8x128xbf16> to vector<8x128xf32>
    %cst = arith.constant dense<0.000000e+00> : vector<8xf32>
    %3 = vector.multi_reduction <add>, %2, %cst [1] : vector<8x128xf32> to vector<8xf32>
    %4 = vector.shape_cast %3 : vector<8xf32> to vector<8x1xf32>
    %cst_2 = arith.constant 1.280000e+02 : f32
    %5 = vector.broadcast %cst_2 : f32 to vector<8x1xf32>
    %6 = arith.divf %4, %5 : vector<8x1xf32>
    %7 = vector.broadcast %6 : vector<8x1xf32> to vector<8x128xf32>
    %8 = arith.subf %2, %7 : vector<8x128xf32>
    %9 = arith.mulf %8, %8 : vector<8x128xf32>
    %cst_3 = arith.constant dense<0.000000e+00> : vector<8xf32>
    %10 = vector.multi_reduction <add>, %9, %cst_3 [1] : vector<8x128xf32> to vector<8xf32>
    %11 = vector.shape_cast %10 : vector<8xf32> to vector<8x1xf32>
    %cst_4 = arith.constant 1.280000e+02 : f32
    %12 = vector.broadcast %cst_4 : f32 to vector<8x1xf32>
    %13 = arith.divf %11, %12 : vector<8x1xf32>
    %14 = vector.broadcast %6 : vector<8x1xf32> to vector<8x128xf32>
    %15 = arith.subf %2, %14 : vector<8x128xf32>
    %cst_5 = arith.constant 9.99999997E-7 : f32
    %16 = vector.broadcast %cst_5 : f32 to vector<8x1xf32>
    %17 = arith.addf %13, %16 : vector<8x1xf32>
    %18 = math.rsqrt %17 : vector<8x1xf32>
    %19 = vector.broadcast %18 : vector<8x1xf32> to vector<8x128xf32>
    %20 = arith.mulf %15, %19 : vector<8x128xf32>
    %c0_6 = arith.constant 0 : index
    %c0_7 = arith.constant 0 : index
    %c0_8 = arith.constant 0 : index
    %21 = vector.load %arg3[%c0_6, %c0_7, %c0_8] : memref<1x1x128xbf16, #tpu.memory_space<vmem>>, vector<1x1x128xbf16>
    %22 = vector.shape_cast %21 : vector<1x1x128xbf16> to vector<1x128xbf16>
    %23 = arith.extf %22 : vector<1x128xbf16> to vector<1x128xf32>
    %c0_9 = arith.constant 0 : index
    %c0_10 = arith.constant 0 : index
    %c0_11 = arith.constant 0 : index
    %24 = vector.load %arg4[%c0_9, %c0_10, %c0_11] : memref<1x1x128xbf16, #tpu.memory_space<vmem>>, vector<1x1x128xbf16>
    %25 = vector.shape_cast %24 : vector<1x1x128xbf16> to vector<1x128xbf16>
    %26 = arith.extf %25 : vector<1x128xbf16> to vector<1x128xf32>
    %cst_12 = arith.constant 1.000000e+00 : f32
    %27 = vector.broadcast %cst_12 : f32 to vector<1x128xf32>
    %28 = arith.addf %27, %23 : vector<1x128xf32>
    %29 = vector.broadcast %28 : vector<1x128xf32> to vector<8x128xf32>
    %30 = arith.mulf %20, %29 : vector<8x128xf32>
    %31 = vector.broadcast %26 : vector<1x128xf32> to vector<8x128xf32>
    %32 = arith.addf %30, %31 : vector<8x128xf32>
    %33 = vector.shape_cast %32 : vector<8x128xf32> to vector<1x8x128xf32>
    %34 = arith.truncf %33 : vector<1x8x128xf32> to vector<1x8x128xbf16>
    %c0_13 = arith.constant 0 : index
    %c0_14 = arith.constant 0 : index
    %c0_15 = arith.constant 0 : index
    %35 = vector.load %arg5[%c0_13, %c0_14, %c0_15] : memref<1x8x128xbf16, #tpu.memory_space<vmem>>, vector<1x8x128xbf16>
    tpu.vector_store %arg5[%c0_13, %c0_14, %c0_15], %34 {strides = array<i32>} : memref<1x8x128xbf16, #tpu.memory_space<vmem>>, vector<1x8x128xbf16>,
    return
  }
  func.func @transform_0(%arg0: i32, %arg1: i32) -> (i32, i32, i32) {
    %c0_i32 = arith.constant 0 : i32
    %c0_i32_0 = arith.constant 0 : i32
    return %arg0, %arg1, %c0_i32 : i32, i32, i32
  }
  func.func @transform_1(%arg0: i32, %arg1: i32) -> (i32, i32, i32) {
    %c0_i32 = arith.constant 0 : i32
    %c0_i32_0 = arith.constant 0 : i32
    %c0_i32_1 = arith.constant 0 : i32
    return %arg0, %c0_i32, %c0_i32_0 : i32, i32, i32
  }
  func.func @transform_2(%arg0: i32, %arg1: i32) -> (i32, i32, i32) {
    %c0_i32 = arith.constant 0 : i32
    %c0_i32_0 = arith.constant 0 : i32
    %c0_i32_1 = arith.constant 0 : i32
    return %arg0, %c0_i32, %c0_i32_0 : i32, i32, i32
  }
  func.func @transform_3(%arg0: i32, %arg1: i32) -> (i32, i32, i32) {
    %c0_i32 = arith.constant 0 : i32
    %c0_i32_0 = arith.constant 0 : i32
    return %arg0, %arg1, %c0_i32 : i32, i32, i32
  }
}

module attributes {stable_mosaic.version = 11 : i64} {
  func.func @_matmul_bias_kernel(%arg0: i32, %arg1: i32, %arg2: i32, %arg3: memref<16x128xbf16, #tpu.memory_space<vmem>>, %arg4: memref<128x768xbf16, #tpu.memory_space<vmem>>, %arg5: memref<1x768xbf16, #tpu.memory_space<vmem>>, %arg6: memref<16x768xbf16, #tpu.memory_space<vmem>>, %arg7: memref<16x768xf32, #tpu.memory_space<vmem>>) attributes {dimension_semantics = [#tpu.dimension_semantics<parallel>, #tpu.dimension_semantics<parallel>, #tpu.dimension_semantics<arbitrary>], iteration_bounds = array<i64: 1, 1, 1>, scalar_prefetch = 0 : i64, scratch_operands = 1 : i64, tpu.core_type = #tpu.core_type<tc>, window_params = [{transform_indices = @transform_0, window_bounds = array<i64: 16, 128>}, {transform_indices = @transform_1, window_bounds = array<i64: 128, 768>}, {transform_indices = @transform_2, window_bounds = array<i64: 1, 768>}, {transform_indices = @transform_3, window_bounds = array<i64: 16, 768>}]} {
    %c0_i32 = arith.constant 0 : i32
    %0 = arith.cmpi eq, %arg2, %c0_i32 : i32
    %1 = arith.extui %0 : i1 to i32
    %c0_i32_0 = arith.constant 0 : i32
    %2 = arith.cmpi ne, %1, %c0_i32_0 : i32
    scf.if %2 {
      %cst_10 = arith.constant 0.000000e+00 : f32
      %12 = vector.broadcast %cst_10 : f32 to vector<16x768xf32>
      %c0_11 = arith.constant 0 : index
      %c0_12 = arith.constant 0 : index
      %13 = vector.load %arg7[%c0_11, %c0_12] : memref<16x768xf32, #tpu.memory_space<vmem>>, vector<16x768xf32>
      tpu.vector_store %arg7[%c0_11, %c0_12], %12 {strides = array<i32>} : memref<16x768xf32, #tpu.memory_space<vmem>>, vector<16x768xf32>,
    } else {
    }
    %c0 = arith.constant 0 : index
    %c0_1 = arith.constant 0 : index
    %3 = vector.load %arg7[%c0, %c0_1] : memref<16x768xf32, #tpu.memory_space<vmem>>, vector<16x768xf32>
    %c0_2 = arith.constant 0 : index
    %c0_3 = arith.constant 0 : index
    %4 = vector.load %arg3[%c0_2, %c0_3] : memref<16x128xbf16, #tpu.memory_space<vmem>>, vector<16x128xbf16>
    %c0_4 = arith.constant 0 : index
    %c0_5 = arith.constant 0 : index
    %5 = vector.load %arg4[%c0_4, %c0_5] : memref<128x768xbf16, #tpu.memory_space<vmem>>, vector<128x768xbf16>
    %cst = arith.constant dense<0.000000e+00> : vector<16x768xf32>
    %6 = tpu.matmul %4, %5, %cst {dimension_numbers = #tpu.dot_dimension_numbers<[1], [0], [0], [1], [0, 0, 1, 1], [], []>} : vector<16x128xbf16>, vector<128x768xbf16>, vector<16x768xf32> -> vector<16x768xf32>
    %7 = arith.addf %3, %6 : vector<16x768xf32>
    %c0_6 = arith.constant 0 : index
    %c0_7 = arith.constant 0 : index
    %8 = vector.load %arg7[%c0_6, %c0_7] : memref<16x768xf32, #tpu.memory_space<vmem>>, vector<16x768xf32>
    tpu.vector_store %arg7[%c0_6, %c0_7], %7 {strides = array<i32>} : memref<16x768xf32, #tpu.memory_space<vmem>>, vector<16x768xf32>,
    %c0_i32_8 = arith.constant 0 : i32
    %9 = arith.cmpi eq, %arg2, %c0_i32_8 : i32
    %10 = arith.extui %9 : i1 to i32
    %c0_i32_9 = arith.constant 0 : i32
    %11 = arith.cmpi ne, %10, %c0_i32_9 : i32
    scf.if %11 {
      %c0_10 = arith.constant 0 : index
      %c0_11 = arith.constant 0 : index
      %12 = vector.load %arg7[%c0_10, %c0_11] : memref<16x768xf32, #tpu.memory_space<vmem>>, vector<16x768xf32>
      %c0_12 = arith.constant 0 : index
      %c0_13 = arith.constant 0 : index
      %13 = vector.load %arg5[%c0_12, %c0_13] : memref<1x768xbf16, #tpu.memory_space<vmem>>, vector<1x768xbf16>
      %14 = arith.extf %13 : vector<1x768xbf16> to vector<1x768xf32>
      %15 = vector.broadcast %14 : vector<1x768xf32> to vector<16x768xf32>
      %16 = arith.addf %12, %15 : vector<16x768xf32>
      %17 = arith.truncf %16 : vector<16x768xf32> to vector<16x768xbf16>
      %c0_14 = arith.constant 0 : index
      %c0_15 = arith.constant 0 : index
      %18 = vector.load %arg6[%c0_14, %c0_15] : memref<16x768xbf16, #tpu.memory_space<vmem>>, vector<16x768xbf16>
      tpu.vector_store %arg6[%c0_14, %c0_15], %17 {strides = array<i32>} : memref<16x768xbf16, #tpu.memory_space<vmem>>, vector<16x768xbf16>,
    } else {
    }
    return
  }
  func.func @transform_0(%arg0: i32, %arg1: i32, %arg2: i32) -> (i32, i32) {
    %c0_i32 = arith.constant 0 : i32
    return %arg0, %arg2 : i32, i32
  }
  func.func @transform_1(%arg0: i32, %arg1: i32, %arg2: i32) -> (i32, i32) {
    %c0_i32 = arith.constant 0 : i32
    return %arg2, %arg1 : i32, i32
  }
  func.func @transform_2(%arg0: i32, %arg1: i32, %arg2: i32) -> (i32, i32) {
    %c0_i32 = arith.constant 0 : i32
    %c0_i32_0 = arith.constant 0 : i32
    return %c0_i32, %arg1 : i32, i32
  }
  func.func @transform_3(%arg0: i32, %arg1: i32, %arg2: i32) -> (i32, i32) {
    %c0_i32 = arith.constant 0 : i32
    return %arg0, %arg1 : i32, i32
  }
}

module attributes {stable_mosaic.version = 11 : i64} {
  func.func @_rmsnorm_kernel(%arg0: i32, %arg1: i32, %arg2: memref<1x8x256xbf16, #tpu.memory_space<vmem>>, %arg3: memref<1x256xbf16, #tpu.memory_space<vmem>>, %arg4: memref<1x8x256xbf16, #tpu.memory_space<vmem>>) attributes {dimension_semantics = [#tpu.dimension_semantics<parallel>, #tpu.dimension_semantics<parallel>], iteration_bounds = array<i64: 2, 1>, scalar_prefetch = 0 : i64, scratch_operands = 0 : i64, tpu.core_type = #tpu.core_type<tc>, window_params = [{transform_indices = @transform_0, window_bounds = array<i64: 1, 8, 256>}, {pipeline_mode = #tpu.pipeline_mode<synchronous>, transform_indices = @transform_1, window_bounds = array<i64: 1, 256>}, {transform_indices = @transform_2, window_bounds = array<i64: 1, 8, 256>}]} {
    %c0 = arith.constant 0 : index
    %c0_0 = arith.constant 0 : index
    %c0_1 = arith.constant 0 : index
    %0 = vector.load %arg2[%c0, %c0_0, %c0_1] : memref<1x8x256xbf16, #tpu.memory_space<vmem>>, vector<1x8x256xbf16>
    %1 = vector.shape_cast %0 : vector<1x8x256xbf16> to vector<8x256xbf16>
    %2 = arith.extf %1 : vector<8x256xbf16> to vector<8x256xf32>
    %3 = arith.mulf %2, %2 : vector<8x256xf32>
    %cst = arith.constant dense<0.000000e+00> : vector<8xf32>
    %4 = vector.multi_reduction <add>, %3, %cst [1] : vector<8x256xf32> to vector<8xf32>
    %5 = vector.shape_cast %4 : vector<8xf32> to vector<8x1xf32>
    %cst_2 = arith.constant 2.560000e+02 : f32
    %6 = vector.broadcast %cst_2 : f32 to vector<8x1xf32>
    %7 = arith.divf %5, %6 : vector<8x1xf32>
    %c0_3 = arith.constant 0 : index
    %c0_4 = arith.constant 0 : index
    %8 = vector.load %arg3[%c0_3, %c0_4] : memref<1x256xbf16, #tpu.memory_space<vmem>>, vector<1x256xbf16>
    %9 = arith.extf %8 : vector<1x256xbf16> to vector<1x256xf32>
    %cst_5 = arith.constant 0.0883883461 : f32
    %10 = vector.broadcast %cst_5 : f32 to vector<1x256xf32>
    %11 = arith.mulf %9, %10 : vector<1x256xf32>
    %cst_6 = arith.constant 9.99999974E-6 : f32
    %12 = vector.broadcast %cst_6 : f32 to vector<8x1xf32>
    %13 = arith.addf %7, %12 : vector<8x1xf32>
    %14 = math.rsqrt %13 : vector<8x1xf32>
    %15 = vector.broadcast %14 : vector<8x1xf32> to vector<8x256xf32>
    %16 = arith.mulf %2, %15 : vector<8x256xf32>
    %17 = vector.broadcast %11 : vector<1x256xf32> to vector<8x256xf32>
    %18 = arith.mulf %16, %17 : vector<8x256xf32>
    %19 = vector.shape_cast %18 : vector<8x256xf32> to vector<1x8x256xf32>
    %20 = arith.truncf %19 : vector<1x8x256xf32> to vector<1x8x256xbf16>
    %c0_7 = arith.constant 0 : index
    %c0_8 = arith.constant 0 : index
    %c0_9 = arith.constant 0 : index
    %21 = vector.load %arg4[%c0_7, %c0_8, %c0_9] : memref<1x8x256xbf16, #tpu.memory_space<vmem>>, vector<1x8x256xbf16>
    tpu.vector_store %arg4[%c0_7, %c0_8, %c0_9], %20 {strides = array<i32>} : memref<1x8x256xbf16, #tpu.memory_space<vmem>>, vector<1x8x256xbf16>,
    return
  }
  func.func @transform_0(%arg0: i32, %arg1: i32) -> (i32, i32, i32) {
    %c0_i32 = arith.constant 0 : i32
    %c0_i32_0 = arith.constant 0 : i32
    return %arg0, %arg1, %c0_i32 : i32, i32, i32
  }
  func.func @transform_1(%arg0: i32, %arg1: i32) -> (i32, i32) {
    %c0_i32 = arith.constant 0 : i32
    %c0_i32_0 = arith.constant 0 : i32
    %c0_i32_1 = arith.constant 0 : i32
    return %c0_i32, %c0_i32_0 : i32, i32
  }
  func.func @transform_2(%arg0: i32, %arg1: i32) -> (i32, i32, i32) {
    %c0_i32 = arith.constant 0 : i32
    %c0_i32_0 = arith.constant 0 : i32
    return %arg0, %arg1, %c0_i32 : i32, i32, i32
  }
}

module attributes {stable_mosaic.version = 11 : i64} {
  func.func @_rmsnorm_kernel(%arg0: i32, %arg1: i32, %arg2: memref<1x16x256xbf16, #tpu.memory_space<vmem>>, %arg3: memref<1x256xbf16, #tpu.memory_space<vmem>>, %arg4: memref<1x16x256xbf16, #tpu.memory_space<vmem>>) attributes {dimension_semantics = [#tpu.dimension_semantics<parallel>, #tpu.dimension_semantics<parallel>], iteration_bounds = array<i64: 2, 1>, scalar_prefetch = 0 : i64, scratch_operands = 0 : i64, tpu.core_type = #tpu.core_type<tc>, window_params = [{transform_indices = @transform_0, window_bounds = array<i64: 1, 16, 256>}, {pipeline_mode = #tpu.pipeline_mode<synchronous>, transform_indices = @transform_1, window_bounds = array<i64: 1, 256>}, {transform_indices = @transform_2, window_bounds = array<i64: 1, 16, 256>}]} {
    %c0 = arith.constant 0 : index
    %c0_0 = arith.constant 0 : index
    %c0_1 = arith.constant 0 : index
    %0 = vector.load %arg2[%c0, %c0_0, %c0_1] : memref<1x16x256xbf16, #tpu.memory_space<vmem>>, vector<1x16x256xbf16>
    %1 = vector.shape_cast %0 : vector<1x16x256xbf16> to vector<16x256xbf16>
    %2 = arith.extf %1 : vector<16x256xbf16> to vector<16x256xf32>
    %3 = arith.mulf %2, %2 : vector<16x256xf32>
    %cst = arith.constant dense<0.000000e+00> : vector<16xf32>
    %4 = vector.multi_reduction <add>, %3, %cst [1] : vector<16x256xf32> to vector<16xf32>
    %5 = vector.shape_cast %4 : vector<16xf32> to vector<16x1xf32>
    %cst_2 = arith.constant 2.560000e+02 : f32
    %6 = vector.broadcast %cst_2 : f32 to vector<16x1xf32>
    %7 = arith.divf %5, %6 : vector<16x1xf32>
    %c0_3 = arith.constant 0 : index
    %c0_4 = arith.constant 0 : index
    %8 = vector.load %arg3[%c0_3, %c0_4] : memref<1x256xbf16, #tpu.memory_space<vmem>>, vector<1x256xbf16>
    %9 = arith.extf %8 : vector<1x256xbf16> to vector<1x256xf32>
    %cst_5 = arith.constant 1.000000e+00 : f32
    %10 = vector.broadcast %cst_5 : f32 to vector<1x256xf32>
    %11 = arith.mulf %9, %10 : vector<1x256xf32>
    %cst_6 = arith.constant 9.99999974E-6 : f32
    %12 = vector.broadcast %cst_6 : f32 to vector<16x1xf32>
    %13 = arith.addf %7, %12 : vector<16x1xf32>
    %14 = math.rsqrt %13 : vector<16x1xf32>
    %15 = vector.broadcast %14 : vector<16x1xf32> to vector<16x256xf32>
    %16 = arith.mulf %2, %15 : vector<16x256xf32>
    %17 = vector.broadcast %11 : vector<1x256xf32> to vector<16x256xf32>
    %18 = arith.mulf %16, %17 : vector<16x256xf32>
    %19 = vector.shape_cast %18 : vector<16x256xf32> to vector<1x16x256xf32>
    %20 = arith.truncf %19 : vector<1x16x256xf32> to vector<1x16x256xbf16>
    %c0_7 = arith.constant 0 : index
    %c0_8 = arith.constant 0 : index
    %c0_9 = arith.constant 0 : index
    %21 = vector.load %arg4[%c0_7, %c0_8, %c0_9] : memref<1x16x256xbf16, #tpu.memory_space<vmem>>, vector<1x16x256xbf16>
    tpu.vector_store %arg4[%c0_7, %c0_8, %c0_9], %20 {strides = array<i32>} : memref<1x16x256xbf16, #tpu.memory_space<vmem>>, vector<1x16x256xbf16>,
    return
  }
  func.func @transform_0(%arg0: i32, %arg1: i32) -> (i32, i32, i32) {
    %c0_i32 = arith.constant 0 : i32
    %c0_i32_0 = arith.constant 0 : i32
    return %arg0, %arg1, %c0_i32 : i32, i32, i32
  }
  func.func @transform_1(%arg0: i32, %arg1: i32) -> (i32, i32) {
    %c0_i32 = arith.constant 0 : i32
    %c0_i32_0 = arith.constant 0 : i32
    %c0_i32_1 = arith.constant 0 : i32
    return %c0_i32, %c0_i32_0 : i32, i32
  }
  func.func @transform_2(%arg0: i32, %arg1: i32) -> (i32, i32, i32) {
    %c0_i32 = arith.constant 0 : i32
    %c0_i32_0 = arith.constant 0 : i32
    return %arg0, %arg1, %c0_i32 : i32, i32, i32
  }
}

module attributes {stable_mosaic.version = 11 : i64} {
  func.func @_rmsnorm_kernel(%arg0: i32, %arg1: i32, %arg2: memref<1x8x256xbf16, #tpu.memory_space<vmem>>, %arg3: memref<1x256xbf16, #tpu.memory_space<vmem>>, %arg4: memref<1x8x256xbf16, #tpu.memory_space<vmem>>) attributes {dimension_semantics = [#tpu.dimension_semantics<parallel>, #tpu.dimension_semantics<parallel>], iteration_bounds = array<i64: 2, 1>, scalar_prefetch = 0 : i64, scratch_operands = 0 : i64, tpu.core_type = #tpu.core_type<tc>, window_params = [{transform_indices = @transform_0, window_bounds = array<i64: 1, 8, 256>}, {pipeline_mode = #tpu.pipeline_mode<synchronous>, transform_indices = @transform_1, window_bounds = array<i64: 1, 256>}, {transform_indices = @transform_2, window_bounds = array<i64: 1, 8, 256>}]} {
    %c0 = arith.constant 0 : index
    %c0_0 = arith.constant 0 : index
    %c0_1 = arith.constant 0 : index
    %0 = vector.load %arg2[%c0, %c0_0, %c0_1] : memref<1x8x256xbf16, #tpu.memory_space<vmem>>, vector<1x8x256xbf16>
    %1 = vector.shape_cast %0 : vector<1x8x256xbf16> to vector<8x256xbf16>
    %2 = arith.extf %1 : vector<8x256xbf16> to vector<8x256xf32>
    %3 = arith.mulf %2, %2 : vector<8x256xf32>
    %cst = arith.constant dense<0.000000e+00> : vector<8xf32>
    %4 = vector.multi_reduction <add>, %3, %cst [1] : vector<8x256xf32> to vector<8xf32>
    %5 = vector.shape_cast %4 : vector<8xf32> to vector<8x1xf32>
    %cst_2 = arith.constant 2.560000e+02 : f32
    %6 = vector.broadcast %cst_2 : f32 to vector<8x1xf32>
    %7 = arith.divf %5, %6 : vector<8x1xf32>
    %c0_3 = arith.constant 0 : index
    %c0_4 = arith.constant 0 : index
    %8 = vector.load %arg3[%c0_3, %c0_4] : memref<1x256xbf16, #tpu.memory_space<vmem>>, vector<1x256xbf16>
    %9 = arith.extf %8 : vector<1x256xbf16> to vector<1x256xf32>
    %cst_5 = arith.constant 1.000000e+00 : f32
    %10 = vector.broadcast %cst_5 : f32 to vector<1x256xf32>
    %11 = arith.mulf %9, %10 : vector<1x256xf32>
    %cst_6 = arith.constant 9.99999974E-6 : f32
    %12 = vector.broadcast %cst_6 : f32 to vector<8x1xf32>
    %13 = arith.addf %7, %12 : vector<8x1xf32>
    %14 = math.rsqrt %13 : vector<8x1xf32>
    %15 = vector.broadcast %14 : vector<8x1xf32> to vector<8x256xf32>
    %16 = arith.mulf %2, %15 : vector<8x256xf32>
    %17 = vector.broadcast %11 : vector<1x256xf32> to vector<8x256xf32>
    %18 = arith.mulf %16, %17 : vector<8x256xf32>
    %19 = vector.shape_cast %18 : vector<8x256xf32> to vector<1x8x256xf32>
    %20 = arith.truncf %19 : vector<1x8x256xf32> to vector<1x8x256xbf16>
    %c0_7 = arith.constant 0 : index
    %c0_8 = arith.constant 0 : index
    %c0_9 = arith.constant 0 : index
    %21 = vector.load %arg4[%c0_7, %c0_8, %c0_9] : memref<1x8x256xbf16, #tpu.memory_space<vmem>>, vector<1x8x256xbf16>
    tpu.vector_store %arg4[%c0_7, %c0_8, %c0_9], %20 {strides = array<i32>} : memref<1x8x256xbf16, #tpu.memory_space<vmem>>, vector<1x8x256xbf16>,
    return
  }
  func.func @transform_0(%arg0: i32, %arg1: i32) -> (i32, i32, i32) {
    %c0_i32 = arith.constant 0 : i32
    %c0_i32_0 = arith.constant 0 : i32
    return %arg0, %arg1, %c0_i32 : i32, i32, i32
  }
  func.func @transform_1(%arg0: i32, %arg1: i32) -> (i32, i32) {
    %c0_i32 = arith.constant 0 : i32
    %c0_i32_0 = arith.constant 0 : i32
    %c0_i32_1 = arith.constant 0 : i32
    return %c0_i32, %c0_i32_0 : i32, i32
  }
  func.func @transform_2(%arg0: i32, %arg1: i32) -> (i32, i32, i32) {
    %c0_i32 = arith.constant 0 : i32
    %c0_i32_0 = arith.constant 0 : i32
    return %arg0, %arg1, %c0_i32 : i32, i32, i32
  }
}

module attributes {stable_mosaic.version = 11 : i64} {
  func.func @_flash_attn_kernel(%arg0: i32, %arg1: i32, %arg2: i32, %arg3: i32, %arg4: memref<1x24x128xbf16, #tpu.memory_space<vmem>>, %arg5: memref<1x24x128xbf16, #tpu.memory_space<vmem>>, %arg6: memref<1x24x128xbf16, #tpu.memory_space<vmem>>, %arg7: memref<1x24x128xbf16, #tpu.memory_space<vmem>>, %arg8: memref<24x1xf32, #tpu.memory_space<vmem>>, %arg9: memref<24x1xf32, #tpu.memory_space<vmem>>, %arg10: memref<24x128xf32, #tpu.memory_space<vmem>>) attributes {dimension_semantics = [#tpu.dimension_semantics<parallel>, #tpu.dimension_semantics<parallel>, #tpu.dimension_semantics<parallel>, #tpu.dimension_semantics<arbitrary>], iteration_bounds = array<i64: 2, 2, 1, 1>, scalar_prefetch = 0 : i64, scratch_operands = 3 : i64, tpu.core_type = #tpu.core_type<tc>, window_params = [{transform_indices = @transform_0, window_bounds = array<i64: 1, 24, 128>}, {transform_indices = @transform_1, window_bounds = array<i64: 1, 24, 128>}, {transform_indices = @transform_2, window_bounds = array<i64: 1, 24, 128>}, {transform_indices = @transform_3, window_bounds = array<i64: 1, 24, 128>}]} {
    %c0_i32 = arith.constant 0 : i32
    %0 = arith.cmpi eq, %arg3, %c0_i32 : i32
    %1 = arith.extui %0 : i1 to i32
    %c0_i32_0 = arith.constant 0 : i32
    %2 = arith.cmpi ne, %1, %c0_i32_0 : i32
    scf.if %2 {
      %cst_26 = arith.constant 0xFF800000 : f32
      %36 = vector.broadcast %cst_26 : f32 to vector<24x1xf32>
      %c0_27 = arith.constant 0 : index
      %c0_28 = arith.constant 0 : index
      %37 = vector.load %arg8[%c0_27, %c0_28] : memref<24x1xf32, #tpu.memory_space<vmem>>, vector<24x1xf32>
      tpu.vector_store %arg8[%c0_27, %c0_28], %36 {strides = array<i32>} : memref<24x1xf32, #tpu.memory_space<vmem>>, vector<24x1xf32>,
      %cst_29 = arith.constant 0.000000e+00 : f32
      %38 = vector.broadcast %cst_29 : f32 to vector<24x1xf32>
      %c0_30 = arith.constant 0 : index
      %c0_31 = arith.constant 0 : index
      %39 = vector.load %arg9[%c0_30, %c0_31] : memref<24x1xf32, #tpu.memory_space<vmem>>, vector<24x1xf32>
      tpu.vector_store %arg9[%c0_30, %c0_31], %38 {strides = array<i32>} : memref<24x1xf32, #tpu.memory_space<vmem>>, vector<24x1xf32>,
      %cst_32 = arith.constant 0.000000e+00 : f32
      %40 = vector.broadcast %cst_32 : f32 to vector<24x128xf32>
      %c0_33 = arith.constant 0 : index
      %c0_34 = arith.constant 0 : index
      %41 = vector.load %arg10[%c0_33, %c0_34] : memref<24x128xf32, #tpu.memory_space<vmem>>, vector<24x128xf32>
      tpu.vector_store %arg10[%c0_33, %c0_34], %40 {strides = array<i32>} : memref<24x128xf32, #tpu.memory_space<vmem>>, vector<24x128xf32>,
    } else {
    }
    %c0 = arith.constant 0 : index
    %c0_1 = arith.constant 0 : index
    %c0_2 = arith.constant 0 : index
    %3 = vector.load %arg4[%c0, %c0_1, %c0_2] : memref<1x24x128xbf16, #tpu.memory_space<vmem>>, vector<1x24x128xbf16>
    %4 = vector.shape_cast %3 : vector<1x24x128xbf16> to vector<24x128xbf16>
    %c0_3 = arith.constant 0 : index
    %c0_4 = arith.constant 0 : index
    %c0_5 = arith.constant 0 : index
    %5 = vector.load %arg5[%c0_3, %c0_4, %c0_5] : memref<1x24x128xbf16, #tpu.memory_space<vmem>>, vector<1x24x128xbf16>
    %6 = vector.shape_cast %5 : vector<1x24x128xbf16> to vector<24x128xbf16>
    %c0_6 = arith.constant 0 : index
    %c0_7 = arith.constant 0 : index
    %c0_8 = arith.constant 0 : index
    %7 = vector.load %arg6[%c0_6, %c0_7, %c0_8] : memref<1x24x128xbf16, #tpu.memory_space<vmem>>, vector<1x24x128xbf16>
    %8 = vector.shape_cast %7 : vector<1x24x128xbf16> to vector<24x128xbf16>
    %cst = arith.constant dense<0.000000e+00> : vector<24x24xf32>
    %9 = tpu.matmul %4, %6, %cst {dimension_numbers = #tpu.dot_dimension_numbers<[1], [1], [0], [0], [0, 0, 1, 0], [], []>} : vector<24x128xbf16>, vector<24x128xbf16>, vector<24x24xf32> -> vector<24x24xf32>
    %c0_9 = arith.constant 0 : index
    %c0_10 = arith.constant 0 : index
    %10 = vector.load %arg8[%c0_9, %c0_10] : memref<24x1xf32, #tpu.memory_space<vmem>>, vector<24x1xf32>
    %cst_11 = arith.constant dense<0xFF800000> : vector<24xf32>
    %11 = vector.multi_reduction <maximumf>, %9, %cst_11 [1] : vector<24x24xf32> to vector<24xf32>
    %12 = vector.shape_cast %11 : vector<24xf32> to vector<24x1xf32>
    %13 = arith.maximumf %10, %12 : vector<24x1xf32>
    %14 = arith.subf %10, %13 : vector<24x1xf32>
    %15 = math.exp %14 : vector<24x1xf32>
    %16 = vector.broadcast %13 : vector<24x1xf32> to vector<24x24xf32>
    %17 = arith.subf %9, %16 : vector<24x24xf32>
    %18 = math.exp %17 : vector<24x24xf32>
    %c0_12 = arith.constant 0 : index
    %c0_13 = arith.constant 0 : index
    %19 = vector.load %arg9[%c0_12, %c0_13] : memref<24x1xf32, #tpu.memory_space<vmem>>, vector<24x1xf32>
    %20 = arith.mulf %15, %19 : vector<24x1xf32>
    %cst_14 = arith.constant dense<0.000000e+00> : vector<24xf32>
    %21 = vector.multi_reduction <add>, %18, %cst_14 [1] : vector<24x24xf32> to vector<24xf32>
    %22 = vector.shape_cast %21 : vector<24xf32> to vector<24x1xf32>
    %23 = arith.addf %20, %22 : vector<24x1xf32>
    %c0_15 = arith.constant 0 : index
    %c0_16 = arith.constant 0 : index
    %24 = vector.load %arg9[%c0_15, %c0_16] : memref<24x1xf32, #tpu.memory_space<vmem>>, vector<24x1xf32>
    tpu.vector_store %arg9[%c0_15, %c0_16], %23 {strides = array<i32>} : memref<24x1xf32, #tpu.memory_space<vmem>>, vector<24x1xf32>,
    %c0_17 = arith.constant 0 : index
    %c0_18 = arith.constant 0 : index
    %25 = vector.load %arg10[%c0_17, %c0_18] : memref<24x128xf32, #tpu.memory_space<vmem>>, vector<24x128xf32>
    %26 = vector.broadcast %15 : vector<24x1xf32> to vector<24x128xf32>
    %27 = arith.mulf %26, %25 : vector<24x128xf32>
    %28 = arith.truncf %18 : vector<24x24xf32> to vector<24x24xbf16>
    %cst_19 = arith.constant dense<0.000000e+00> : vector<24x128xf32>
    %29 = tpu.matmul %28, %8, %cst_19 {dimension_numbers = #tpu.dot_dimension_numbers<[1], [0], [0], [1], [0, 0, 1, 1], [], []>} : vector<24x24xbf16>, vector<24x128xbf16>, vector<24x128xf32> -> vector<24x128xf32>
    %30 = arith.addf %27, %29 : vector<24x128xf32>
    %c0_20 = arith.constant 0 : index
    %c0_21 = arith.constant 0 : index
    %31 = vector.load %arg10[%c0_20, %c0_21] : memref<24x128xf32, #tpu.memory_space<vmem>>, vector<24x128xf32>
    tpu.vector_store %arg10[%c0_20, %c0_21], %30 {strides = array<i32>} : memref<24x128xf32, #tpu.memory_space<vmem>>, vector<24x128xf32>,
    %c0_22 = arith.constant 0 : index
    %c0_23 = arith.constant 0 : index
    %32 = vector.load %arg8[%c0_22, %c0_23] : memref<24x1xf32, #tpu.memory_space<vmem>>, vector<24x1xf32>
    tpu.vector_store %arg8[%c0_22, %c0_23], %13 {strides = array<i32>} : memref<24x1xf32, #tpu.memory_space<vmem>>, vector<24x1xf32>,
    %c0_i32_24 = arith.constant 0 : i32
    %33 = arith.cmpi eq, %arg3, %c0_i32_24 : i32
    %34 = arith.extui %33 : i1 to i32
    %c0_i32_25 = arith.constant 0 : i32
    %35 = arith.cmpi ne, %34, %c0_i32_25 : i32
    scf.if %35 {
      %c0_26 = arith.constant 0 : index
      %c0_27 = arith.constant 0 : index
      %36 = vector.load %arg10[%c0_26, %c0_27] : memref<24x128xf32, #tpu.memory_space<vmem>>, vector<24x128xf32>
      %c0_28 = arith.constant 0 : index
      %c0_29 = arith.constant 0 : index
      %37 = vector.load %arg9[%c0_28, %c0_29] : memref<24x1xf32, #tpu.memory_space<vmem>>, vector<24x1xf32>
      %38 = tpu.reciprocal %37 : vector<24x1xf32> -> vector<24x1xf32>
      %39 = vector.broadcast %38 : vector<24x1xf32> to vector<24x128xf32>
      %40 = arith.mulf %36, %39 : vector<24x128xf32>
      %41 = vector.shape_cast %40 : vector<24x128xf32> to vector<1x24x128xf32>
      %42 = arith.truncf %41 : vector<1x24x128xf32> to vector<1x24x128xbf16>
      %c0_30 = arith.constant 0 : index
      %c0_31 = arith.constant 0 : index
      %c0_32 = arith.constant 0 : index
      %43 = vector.load %arg7[%c0_30, %c0_31, %c0_32] : memref<1x24x128xbf16, #tpu.memory_space<vmem>>, vector<1x24x128xbf16>
      tpu.vector_store %arg7[%c0_30, %c0_31, %c0_32], %42 {strides = array<i32>} : memref<1x24x128xbf16, #tpu.memory_space<vmem>>, vector<1x24x128xbf16>,
    } else {
    }
    return
  }
  func.func @transform_0(%arg0: i32, %arg1: i32, %arg2: i32, %arg3: i32) -> (i32, i32, i32) {
    %c0_i32 = arith.constant 0 : i32
    return %arg0, %arg2, %arg1 : i32, i32, i32
  }
  func.func @transform_1(%arg0: i32, %arg1: i32, %arg2: i32, %arg3: i32) -> (i32, i32, i32) {
    %c0_i32 = arith.constant 0 : i32
    return %arg0, %arg3, %arg1 : i32, i32, i32
  }
  func.func @transform_2(%arg0: i32, %arg1: i32, %arg2: i32, %arg3: i32) -> (i32, i32, i32) {
    %c0_i32 = arith.constant 0 : i32
    return %arg0, %arg3, %arg1 : i32, i32, i32
  }
  func.func @transform_3(%arg0: i32, %arg1: i32, %arg2: i32, %arg3: i32) -> (i32, i32, i32) {
    %c0_i32 = arith.constant 0 : i32
    return %arg0, %arg2, %arg1 : i32, i32, i32
  }
}

module attributes {stable_mosaic.version = 11 : i64} {
  func.func @_matmul_gated_res_kernel(%arg0: i32, %arg1: i32, %arg2: i32, %arg3: i32, %arg4: memref<1x8x256xbf16, #tpu.memory_space<vmem>>, %arg5: memref<256x128xbf16, #tpu.memory_space<vmem>>, %arg6: memref<1x128xbf16, #tpu.memory_space<vmem>>, %arg7: memref<1x1x128xbf16, #tpu.memory_space<vmem>>, %arg8: memref<1x8x128xbf16, #tpu.memory_space<vmem>>, %arg9: memref<1x8x128xbf16, #tpu.memory_space<vmem>>, %arg10: memref<8x128xf32, #tpu.memory_space<vmem>>) attributes {dimension_semantics = [#tpu.dimension_semantics<parallel>, #tpu.dimension_semantics<parallel>, #tpu.dimension_semantics<parallel>, #tpu.dimension_semantics<arbitrary>], iteration_bounds = array<i64: 2, 1, 1, 1>, scalar_prefetch = 0 : i64, scratch_operands = 1 : i64, tpu.core_type = #tpu.core_type<tc>, window_params = [{transform_indices = @transform_0, window_bounds = array<i64: 1, 8, 256>}, {transform_indices = @transform_1, window_bounds = array<i64: 256, 128>}, {transform_indices = @transform_2, window_bounds = array<i64: 1, 128>}, {transform_indices = @transform_3, window_bounds = array<i64: 1, 1, 128>}, {transform_indices = @transform_4, window_bounds = array<i64: 1, 8, 128>}, {transform_indices = @transform_5, window_bounds = array<i64: 1, 8, 128>}]} {
    %c0_i32 = arith.constant 0 : i32
    %0 = arith.cmpi eq, %arg3, %c0_i32 : i32
    %1 = arith.extui %0 : i1 to i32
    %c0_i32_0 = arith.constant 0 : i32
    %2 = arith.cmpi ne, %1, %c0_i32_0 : i32
    scf.if %2 {
      %cst_11 = arith.constant 0.000000e+00 : f32
      %13 = vector.broadcast %cst_11 : f32 to vector<8x128xf32>
      %c0_12 = arith.constant 0 : index
      %c0_13 = arith.constant 0 : index
      %14 = vector.load %arg10[%c0_12, %c0_13] : memref<8x128xf32, #tpu.memory_space<vmem>>, vector<8x128xf32>
      tpu.vector_store %arg10[%c0_12, %c0_13], %13 {strides = array<i32>} : memref<8x128xf32, #tpu.memory_space<vmem>>, vector<8x128xf32>,
    } else {
    }
    %c0 = arith.constant 0 : index
    %c0_1 = arith.constant 0 : index
    %3 = vector.load %arg10[%c0, %c0_1] : memref<8x128xf32, #tpu.memory_space<vmem>>, vector<8x128xf32>
    %c0_2 = arith.constant 0 : index
    %c0_3 = arith.constant 0 : index
    %c0_4 = arith.constant 0 : index
    %4 = vector.load %arg4[%c0_2, %c0_3, %c0_4] : memref<1x8x256xbf16, #tpu.memory_space<vmem>>, vector<1x8x256xbf16>
    %5 = vector.shape_cast %4 : vector<1x8x256xbf16> to vector<8x256xbf16>
    %c0_5 = arith.constant 0 : index
    %c0_6 = arith.constant 0 : index
    %6 = vector.load %arg5[%c0_5, %c0_6] : memref<256x128xbf16, #tpu.memory_space<vmem>>, vector<256x128xbf16>
    %cst = arith.constant dense<0.000000e+00> : vector<8x128xf32>
    %7 = tpu.matmul %5, %6, %cst {dimension_numbers = #tpu.dot_dimension_numbers<[1], [0], [0], [1], [0, 0, 1, 1], [], []>} : vector<8x256xbf16>, vector<256x128xbf16>, vector<8x128xf32> -> vector<8x128xf32>
    %8 = arith.addf %3, %7 : vector<8x128xf32>
    %c0_7 = arith.constant 0 : index
    %c0_8 = arith.constant 0 : index
    %9 = vector.load %arg10[%c0_7, %c0_8] : memref<8x128xf32, #tpu.memory_space<vmem>>, vector<8x128xf32>
    tpu.vector_store %arg10[%c0_7, %c0_8], %8 {strides = array<i32>} : memref<8x128xf32, #tpu.memory_space<vmem>>, vector<8x128xf32>,
    %c0_i32_9 = arith.constant 0 : i32
    %10 = arith.cmpi eq, %arg3, %c0_i32_9 : i32
    %11 = arith.extui %10 : i1 to i32
    %c0_i32_10 = arith.constant 0 : i32
    %12 = arith.cmpi ne, %11, %c0_i32_10 : i32
    scf.if %12 {
      %c0_11 = arith.constant 0 : index
      %c0_12 = arith.constant 0 : index
      %13 = vector.load %arg10[%c0_11, %c0_12] : memref<8x128xf32, #tpu.memory_space<vmem>>, vector<8x128xf32>
      %c0_13 = arith.constant 0 : index
      %c0_14 = arith.constant 0 : index
      %14 = vector.load %arg6[%c0_13, %c0_14] : memref<1x128xbf16, #tpu.memory_space<vmem>>, vector<1x128xbf16>
      %15 = arith.extf %14 : vector<1x128xbf16> to vector<1x128xf32>
      %16 = vector.broadcast %15 : vector<1x128xf32> to vector<8x128xf32>
      %17 = arith.addf %13, %16 : vector<8x128xf32>
      %c0_15 = arith.constant 0 : index
      %c0_16 = arith.constant 0 : index
      %c0_17 = arith.constant 0 : index
      %18 = vector.load %arg7[%c0_15, %c0_16, %c0_17] : memref<1x1x128xbf16, #tpu.memory_space<vmem>>, vector<1x1x128xbf16>
      %19 = vector.shape_cast %18 : vector<1x1x128xbf16> to vector<1x128xbf16>
      %20 = arith.extf %19 : vector<1x128xbf16> to vector<1x128xf32>
      %21 = vector.broadcast %20 : vector<1x128xf32> to vector<8x128xf32>
      %22 = arith.mulf %21, %17 : vector<8x128xf32>
      %c0_18 = arith.constant 0 : index
      %c0_19 = arith.constant 0 : index
      %c0_20 = arith.constant 0 : index
      %23 = vector.load %arg8[%c0_18, %c0_19, %c0_20] : memref<1x8x128xbf16, #tpu.memory_space<vmem>>, vector<1x8x128xbf16>
      %24 = vector.shape_cast %23 : vector<1x8x128xbf16> to vector<8x128xbf16>
      %25 = arith.extf %24 : vector<8x128xbf16> to vector<8x128xf32>
      %26 = arith.addf %22, %25 : vector<8x128xf32>
      %27 = vector.shape_cast %26 : vector<8x128xf32> to vector<1x8x128xf32>
      %28 = arith.truncf %27 : vector<1x8x128xf32> to vector<1x8x128xbf16>
      %c0_21 = arith.constant 0 : index
      %c0_22 = arith.constant 0 : index
      %c0_23 = arith.constant 0 : index
      %29 = vector.load %arg9[%c0_21, %c0_22, %c0_23] : memref<1x8x128xbf16, #tpu.memory_space<vmem>>, vector<1x8x128xbf16>
      tpu.vector_store %arg9[%c0_21, %c0_22, %c0_23], %28 {strides = array<i32>} : memref<1x8x128xbf16, #tpu.memory_space<vmem>>, vector<1x8x128xbf16>,
    } else {
    }
    return
  }
  func.func @transform_0(%arg0: i32, %arg1: i32, %arg2: i32, %arg3: i32) -> (i32, i32, i32) {
    %c0_i32 = arith.constant 0 : i32
    return %arg0, %arg1, %arg3 : i32, i32, i32
  }
  func.func @transform_1(%arg0: i32, %arg1: i32, %arg2: i32, %arg3: i32) -> (i32, i32) {
    %c0_i32 = arith.constant 0 : i32
    return %arg3, %arg2 : i32, i32
  }
  func.func @transform_2(%arg0: i32, %arg1: i32, %arg2: i32, %arg3: i32) -> (i32, i32) {
    %c0_i32 = arith.constant 0 : i32
    %c0_i32_0 = arith.constant 0 : i32
    return %c0_i32, %arg2 : i32, i32
  }
  func.func @transform_3(%arg0: i32, %arg1: i32, %arg2: i32, %arg3: i32) -> (i32, i32, i32) {
    %c0_i32 = arith.constant 0 : i32
    %c0_i32_0 = arith.constant 0 : i32
    return %arg0, %c0_i32, %arg2 : i32, i32, i32
  }
  func.func @transform_4(%arg0: i32, %arg1: i32, %arg2: i32, %arg3: i32) -> (i32, i32, i32) {
    %c0_i32 = arith.constant 0 : i32
    return %arg0, %arg1, %arg2 : i32, i32, i32
  }
  func.func @transform_5(%arg0: i32, %arg1: i32, %arg2: i32, %arg3: i32) -> (i32, i32, i32) {
    %c0_i32 = arith.constant 0 : i32
    return %arg0, %arg1, %arg2 : i32, i32, i32
  }
}

module attributes {stable_mosaic.version = 11 : i64} {
  func.func @_swiglu_fused_kernel(%arg0: i32, %arg1: i32, %arg2: i32, %arg3: memref<1x8x128xbf16, #tpu.memory_space<vmem>>, %arg4: memref<128x512xbf16, #tpu.memory_space<vmem>>, %arg5: memref<128x512xbf16, #tpu.memory_space<vmem>>, %arg6: memref<512x128xbf16, #tpu.memory_space<vmem>>, %arg7: memref<1x1x128xbf16, #tpu.memory_space<vmem>>, %arg8: memref<1x8x1xf32, #tpu.memory_space<vmem>>, %arg9: memref<1x8x128xbf16, #tpu.memory_space<vmem>>, %arg10: memref<1x8x128xbf16, #tpu.memory_space<vmem>>, %arg11: memref<8x128xf32, #tpu.memory_space<vmem>>) attributes {dimension_semantics = [#tpu.dimension_semantics<parallel>, #tpu.dimension_semantics<parallel>, #tpu.dimension_semantics<arbitrary>], iteration_bounds = array<i64: 2, 1, 1>, scalar_prefetch = 0 : i64, scratch_operands = 1 : i64, tpu.core_type = #tpu.core_type<tc>, window_params = [{transform_indices = @transform_0, window_bounds = array<i64: 1, 8, 128>}, {transform_indices = @transform_1, window_bounds = array<i64: 128, 512>}, {transform_indices = @transform_2, window_bounds = array<i64: 128, 512>}, {transform_indices = @transform_3, window_bounds = array<i64: 512, 128>}, {transform_indices = @transform_4, window_bounds = array<i64: 1, 1, 128>}, {transform_indices = @transform_5, window_bounds = array<i64: 1, 8, 1>}, {transform_indices = @transform_6, window_bounds = array<i64: 1, 8, 128>}, {transform_indices = @transform_7, window_bounds = array<i64: 1, 8, 128>}]} {
    %c0_i32 = arith.constant 0 : i32
    %0 = arith.cmpi eq, %arg2, %c0_i32 : i32
    %1 = arith.extui %0 : i1 to i32
    %c0_i32_0 = arith.constant 0 : i32
    %2 = arith.cmpi ne, %1, %c0_i32_0 : i32
    scf.if %2 {
      %cst_18 = arith.constant 0.000000e+00 : f32
      %25 = vector.broadcast %cst_18 : f32 to vector<8x128xf32>
      %c0_19 = arith.constant 0 : index
      %c0_20 = arith.constant 0 : index
      %26 = vector.load %arg11[%c0_19, %c0_20] : memref<8x128xf32, #tpu.memory_space<vmem>>, vector<8x128xf32>
      tpu.vector_store %arg11[%c0_19, %c0_20], %25 {strides = array<i32>} : memref<8x128xf32, #tpu.memory_space<vmem>>, vector<8x128xf32>,
    } else {
    }
    %c0 = arith.constant 0 : index
    %c0_1 = arith.constant 0 : index
    %c0_2 = arith.constant 0 : index
    %3 = vector.load %arg3[%c0, %c0_1, %c0_2] : memref<1x8x128xbf16, #tpu.memory_space<vmem>>, vector<1x8x128xbf16>
    %4 = vector.shape_cast %3 : vector<1x8x128xbf16> to vector<8x128xbf16>
    %c0_3 = arith.constant 0 : index
    %c0_4 = arith.constant 0 : index
    %5 = vector.load %arg4[%c0_3, %c0_4] : memref<128x512xbf16, #tpu.memory_space<vmem>>, vector<128x512xbf16>
    %cst = arith.constant dense<0.000000e+00> : vector<8x512xf32>
    %6 = tpu.matmul %4, %5, %cst {dimension_numbers = #tpu.dot_dimension_numbers<[1], [0], [0], [1], [0, 0, 1, 1], [], []>} : vector<8x128xbf16>, vector<128x512xbf16>, vector<8x512xf32> -> vector<8x512xf32>
    %c0_5 = arith.constant 0 : index
    %c0_6 = arith.constant 0 : index
    %7 = vector.load %arg5[%c0_5, %c0_6] : memref<128x512xbf16, #tpu.memory_space<vmem>>, vector<128x512xbf16>
    %cst_7 = arith.constant dense<0.000000e+00> : vector<8x512xf32>
    %8 = tpu.matmul %4, %7, %cst_7 {dimension_numbers = #tpu.dot_dimension_numbers<[1], [0], [0], [1], [0, 0, 1, 1], [], []>} : vector<8x128xbf16>, vector<128x512xbf16>, vector<8x512xf32> -> vector<8x512xf32>
    %9 = arith.negf %6 : vector<8x512xf32>
    %10 = math.exp %9 : vector<8x512xf32>
    %cst_8 = arith.constant 1.000000e+00 : f32
    %11 = vector.broadcast %cst_8 : f32 to vector<8x512xf32>
    %12 = arith.addf %11, %10 : vector<8x512xf32>
    %13 = arith.divf %11, %12 : vector<8x512xf32>
    %14 = arith.mulf %6, %13 : vector<8x512xf32>
    %15 = arith.mulf %14, %8 : vector<8x512xf32>
    %c0_9 = arith.constant 0 : index
    %c0_10 = arith.constant 0 : index
    %16 = vector.load %arg11[%c0_9, %c0_10] : memref<8x128xf32, #tpu.memory_space<vmem>>, vector<8x128xf32>
    %17 = arith.truncf %15 : vector<8x512xf32> to vector<8x512xbf16>
    %c0_11 = arith.constant 0 : index
    %c0_12 = arith.constant 0 : index
    %18 = vector.load %arg6[%c0_11, %c0_12] : memref<512x128xbf16, #tpu.memory_space<vmem>>, vector<512x128xbf16>
    %cst_13 = arith.constant dense<0.000000e+00> : vector<8x128xf32>
    %19 = tpu.matmul %17, %18, %cst_13 {dimension_numbers = #tpu.dot_dimension_numbers<[1], [0], [0], [1], [0, 0, 1, 1], [], []>} : vector<8x512xbf16>, vector<512x128xbf16>, vector<8x128xf32> -> vector<8x128xf32>
    %20 = arith.addf %16, %19 : vector<8x128xf32>
    %c0_14 = arith.constant 0 : index
    %c0_15 = arith.constant 0 : index
    %21 = vector.load %arg11[%c0_14, %c0_15] : memref<8x128xf32, #tpu.memory_space<vmem>>, vector<8x128xf32>
    tpu.vector_store %arg11[%c0_14, %c0_15], %20 {strides = array<i32>} : memref<8x128xf32, #tpu.memory_space<vmem>>, vector<8x128xf32>,
    %c0_i32_16 = arith.constant 0 : i32
    %22 = arith.cmpi eq, %arg2, %c0_i32_16 : i32
    %23 = arith.extui %22 : i1 to i32
    %c0_i32_17 = arith.constant 0 : i32
    %24 = arith.cmpi ne, %23, %c0_i32_17 : i32
    scf.if %24 {
      %c0_18 = arith.constant 0 : index
      %c0_19 = arith.constant 0 : index
      %25 = vector.load %arg11[%c0_18, %c0_19] : memref<8x128xf32, #tpu.memory_space<vmem>>, vector<8x128xf32>
      %c0_20 = arith.constant 0 : index
      %c0_21 = arith.constant 0 : index
      %c0_22 = arith.constant 0 : index
      %26 = vector.load %arg8[%c0_20, %c0_21, %c0_22] : memref<1x8x1xf32, #tpu.memory_space<vmem>>, vector<1x8x1xf32>
      %27 = vector.shape_cast %26 : vector<1x8x1xf32> to vector<8x1xf32>
      %28 = vector.broadcast %27 : vector<8x1xf32> to vector<8x128xf32>
      %29 = arith.mulf %25, %28 : vector<8x128xf32>
      %c0_23 = arith.constant 0 : index
      %c0_24 = arith.constant 0 : index
      %c0_25 = arith.constant 0 : index
      %30 = vector.load %arg7[%c0_23, %c0_24, %c0_25] : memref<1x1x128xbf16, #tpu.memory_space<vmem>>, vector<1x1x128xbf16>
      %31 = vector.shape_cast %30 : vector<1x1x128xbf16> to vector<1x128xbf16>
      %32 = arith.extf %31 : vector<1x128xbf16> to vector<1x128xf32>
      %33 = vector.broadcast %32 : vector<1x128xf32> to vector<8x128xf32>
      %34 = arith.mulf %33, %29 : vector<8x128xf32>
      %c0_26 = arith.constant 0 : index
      %c0_27 = arith.constant 0 : index
      %c0_28 = arith.constant 0 : index
      %35 = vector.load %arg9[%c0_26, %c0_27, %c0_28] : memref<1x8x128xbf16, #tpu.memory_space<vmem>>, vector<1x8x128xbf16>
      %36 = vector.shape_cast %35 : vector<1x8x128xbf16> to vector<8x128xbf16>
      %37 = arith.extf %36 : vector<8x128xbf16> to vector<8x128xf32>
      %38 = arith.addf %34, %37 : vector<8x128xf32>
      %39 = vector.shape_cast %38 : vector<8x128xf32> to vector<1x8x128xf32>
      %40 = arith.truncf %39 : vector<1x8x128xf32> to vector<1x8x128xbf16>
      %c0_29 = arith.constant 0 : index
      %c0_30 = arith.constant 0 : index
      %c0_31 = arith.constant 0 : index
      %41 = vector.load %arg10[%c0_29, %c0_30, %c0_31] : memref<1x8x128xbf16, #tpu.memory_space<vmem>>, vector<1x8x128xbf16>
      tpu.vector_store %arg10[%c0_29, %c0_30, %c0_31], %40 {strides = array<i32>} : memref<1x8x128xbf16, #tpu.memory_space<vmem>>, vector<1x8x128xbf16>,
    } else {
    }
    return
  }
  func.func @transform_0(%arg0: i32, %arg1: i32, %arg2: i32) -> (i32, i32, i32) {
    %c0_i32 = arith.constant 0 : i32
    %c0_i32_0 = arith.constant 0 : i32
    return %arg0, %arg1, %c0_i32 : i32, i32, i32
  }
  func.func @transform_1(%arg0: i32, %arg1: i32, %arg2: i32) -> (i32, i32) {
    %c0_i32 = arith.constant 0 : i32
    %c0_i32_0 = arith.constant 0 : i32
    return %c0_i32, %arg2 : i32, i32
  }
  func.func @transform_2(%arg0: i32, %arg1: i32, %arg2: i32) -> (i32, i32) {
    %c0_i32 = arith.constant 0 : i32
    %c0_i32_0 = arith.constant 0 : i32
    return %c0_i32, %arg2 : i32, i32
  }
  func.func @transform_3(%arg0: i32, %arg1: i32, %arg2: i32) -> (i32, i32) {
    %c0_i32 = arith.constant 0 : i32
    %c0_i32_0 = arith.constant 0 : i32
    return %arg2, %c0_i32 : i32, i32
  }
  func.func @transform_4(%arg0: i32, %arg1: i32, %arg2: i32) -> (i32, i32, i32) {
    %c0_i32 = arith.constant 0 : i32
    %c0_i32_0 = arith.constant 0 : i32
    %c0_i32_1 = arith.constant 0 : i32
    return %arg0, %c0_i32, %c0_i32_0 : i32, i32, i32
  }
  func.func @transform_5(%arg0: i32, %arg1: i32, %arg2: i32) -> (i32, i32, i32) {
    %c0_i32 = arith.constant 0 : i32
    %c0_i32_0 = arith.constant 0 : i32
    return %arg0, %arg1, %c0_i32 : i32, i32, i32
  }
  func.func @transform_6(%arg0: i32, %arg1: i32, %arg2: i32) -> (i32, i32, i32) {
    %c0_i32 = arith.constant 0 : i32
    %c0_i32_0 = arith.constant 0 : i32
    return %arg0, %arg1, %c0_i32 : i32, i32, i32
  }
  func.func @transform_7(%arg0: i32, %arg1: i32, %arg2: i32) -> (i32, i32, i32) {
    %c0_i32 = arith.constant 0 : i32
    %c0_i32_0 = arith.constant 0 : i32
    return %arg0, %arg1, %c0_i32 : i32, i32, i32
  }
}

module attributes {stable_mosaic.version = 11 : i64} {
  func.func @_matmul_gated_res_kernel(%arg0: i32, %arg1: i32, %arg2: i32, %arg3: i32, %arg4: memref<1x16x256xbf16, #tpu.memory_space<vmem>>, %arg5: memref<256x128xbf16, #tpu.memory_space<vmem>>, %arg6: memref<1x128xbf16, #tpu.memory_space<vmem>>, %arg7: memref<1x1x128xbf16, #tpu.memory_space<vmem>>, %arg8: memref<1x16x128xbf16, #tpu.memory_space<vmem>>, %arg9: memref<1x16x128xbf16, #tpu.memory_space<vmem>>, %arg10: memref<16x128xf32, #tpu.memory_space<vmem>>) attributes {dimension_semantics = [#tpu.dimension_semantics<parallel>, #tpu.dimension_semantics<parallel>, #tpu.dimension_semantics<parallel>, #tpu.dimension_semantics<arbitrary>], iteration_bounds = array<i64: 2, 1, 1, 1>, scalar_prefetch = 0 : i64, scratch_operands = 1 : i64, tpu.core_type = #tpu.core_type<tc>, window_params = [{transform_indices = @transform_0, window_bounds = array<i64: 1, 16, 256>}, {transform_indices = @transform_1, window_bounds = array<i64: 256, 128>}, {transform_indices = @transform_2, window_bounds = array<i64: 1, 128>}, {transform_indices = @transform_3, window_bounds = array<i64: 1, 1, 128>}, {transform_indices = @transform_4, window_bounds = array<i64: 1, 16, 128>}, {transform_indices = @transform_5, window_bounds = array<i64: 1, 16, 128>}]} {
    %c0_i32 = arith.constant 0 : i32
    %0 = arith.cmpi eq, %arg3, %c0_i32 : i32
    %1 = arith.extui %0 : i1 to i32
    %c0_i32_0 = arith.constant 0 : i32
    %2 = arith.cmpi ne, %1, %c0_i32_0 : i32
    scf.if %2 {
      %cst_11 = arith.constant 0.000000e+00 : f32
      %13 = vector.broadcast %cst_11 : f32 to vector<16x128xf32>
      %c0_12 = arith.constant 0 : index
      %c0_13 = arith.constant 0 : index
      %14 = vector.load %arg10[%c0_12, %c0_13] : memref<16x128xf32, #tpu.memory_space<vmem>>, vector<16x128xf32>
      tpu.vector_store %arg10[%c0_12, %c0_13], %13 {strides = array<i32>} : memref<16x128xf32, #tpu.memory_space<vmem>>, vector<16x128xf32>,
    } else {
    }
    %c0 = arith.constant 0 : index
    %c0_1 = arith.constant 0 : index
    %3 = vector.load %arg10[%c0, %c0_1] : memref<16x128xf32, #tpu.memory_space<vmem>>, vector<16x128xf32>
    %c0_2 = arith.constant 0 : index
    %c0_3 = arith.constant 0 : index
    %c0_4 = arith.constant 0 : index
    %4 = vector.load %arg4[%c0_2, %c0_3, %c0_4] : memref<1x16x256xbf16, #tpu.memory_space<vmem>>, vector<1x16x256xbf16>
    %5 = vector.shape_cast %4 : vector<1x16x256xbf16> to vector<16x256xbf16>
    %c0_5 = arith.constant 0 : index
    %c0_6 = arith.constant 0 : index
    %6 = vector.load %arg5[%c0_5, %c0_6] : memref<256x128xbf16, #tpu.memory_space<vmem>>, vector<256x128xbf16>
    %cst = arith.constant dense<0.000000e+00> : vector<16x128xf32>
    %7 = tpu.matmul %5, %6, %cst {dimension_numbers = #tpu.dot_dimension_numbers<[1], [0], [0], [1], [0, 0, 1, 1], [], []>} : vector<16x256xbf16>, vector<256x128xbf16>, vector<16x128xf32> -> vector<16x128xf32>
    %8 = arith.addf %3, %7 : vector<16x128xf32>
    %c0_7 = arith.constant 0 : index
    %c0_8 = arith.constant 0 : index
    %9 = vector.load %arg10[%c0_7, %c0_8] : memref<16x128xf32, #tpu.memory_space<vmem>>, vector<16x128xf32>
    tpu.vector_store %arg10[%c0_7, %c0_8], %8 {strides = array<i32>} : memref<16x128xf32, #tpu.memory_space<vmem>>, vector<16x128xf32>,
    %c0_i32_9 = arith.constant 0 : i32
    %10 = arith.cmpi eq, %arg3, %c0_i32_9 : i32
    %11 = arith.extui %10 : i1 to i32
    %c0_i32_10 = arith.constant 0 : i32
    %12 = arith.cmpi ne, %11, %c0_i32_10 : i32
    scf.if %12 {
      %c0_11 = arith.constant 0 : index
      %c0_12 = arith.constant 0 : index
      %13 = vector.load %arg10[%c0_11, %c0_12] : memref<16x128xf32, #tpu.memory_space<vmem>>, vector<16x128xf32>
      %c0_13 = arith.constant 0 : index
      %c0_14 = arith.constant 0 : index
      %14 = vector.load %arg6[%c0_13, %c0_14] : memref<1x128xbf16, #tpu.memory_space<vmem>>, vector<1x128xbf16>
      %15 = arith.extf %14 : vector<1x128xbf16> to vector<1x128xf32>
      %16 = vector.broadcast %15 : vector<1x128xf32> to vector<16x128xf32>
      %17 = arith.addf %13, %16 : vector<16x128xf32>
      %c0_15 = arith.constant 0 : index
      %c0_16 = arith.constant 0 : index
      %c0_17 = arith.constant 0 : index
      %18 = vector.load %arg7[%c0_15, %c0_16, %c0_17] : memref<1x1x128xbf16, #tpu.memory_space<vmem>>, vector<1x1x128xbf16>
      %19 = vector.shape_cast %18 : vector<1x1x128xbf16> to vector<1x128xbf16>
      %20 = arith.extf %19 : vector<1x128xbf16> to vector<1x128xf32>
      %21 = vector.broadcast %20 : vector<1x128xf32> to vector<16x128xf32>
      %22 = arith.mulf %21, %17 : vector<16x128xf32>
      %c0_18 = arith.constant 0 : index
      %c0_19 = arith.constant 0 : index
      %c0_20 = arith.constant 0 : index
      %23 = vector.load %arg8[%c0_18, %c0_19, %c0_20] : memref<1x16x128xbf16, #tpu.memory_space<vmem>>, vector<1x16x128xbf16>
      %24 = vector.shape_cast %23 : vector<1x16x128xbf16> to vector<16x128xbf16>
      %25 = arith.extf %24 : vector<16x128xbf16> to vector<16x128xf32>
      %26 = arith.addf %22, %25 : vector<16x128xf32>
      %27 = vector.shape_cast %26 : vector<16x128xf32> to vector<1x16x128xf32>
      %28 = arith.truncf %27 : vector<1x16x128xf32> to vector<1x16x128xbf16>
      %c0_21 = arith.constant 0 : index
      %c0_22 = arith.constant 0 : index
      %c0_23 = arith.constant 0 : index
      %29 = vector.load %arg9[%c0_21, %c0_22, %c0_23] : memref<1x16x128xbf16, #tpu.memory_space<vmem>>, vector<1x16x128xbf16>
      tpu.vector_store %arg9[%c0_21, %c0_22, %c0_23], %28 {strides = array<i32>} : memref<1x16x128xbf16, #tpu.memory_space<vmem>>, vector<1x16x128xbf16>,
    } else {
    }
    return
  }
  func.func @transform_0(%arg0: i32, %arg1: i32, %arg2: i32, %arg3: i32) -> (i32, i32, i32) {
    %c0_i32 = arith.constant 0 : i32
    return %arg0, %arg1, %arg3 : i32, i32, i32
  }
  func.func @transform_1(%arg0: i32, %arg1: i32, %arg2: i32, %arg3: i32) -> (i32, i32) {
    %c0_i32 = arith.constant 0 : i32
    return %arg3, %arg2 : i32, i32
  }
  func.func @transform_2(%arg0: i32, %arg1: i32, %arg2: i32, %arg3: i32) -> (i32, i32) {
    %c0_i32 = arith.constant 0 : i32
    %c0_i32_0 = arith.constant 0 : i32
    return %c0_i32, %arg2 : i32, i32
  }
  func.func @transform_3(%arg0: i32, %arg1: i32, %arg2: i32, %arg3: i32) -> (i32, i32, i32) {
    %c0_i32 = arith.constant 0 : i32
    %c0_i32_0 = arith.constant 0 : i32
    return %arg0, %c0_i32, %arg2 : i32, i32, i32
  }
  func.func @transform_4(%arg0: i32, %arg1: i32, %arg2: i32, %arg3: i32) -> (i32, i32, i32) {
    %c0_i32 = arith.constant 0 : i32
    return %arg0, %arg1, %arg2 : i32, i32, i32
  }
  func.func @transform_5(%arg0: i32, %arg1: i32, %arg2: i32, %arg3: i32) -> (i32, i32, i32) {
    %c0_i32 = arith.constant 0 : i32
    return %arg0, %arg1, %arg2 : i32, i32, i32
  }
}

module attributes {stable_mosaic.version = 11 : i64} {
  func.func @_swiglu_fused_kernel(%arg0: i32, %arg1: i32, %arg2: i32, %arg3: memref<1x16x128xbf16, #tpu.memory_space<vmem>>, %arg4: memref<128x512xbf16, #tpu.memory_space<vmem>>, %arg5: memref<128x512xbf16, #tpu.memory_space<vmem>>, %arg6: memref<512x128xbf16, #tpu.memory_space<vmem>>, %arg7: memref<1x1x128xbf16, #tpu.memory_space<vmem>>, %arg8: memref<1x16x1xf32, #tpu.memory_space<vmem>>, %arg9: memref<1x16x128xbf16, #tpu.memory_space<vmem>>, %arg10: memref<1x16x128xbf16, #tpu.memory_space<vmem>>, %arg11: memref<16x128xf32, #tpu.memory_space<vmem>>) attributes {dimension_semantics = [#tpu.dimension_semantics<parallel>, #tpu.dimension_semantics<parallel>, #tpu.dimension_semantics<arbitrary>], iteration_bounds = array<i64: 2, 1, 1>, scalar_prefetch = 0 : i64, scratch_operands = 1 : i64, tpu.core_type = #tpu.core_type<tc>, window_params = [{transform_indices = @transform_0, window_bounds = array<i64: 1, 16, 128>}, {transform_indices = @transform_1, window_bounds = array<i64: 128, 512>}, {transform_indices = @transform_2, window_bounds = array<i64: 128, 512>}, {transform_indices = @transform_3, window_bounds = array<i64: 512, 128>}, {transform_indices = @transform_4, window_bounds = array<i64: 1, 1, 128>}, {transform_indices = @transform_5, window_bounds = array<i64: 1, 16, 1>}, {transform_indices = @transform_6, window_bounds = array<i64: 1, 16, 128>}, {transform_indices = @transform_7, window_bounds = array<i64: 1, 16, 128>}]} {
    %c0_i32 = arith.constant 0 : i32
    %0 = arith.cmpi eq, %arg2, %c0_i32 : i32
    %1 = arith.extui %0 : i1 to i32
    %c0_i32_0 = arith.constant 0 : i32
    %2 = arith.cmpi ne, %1, %c0_i32_0 : i32
    scf.if %2 {
      %cst_18 = arith.constant 0.000000e+00 : f32
      %25 = vector.broadcast %cst_18 : f32 to vector<16x128xf32>
      %c0_19 = arith.constant 0 : index
      %c0_20 = arith.constant 0 : index
      %26 = vector.load %arg11[%c0_19, %c0_20] : memref<16x128xf32, #tpu.memory_space<vmem>>, vector<16x128xf32>
      tpu.vector_store %arg11[%c0_19, %c0_20], %25 {strides = array<i32>} : memref<16x128xf32, #tpu.memory_space<vmem>>, vector<16x128xf32>,
    } else {
    }
    %c0 = arith.constant 0 : index
    %c0_1 = arith.constant 0 : index
    %c0_2 = arith.constant 0 : index
    %3 = vector.load %arg3[%c0, %c0_1, %c0_2] : memref<1x16x128xbf16, #tpu.memory_space<vmem>>, vector<1x16x128xbf16>
    %4 = vector.shape_cast %3 : vector<1x16x128xbf16> to vector<16x128xbf16>
    %c0_3 = arith.constant 0 : index
    %c0_4 = arith.constant 0 : index
    %5 = vector.load %arg4[%c0_3, %c0_4] : memref<128x512xbf16, #tpu.memory_space<vmem>>, vector<128x512xbf16>
    %cst = arith.constant dense<0.000000e+00> : vector<16x512xf32>
    %6 = tpu.matmul %4, %5, %cst {dimension_numbers = #tpu.dot_dimension_numbers<[1], [0], [0], [1], [0, 0, 1, 1], [], []>} : vector<16x128xbf16>, vector<128x512xbf16>, vector<16x512xf32> -> vector<16x512xf32>
    %c0_5 = arith.constant 0 : index
    %c0_6 = arith.constant 0 : index
    %7 = vector.load %arg5[%c0_5, %c0_6] : memref<128x512xbf16, #tpu.memory_space<vmem>>, vector<128x512xbf16>
    %cst_7 = arith.constant dense<0.000000e+00> : vector<16x512xf32>
    %8 = tpu.matmul %4, %7, %cst_7 {dimension_numbers = #tpu.dot_dimension_numbers<[1], [0], [0], [1], [0, 0, 1, 1], [], []>} : vector<16x128xbf16>, vector<128x512xbf16>, vector<16x512xf32> -> vector<16x512xf32>
    %9 = arith.negf %6 : vector<16x512xf32>
    %10 = math.exp %9 : vector<16x512xf32>
    %cst_8 = arith.constant 1.000000e+00 : f32
    %11 = vector.broadcast %cst_8 : f32 to vector<16x512xf32>
    %12 = arith.addf %11, %10 : vector<16x512xf32>
    %13 = arith.divf %11, %12 : vector<16x512xf32>
    %14 = arith.mulf %6, %13 : vector<16x512xf32>
    %15 = arith.mulf %14, %8 : vector<16x512xf32>
    %c0_9 = arith.constant 0 : index
    %c0_10 = arith.constant 0 : index
    %16 = vector.load %arg11[%c0_9, %c0_10] : memref<16x128xf32, #tpu.memory_space<vmem>>, vector<16x128xf32>
    %17 = arith.truncf %15 : vector<16x512xf32> to vector<16x512xbf16>
    %c0_11 = arith.constant 0 : index
    %c0_12 = arith.constant 0 : index
    %18 = vector.load %arg6[%c0_11, %c0_12] : memref<512x128xbf16, #tpu.memory_space<vmem>>, vector<512x128xbf16>
    %cst_13 = arith.constant dense<0.000000e+00> : vector<16x128xf32>
    %19 = tpu.matmul %17, %18, %cst_13 {dimension_numbers = #tpu.dot_dimension_numbers<[1], [0], [0], [1], [0, 0, 1, 1], [], []>} : vector<16x512xbf16>, vector<512x128xbf16>, vector<16x128xf32> -> vector<16x128xf32>
    %20 = arith.addf %16, %19 : vector<16x128xf32>
    %c0_14 = arith.constant 0 : index
    %c0_15 = arith.constant 0 : index
    %21 = vector.load %arg11[%c0_14, %c0_15] : memref<16x128xf32, #tpu.memory_space<vmem>>, vector<16x128xf32>
    tpu.vector_store %arg11[%c0_14, %c0_15], %20 {strides = array<i32>} : memref<16x128xf32, #tpu.memory_space<vmem>>, vector<16x128xf32>,
    %c0_i32_16 = arith.constant 0 : i32
    %22 = arith.cmpi eq, %arg2, %c0_i32_16 : i32
    %23 = arith.extui %22 : i1 to i32
    %c0_i32_17 = arith.constant 0 : i32
    %24 = arith.cmpi ne, %23, %c0_i32_17 : i32
    scf.if %24 {
      %c0_18 = arith.constant 0 : index
      %c0_19 = arith.constant 0 : index
      %25 = vector.load %arg11[%c0_18, %c0_19] : memref<16x128xf32, #tpu.memory_space<vmem>>, vector<16x128xf32>
      %c0_20 = arith.constant 0 : index
      %c0_21 = arith.constant 0 : index
      %c0_22 = arith.constant 0 : index
      %26 = vector.load %arg8[%c0_20, %c0_21, %c0_22] : memref<1x16x1xf32, #tpu.memory_space<vmem>>, vector<1x16x1xf32>
      %27 = vector.shape_cast %26 : vector<1x16x1xf32> to vector<16x1xf32>
      %28 = vector.broadcast %27 : vector<16x1xf32> to vector<16x128xf32>
      %29 = arith.mulf %25, %28 : vector<16x128xf32>
      %c0_23 = arith.constant 0 : index
      %c0_24 = arith.constant 0 : index
      %c0_25 = arith.constant 0 : index
      %30 = vector.load %arg7[%c0_23, %c0_24, %c0_25] : memref<1x1x128xbf16, #tpu.memory_space<vmem>>, vector<1x1x128xbf16>
      %31 = vector.shape_cast %30 : vector<1x1x128xbf16> to vector<1x128xbf16>
      %32 = arith.extf %31 : vector<1x128xbf16> to vector<1x128xf32>
      %33 = vector.broadcast %32 : vector<1x128xf32> to vector<16x128xf32>
      %34 = arith.mulf %33, %29 : vector<16x128xf32>
      %c0_26 = arith.constant 0 : index
      %c0_27 = arith.constant 0 : index
      %c0_28 = arith.constant 0 : index
      %35 = vector.load %arg9[%c0_26, %c0_27, %c0_28] : memref<1x16x128xbf16, #tpu.memory_space<vmem>>, vector<1x16x128xbf16>
      %36 = vector.shape_cast %35 : vector<1x16x128xbf16> to vector<16x128xbf16>
      %37 = arith.extf %36 : vector<16x128xbf16> to vector<16x128xf32>
      %38 = arith.addf %34, %37 : vector<16x128xf32>
      %39 = vector.shape_cast %38 : vector<16x128xf32> to vector<1x16x128xf32>
      %40 = arith.truncf %39 : vector<1x16x128xf32> to vector<1x16x128xbf16>
      %c0_29 = arith.constant 0 : index
      %c0_30 = arith.constant 0 : index
      %c0_31 = arith.constant 0 : index
      %41 = vector.load %arg10[%c0_29, %c0_30, %c0_31] : memref<1x16x128xbf16, #tpu.memory_space<vmem>>, vector<1x16x128xbf16>
      tpu.vector_store %arg10[%c0_29, %c0_30, %c0_31], %40 {strides = array<i32>} : memref<1x16x128xbf16, #tpu.memory_space<vmem>>, vector<1x16x128xbf16>,
    } else {
    }
    return
  }
  func.func @transform_0(%arg0: i32, %arg1: i32, %arg2: i32) -> (i32, i32, i32) {
    %c0_i32 = arith.constant 0 : i32
    %c0_i32_0 = arith.constant 0 : i32
    return %arg0, %arg1, %c0_i32 : i32, i32, i32
  }
  func.func @transform_1(%arg0: i32, %arg1: i32, %arg2: i32) -> (i32, i32) {
    %c0_i32 = arith.constant 0 : i32
    %c0_i32_0 = arith.constant 0 : i32
    return %c0_i32, %arg2 : i32, i32
  }
  func.func @transform_2(%arg0: i32, %arg1: i32, %arg2: i32) -> (i32, i32) {
    %c0_i32 = arith.constant 0 : i32
    %c0_i32_0 = arith.constant 0 : i32
    return %c0_i32, %arg2 : i32, i32
  }
  func.func @transform_3(%arg0: i32, %arg1: i32, %arg2: i32) -> (i32, i32) {
    %c0_i32 = arith.constant 0 : i32
    %c0_i32_0 = arith.constant 0 : i32
    return %arg2, %c0_i32 : i32, i32
  }
  func.func @transform_4(%arg0: i32, %arg1: i32, %arg2: i32) -> (i32, i32, i32) {
    %c0_i32 = arith.constant 0 : i32
    %c0_i32_0 = arith.constant 0 : i32
    %c0_i32_1 = arith.constant 0 : i32
    return %arg0, %c0_i32, %c0_i32_0 : i32, i32, i32
  }
  func.func @transform_5(%arg0: i32, %arg1: i32, %arg2: i32) -> (i32, i32, i32) {
    %c0_i32 = arith.constant 0 : i32
    %c0_i32_0 = arith.constant 0 : i32
    return %arg0, %arg1, %c0_i32 : i32, i32, i32
  }
  func.func @transform_6(%arg0: i32, %arg1: i32, %arg2: i32) -> (i32, i32, i32) {
    %c0_i32 = arith.constant 0 : i32
    %c0_i32_0 = arith.constant 0 : i32
    return %arg0, %arg1, %c0_i32 : i32, i32, i32
  }
  func.func @transform_7(%arg0: i32, %arg1: i32, %arg2: i32) -> (i32, i32, i32) {
    %c0_i32 = arith.constant 0 : i32
    %c0_i32_0 = arith.constant 0 : i32
    return %arg0, %arg1, %c0_i32 : i32, i32, i32
  }
}

module attributes {stable_mosaic.version = 11 : i64} {
  func.func @_swiglu_fused_kernel(%arg0: i32, %arg1: i32, %arg2: i32, %arg3: memref<1x16x128xbf16, #tpu.memory_space<vmem>>, %arg4: memref<128x256xbf16, #tpu.memory_space<vmem>>, %arg5: memref<128x256xbf16, #tpu.memory_space<vmem>>, %arg6: memref<256x128xbf16, #tpu.memory_space<vmem>>, %arg7: memref<1x1x128xbf16, #tpu.memory_space<vmem>>, %arg8: memref<1x16x1xf32, #tpu.memory_space<vmem>>, %arg9: memref<1x16x128xbf16, #tpu.memory_space<vmem>>, %arg10: memref<1x16x128xbf16, #tpu.memory_space<vmem>>, %arg11: memref<16x128xf32, #tpu.memory_space<vmem>>) attributes {dimension_semantics = [#tpu.dimension_semantics<parallel>, #tpu.dimension_semantics<parallel>, #tpu.dimension_semantics<arbitrary>], iteration_bounds = array<i64: 2, 1, 1>, scalar_prefetch = 0 : i64, scratch_operands = 1 : i64, tpu.core_type = #tpu.core_type<tc>, window_params = [{transform_indices = @transform_0, window_bounds = array<i64: 1, 16, 128>}, {transform_indices = @transform_1, window_bounds = array<i64: 128, 256>}, {transform_indices = @transform_2, window_bounds = array<i64: 128, 256>}, {transform_indices = @transform_3, window_bounds = array<i64: 256, 128>}, {transform_indices = @transform_4, window_bounds = array<i64: 1, 1, 128>}, {transform_indices = @transform_5, window_bounds = array<i64: 1, 16, 1>}, {transform_indices = @transform_6, window_bounds = array<i64: 1, 16, 128>}, {transform_indices = @transform_7, window_bounds = array<i64: 1, 16, 128>}]} {
    %c0_i32 = arith.constant 0 : i32
    %0 = arith.cmpi eq, %arg2, %c0_i32 : i32
    %1 = arith.extui %0 : i1 to i32
    %c0_i32_0 = arith.constant 0 : i32
    %2 = arith.cmpi ne, %1, %c0_i32_0 : i32
    scf.if %2 {
      %cst_18 = arith.constant 0.000000e+00 : f32
      %25 = vector.broadcast %cst_18 : f32 to vector<16x128xf32>
      %c0_19 = arith.constant 0 : index
      %c0_20 = arith.constant 0 : index
      %26 = vector.load %arg11[%c0_19, %c0_20] : memref<16x128xf32, #tpu.memory_space<vmem>>, vector<16x128xf32>
      tpu.vector_store %arg11[%c0_19, %c0_20], %25 {strides = array<i32>} : memref<16x128xf32, #tpu.memory_space<vmem>>, vector<16x128xf32>,
    } else {
    }
    %c0 = arith.constant 0 : index
    %c0_1 = arith.constant 0 : index
    %c0_2 = arith.constant 0 : index
    %3 = vector.load %arg3[%c0, %c0_1, %c0_2] : memref<1x16x128xbf16, #tpu.memory_space<vmem>>, vector<1x16x128xbf16>
    %4 = vector.shape_cast %3 : vector<1x16x128xbf16> to vector<16x128xbf16>
    %c0_3 = arith.constant 0 : index
    %c0_4 = arith.constant 0 : index
    %5 = vector.load %arg4[%c0_3, %c0_4] : memref<128x256xbf16, #tpu.memory_space<vmem>>, vector<128x256xbf16>
    %cst = arith.constant dense<0.000000e+00> : vector<16x256xf32>
    %6 = tpu.matmul %4, %5, %cst {dimension_numbers = #tpu.dot_dimension_numbers<[1], [0], [0], [1], [0, 0, 1, 1], [], []>} : vector<16x128xbf16>, vector<128x256xbf16>, vector<16x256xf32> -> vector<16x256xf32>
    %c0_5 = arith.constant 0 : index
    %c0_6 = arith.constant 0 : index
    %7 = vector.load %arg5[%c0_5, %c0_6] : memref<128x256xbf16, #tpu.memory_space<vmem>>, vector<128x256xbf16>
    %cst_7 = arith.constant dense<0.000000e+00> : vector<16x256xf32>
    %8 = tpu.matmul %4, %7, %cst_7 {dimension_numbers = #tpu.dot_dimension_numbers<[1], [0], [0], [1], [0, 0, 1, 1], [], []>} : vector<16x128xbf16>, vector<128x256xbf16>, vector<16x256xf32> -> vector<16x256xf32>
    %9 = arith.negf %6 : vector<16x256xf32>
    %10 = math.exp %9 : vector<16x256xf32>
    %cst_8 = arith.constant 1.000000e+00 : f32
    %11 = vector.broadcast %cst_8 : f32 to vector<16x256xf32>
    %12 = arith.addf %11, %10 : vector<16x256xf32>
    %13 = arith.divf %11, %12 : vector<16x256xf32>
    %14 = arith.mulf %6, %13 : vector<16x256xf32>
    %15 = arith.mulf %14, %8 : vector<16x256xf32>
    %c0_9 = arith.constant 0 : index
    %c0_10 = arith.constant 0 : index
    %16 = vector.load %arg11[%c0_9, %c0_10] : memref<16x128xf32, #tpu.memory_space<vmem>>, vector<16x128xf32>
    %17 = arith.truncf %15 : vector<16x256xf32> to vector<16x256xbf16>
    %c0_11 = arith.constant 0 : index
    %c0_12 = arith.constant 0 : index
    %18 = vector.load %arg6[%c0_11, %c0_12] : memref<256x128xbf16, #tpu.memory_space<vmem>>, vector<256x128xbf16>
    %cst_13 = arith.constant dense<0.000000e+00> : vector<16x128xf32>
    %19 = tpu.matmul %17, %18, %cst_13 {dimension_numbers = #tpu.dot_dimension_numbers<[1], [0], [0], [1], [0, 0, 1, 1], [], []>} : vector<16x256xbf16>, vector<256x128xbf16>, vector<16x128xf32> -> vector<16x128xf32>
    %20 = arith.addf %16, %19 : vector<16x128xf32>
    %c0_14 = arith.constant 0 : index
    %c0_15 = arith.constant 0 : index
    %21 = vector.load %arg11[%c0_14, %c0_15] : memref<16x128xf32, #tpu.memory_space<vmem>>, vector<16x128xf32>
    tpu.vector_store %arg11[%c0_14, %c0_15], %20 {strides = array<i32>} : memref<16x128xf32, #tpu.memory_space<vmem>>, vector<16x128xf32>,
    %c0_i32_16 = arith.constant 0 : i32
    %22 = arith.cmpi eq, %arg2, %c0_i32_16 : i32
    %23 = arith.extui %22 : i1 to i32
    %c0_i32_17 = arith.constant 0 : i32
    %24 = arith.cmpi ne, %23, %c0_i32_17 : i32
    scf.if %24 {
      %c0_18 = arith.constant 0 : index
      %c0_19 = arith.constant 0 : index
      %25 = vector.load %arg11[%c0_18, %c0_19] : memref<16x128xf32, #tpu.memory_space<vmem>>, vector<16x128xf32>
      %c0_20 = arith.constant 0 : index
      %c0_21 = arith.constant 0 : index
      %c0_22 = arith.constant 0 : index
      %26 = vector.load %arg8[%c0_20, %c0_21, %c0_22] : memref<1x16x1xf32, #tpu.memory_space<vmem>>, vector<1x16x1xf32>
      %27 = vector.shape_cast %26 : vector<1x16x1xf32> to vector<16x1xf32>
      %28 = vector.broadcast %27 : vector<16x1xf32> to vector<16x128xf32>
      %29 = arith.mulf %25, %28 : vector<16x128xf32>
      %c0_23 = arith.constant 0 : index
      %c0_24 = arith.constant 0 : index
      %c0_25 = arith.constant 0 : index
      %30 = vector.load %arg7[%c0_23, %c0_24, %c0_25] : memref<1x1x128xbf16, #tpu.memory_space<vmem>>, vector<1x1x128xbf16>
      %31 = vector.shape_cast %30 : vector<1x1x128xbf16> to vector<1x128xbf16>
      %32 = arith.extf %31 : vector<1x128xbf16> to vector<1x128xf32>
      %33 = vector.broadcast %32 : vector<1x128xf32> to vector<16x128xf32>
      %34 = arith.mulf %33, %29 : vector<16x128xf32>
      %c0_26 = arith.constant 0 : index
      %c0_27 = arith.constant 0 : index
      %c0_28 = arith.constant 0 : index
      %35 = vector.load %arg9[%c0_26, %c0_27, %c0_28] : memref<1x16x128xbf16, #tpu.memory_space<vmem>>, vector<1x16x128xbf16>
      %36 = vector.shape_cast %35 : vector<1x16x128xbf16> to vector<16x128xbf16>
      %37 = arith.extf %36 : vector<16x128xbf16> to vector<16x128xf32>
      %38 = arith.addf %34, %37 : vector<16x128xf32>
      %39 = vector.shape_cast %38 : vector<16x128xf32> to vector<1x16x128xf32>
      %40 = arith.truncf %39 : vector<1x16x128xf32> to vector<1x16x128xbf16>
      %c0_29 = arith.constant 0 : index
      %c0_30 = arith.constant 0 : index
      %c0_31 = arith.constant 0 : index
      %41 = vector.load %arg10[%c0_29, %c0_30, %c0_31] : memref<1x16x128xbf16, #tpu.memory_space<vmem>>, vector<1x16x128xbf16>
      tpu.vector_store %arg10[%c0_29, %c0_30, %c0_31], %40 {strides = array<i32>} : memref<1x16x128xbf16, #tpu.memory_space<vmem>>, vector<1x16x128xbf16>,
    } else {
    }
    return
  }
  func.func @transform_0(%arg0: i32, %arg1: i32, %arg2: i32) -> (i32, i32, i32) {
    %c0_i32 = arith.constant 0 : i32
    %c0_i32_0 = arith.constant 0 : i32
    return %arg0, %arg1, %c0_i32 : i32, i32, i32
  }
  func.func @transform_1(%arg0: i32, %arg1: i32, %arg2: i32) -> (i32, i32) {
    %c0_i32 = arith.constant 0 : i32
    %c0_i32_0 = arith.constant 0 : i32
    return %c0_i32, %arg2 : i32, i32
  }
  func.func @transform_2(%arg0: i32, %arg1: i32, %arg2: i32) -> (i32, i32) {
    %c0_i32 = arith.constant 0 : i32
    %c0_i32_0 = arith.constant 0 : i32
    return %c0_i32, %arg2 : i32, i32
  }
  func.func @transform_3(%arg0: i32, %arg1: i32, %arg2: i32) -> (i32, i32) {
    %c0_i32 = arith.constant 0 : i32
    %c0_i32_0 = arith.constant 0 : i32
    return %arg2, %c0_i32 : i32, i32
  }
  func.func @transform_4(%arg0: i32, %arg1: i32, %arg2: i32) -> (i32, i32, i32) {
    %c0_i32 = arith.constant 0 : i32
    %c0_i32_0 = arith.constant 0 : i32
    %c0_i32_1 = arith.constant 0 : i32
    return %arg0, %c0_i32, %c0_i32_0 : i32, i32, i32
  }
  func.func @transform_5(%arg0: i32, %arg1: i32, %arg2: i32) -> (i32, i32, i32) {
    %c0_i32 = arith.constant 0 : i32
    %c0_i32_0 = arith.constant 0 : i32
    return %arg0, %arg1, %c0_i32 : i32, i32, i32
  }
  func.func @transform_6(%arg0: i32, %arg1: i32, %arg2: i32) -> (i32, i32, i32) {
    %c0_i32 = arith.constant 0 : i32
    %c0_i32_0 = arith.constant 0 : i32
    return %arg0, %arg1, %c0_i32 : i32, i32, i32
  }
  func.func @transform_7(%arg0: i32, %arg1: i32, %arg2: i32) -> (i32, i32, i32) {
    %c0_i32 = arith.constant 0 : i32
    %c0_i32_0 = arith.constant 0 : i32
    return %arg0, %arg1, %c0_i32 : i32, i32, i32
  }
}

</mosaic_0001>

<bundles_post_ra>
// kernel: hidream_block_forward.24
= control target key start
LH: loop header
LB: loop body
LE: loop exit
PB: predicated region body
PF: predicated region fallthrough
CT: control target
= control target key end

     0   :  { %s435_s9 = smov 0   ;;  %s437_s10 = smov 0   ;;  %s478_s0 = inlined_call_operand.vmem [shape: bf16[2,16,256], index: 0, kind: input, shape index: {}]   ;;  %s479_s1 = inlined_call_operand.vmem [shape: bf16[1,256], index: 1, kind: input, shape index: {}]   ;;  %s480_s2 = inlined_call_operand.vmem [shape: bf16[2,16,256], index: 2, kind: output, shape index: {}]  }
   0x1   :  { %s439_s11 = smov 0  }
   0x2 LB: > { %s24_s12 = sadd.s32 1, %s414_s10  ;;  %p355_p0 = scmp.ge.s32.totalorder %s418_s11, 1  ;;  %s418_s11 = sphi %s439_s11, %s12_s11   ;;  %s414_s10 = sphi %s437_s10, %s482_s10   ;;  %s410_s9 = sphi %s435_s9, %s481_s9  }
   0x3   : > { %p26_p1 = scmp.ge.s32.totalorder %s24_s12, 2  ;;  %p134_p2 = scmp.lt.s32.totalorder %s418_s11, 3 }
   0x5   : > { %s484_s12 = smov (%p26_p1, %s24_s12), 0  ;;  %p135_p3 = pnand %p355_p0, %p134_p2 }
   0x6   : > { %p167_p4 = scmp.lt.s32.totalorder (!%p135_p3), %s410_s9, 1 }
   0x7   : > { %138 = sbr.rel (%p135_p3) target bundleno = 189 (0xbd), region = 28 }
   0xc   : > { %s486_s9 = smov (!%p167_p4, %s410_s9), 1  ;;  %v219_v13 = vlaneseq  ;;  %v207_v15 = vld [vmem:[%s479_s1] sm:$0x3] }
   0xd   : > { %s364_s13 = sshll.u32 %s486_s9, 4  ;;  %v208_v18 = vunpack.c.l.bf16 %v207_v15 }
   0xe   : > { %s175_s16 = scalar_lea.vmem %s478_s0, %s364_s13  ;;  %v220_v19 = vshrl.u32 %v219_v13, 7  ;;  %s186_s21 = scalar_lea.vmem %s480_s2, %s364_s13 }
   0xf   : > { %v188_v0 = vld [vmem:[%s175_s16] sm:$0xff]  ;;  %v189_v1 = vld [vmem:[%s175_s16 + $0x8] sm:$0xff]  ;;  %v209_v22 = vmul.f32 0.088388346, %v208_v18 }
  0x10   : > { %v190_v2 = vunpack.c.l.bf16 %v188_v0  ;;  %v191_v3 = vunpack.c.h.bf16 %v188_v0  ;;  %v192_v4 = vunpack.c.l.bf16 %v189_v1  ;;  %v193_v5 = vunpack.c.h.bf16 %v189_v1 }
  0x11   : > { %v221_v23 = vsub.s32 0, %v220_v19  ;;  %v225_v24 = vsub.s32 2, %v220_v19 }
  0x12   : > { %v194_v6 = vmul.f32 %v190_v2, %v190_v2  ;;  %v195_v7 = vmul.f32 %v191_v3, %v191_v3  ;;  %v196_v8 = vmul.f32 %v192_v4, %v192_v4  ;;  %v197_v9 = vmul.f32 %v193_v5, %v193_v5 }
  0x13   : > { %v222_v25 = vrot.slane %v209_v22, %v221_v23  ;;  %v226_v26 = vrot.slane %v209_v22, %v225_v24 }
  0x14   : > { %v198_v10 = vadd.f32 %v195_v7, %v194_v6  ;;  %v201_v11 = vadd.f32 %v197_v9, %v196_v8 }
  0x15   : > { %v232_v27 = vrot.slane %v222_v25, %v221_v23  ;;  %v236_v28 = vrot.slane %v226_v26, %v221_v23 }
  0x16   : > { %199 = vadd.xlane.f32.xlu0 %v198_v10 }
  0x1a   : > { %202 = vadd.xlane.f32.xlu0 %v201_v11 }
  0x9f   : > { %v200_v12 = vpop.xlane.xlu0 %199 }
  0xa0   : > { %v205_v14 = vmul.f32 0.00390625, %v200_v12 }
  0xa2   : > { %v210_v16 = vadd.f32 1e-05, %v205_v14 }
  0xa3   : > { %v203_v17 = vpop.xlane.xlu0 %202 }
  0xa4   : > { %392 = vrsqrt.f32 %v210_v16  ;;  %v206_v20 = vmul.f32 0.00390625, %v203_v17 }
  0xa6   : > { %v211_v21 = vadd.f32 1e-05, %v206_v20 }
  0xa8   : > { %394 = vrsqrt.f32 %v211_v21 }
  0xb1   : > { %v393_v29 = vpop.eup %392 }
  0xb2   : > { %v214_v30 = vmul.f32 %v393_v29, %v190_v2  ;;  %v215_v31 = vmul.f32 %v393_v29, %v191_v3 }
  0xb4   : > { %v237_v32 = vmul.f32 %v232_v27, %v214_v30  ;;  %v238_v33 = vmul.f32 %v236_v28, %v215_v31 }
  0xb5   : > { %v395_v34 = vpop.eup %394 }
  0xb6   : > { %v366_v35 = vpack.c.bf16 %v238_v33, %v237_v32  ;;  %v216_v36 = vmul.f32 %v395_v34, %v192_v4  ;;  %v217_v37 = vmul.f32 %v395_v34, %v193_v5 }
  0xb8   : > { %253 = vst [vmem:[%s186_s21] sm:$0xff] %v366_v35  ;;  %v239_v38 = vmul.f32 %v232_v27, %v216_v36  ;;  %v240_v39 = vmul.f32 %v236_v28, %v217_v37 }
  0xba   : > { %v367_v40 = vpack.c.bf16 %v240_v39, %v239_v38 }
  0xbc   : > { %254 = vst [vmem:[%s186_s21 + $0x8] sm:$0xff] %v367_v40 }
  0xbd PF: > { %s12_s11 = sadd.s32 1, %s418_s11   ;;  %s481_s9 = smov %s414_s10 }
  0xbe   : > { %p9_p5 = scmp.ge.s32.totalorder %s12_s11, 4   ;;  %s482_s10 = smov %s484_s12 }
  0xc0   :  { %11 = sbr.rel (!%p9_p5) target bundleno = 2 (0x2), region = 58 }

// kernel: hidream_block_forward.21
= control target key start
LH: loop header
LB: loop body
LE: loop exit
PB: predicated region body
PF: predicated region fallthrough
CT: control target
= control target key end

     0   :  { %s495_s12 = smov 0   ;;  %s497_s13 = smov 0   ;;  %s543_s0 = inlined_call_operand.vmem [shape: bf16[2,16,128], index: 0, kind: input, shape index: {}]   ;;  %s544_s1 = inlined_call_operand.vmem [shape: bf16[2,1,128], index: 1, kind: input, shape index: {}]   ;;  %s545_s2 = inlined_call_operand.vmem [shape: bf16[2,1,128], index: 2, kind: input, shape index: {}]   ;;  %s546_s3 = inlined_call_operand.vmem [shape: bf16[2,16,128], index: 3, kind: output, shape index: {}]  }
   0x1   :  { %s499_s14 = smov 0  }
   0x2 LB: > { %s25_s15 = sadd.s32 1, %s469_s13  ;;  %p401_p0 = scmp.ge.s32.totalorder %s473_s14, 1  ;;  %s473_s14 = sphi %s499_s14, %s13_s14   ;;  %s469_s13 = sphi %s497_s13, %s548_s13   ;;  %s465_s12 = sphi %s495_s12, %s547_s12  }
   0x3   : > { %p27_p1 = scmp.ge.s32.totalorder %s25_s15, 2  ;;  %p174_p2 = scmp.lt.s32.totalorder %s473_s14, 3 }
   0x5   : > { %s550_s15 = smov (%p27_p1, %s25_s15), 0  ;;  %p175_p3 = pnand %p401_p0, %p174_p2 }
   0x6   : > { %p213_p4 = scmp.lt.s32.totalorder (!%p175_p3), %s465_s12, 1 }
   0x7   : > { %178 = sbr.rel (%p175_p3) target bundleno = 331 (0x14b), region = 32 }
   0xc   : > { %s552_s12 = smov (!%p213_p4, %s465_s12), 1  ;;  %v270_v16 = vlaneseq }
   0xd   : > { %s410_s16 = sshll.u32 %s552_s12, 3  ;;  %s224_s22 = scalar_lea.vmem %s544_s1, %s552_s12 }
   0xe   : > { %s220_s19 = scalar_lea.vmem %s543_s0, %s410_s16  ;;  %v265_v18 = vld [vmem:[%s224_s22] sm:$0x1]  ;;  %v271_v20 = vshrl.u32 %v270_v16, 7  ;;  %s227_s25 = scalar_lea.vmem %s545_s2, %s552_s12 }
   0xf   : > { %v415_v0 = vld [vmem:[%s220_s19] sm:$0xff]   ;;  %v266_v19 = vunpack.c.l.bf16 %v265_v18  ;;  %s236_s28 = scalar_lea.vmem %s546_s3, %s410_s16 }
  0x10   : > { %v416_v1 = vunpack.c.l.bf16 %v415_v0  ;;  %v417_v2 = vunpack.c.h.bf16 %v415_v0  ;;  %v272_v22 = vsub.s32 0, %v271_v20  ;;  %v267_v23 = vld [vmem:[%s227_s25] sm:$0x1] }
  0x11   : > { %v269_v21 = vadd.f32 1.0, %v266_v19  ;;  %v268_v25 = vunpack.c.l.bf16 %v267_v23 }
  0x12   : > { %242 = vadd.xlane.f32.xlu0 %v416_v1 }
  0x13   : > { %v273_v26 = vrot.slane %v269_v21, %v272_v22  ;;  %v279_v29 = vrot.slane %v268_v25, %v272_v22 }
  0x16   : > { %244 = vadd.xlane.f32.xlu0 %v417_v2 }
  0x9b   : > { %v243_v3 = vpop.xlane.xlu0 %242 }
  0x9c   : > { %v247_v4 = vmul.f32 0.0078125, %v243_v3 }
  0x9e   : > { %v249_v5 = vsub.f32 %v416_v1, %v247_v4 }
  0x9f   : > { %v245_v6 = vpop.xlane.xlu0 %244 }
  0xa0   : > { %v248_v7 = vmul.f32 0.0078125, %v245_v6  ;;  %v251_v8 = vmul.f32 %v249_v5, %v249_v5 }
  0xa2   : > { %v250_v9 = vsub.f32 %v417_v2, %v248_v7  ;;  %253 = vadd.xlane.f32.xlu1 %v251_v8 }
  0xa4   : > { %v252_v10 = vmul.f32 %v250_v9, %v250_v9 }
  0xa6   : > { %255 = vadd.xlane.f32.xlu1 %v252_v10 }
 0x12b   : > { %v254_v11 = vpop.xlane.xlu1 %253 }
 0x12c   : > { %v257_v12 = vmul.f32 0.0078125, %v254_v11 }
 0x12e   : > { %v259_v13 = vadd.f32 1e-06, %v257_v12 }
 0x12f   : > { %v256_v14 = vpop.xlane.xlu1 %255 }
 0x130   : > { %447 = vrsqrt.f32 %v259_v13  ;;  %v258_v15 = vmul.f32 0.0078125, %v256_v14 }
 0x132   : > { %v260_v17 = vadd.f32 1e-06, %v258_v15 }
 0x134   : > { %449 = vrsqrt.f32 %v260_v17 }
 0x13d   : > { %v448_v24 = vpop.eup %447 }
 0x13e   : > { %v263_v27 = vmul.f32 %v448_v24, %v249_v5 }
 0x140   : > { %v274_v30 = vmul.f32 %v273_v26, %v263_v27 }
 0x141   : > { %v450_v28 = vpop.eup %449 }
 0x142   : > { %v264_v31 = vmul.f32 %v450_v28, %v250_v9  ;;  %v280_v33 = vadd.f32 %v279_v29, %v274_v30 }
 0x144   : > { %v275_v32 = vmul.f32 %v273_v26, %v264_v31 }
 0x146   : > { %v281_v34 = vadd.f32 %v279_v29, %v275_v32 }
 0x148   : > { %v421_v35 = vpack.c.bf16 %v281_v34, %v280_v33 }
 0x14a   : > { %422 = vst [vmem:[%s236_s28] sm:$0xff] %v421_v35  }
 0x14b PF: > { %s13_s14 = sadd.s32 1, %s473_s14   ;;  %s547_s12 = smov %s469_s13 }
 0x14c   : > { %p10_p5 = scmp.ge.s32.totalorder %s13_s14, 4   ;;  %s548_s13 = smov %s550_s15 }
 0x14e   :  { %12 = sbr.rel (!%p10_p5) target bundleno = 2 (0x2), region = 68 }

// kernel: hidream_block_forward.20
= control target key start
LH: loop header
LB: loop body
LE: loop exit
PB: predicated region body
PF: predicated region fallthrough
CT: control target
= control target key end

     0   :  { %8 = vsyncpa [#allocation4], 0  ;;  %s1497_s0 = inlined_call_operand.vmem [shape: bf16[2,128], index: 0, kind: input, shape index: {}]   ;;  %s1498_s1 = inlined_call_operand.hbm [shape: bf16[128,1536], index: 1, kind: input, shape index: {}]   ;;  %s1499_s2 = inlined_call_operand.vmem [shape: bf16[1,1536], index: 2, kind: input, shape index: {}]   ;;  %s1500_s3 = inlined_call_operand.vmem [shape: bf16[2,1536], index: 3, kind: output, shape index: {}]  }
   0x1   :  { %10 = vsyncpa [#allocation4 + $0x1], 0  ;;  %s1335_s12 = smov 0   ;;  %s1337_s13 = smov 0  }
   0x2   :  { %s1339_s14 = smov 0   ;;  %s1341_s15 = smov 0  }
   0x3   :  { %s1343_s16 = smov 0   ;;  %s1345_s17 = smov 0  }
   0x4 LB: > { %s1030_s18 = sadd.s32 4294967295, %s1305_s17   ;;  %s31_s19 = sadd.s32 1, %s1301_s16  ;;  %s1305_s17 = sphi %s1345_s17, %s16_s17   ;;  %s1301_s16 = sphi %s1343_s16, %s1507_s16   ;;  %s1297_s15 = sphi %s1341_s15, %s1506_s15   ;;  %s1293_s14 = sphi %s1339_s14, %s1505_s14   ;;  %s1289_s13 = sphi %s1337_s13, %s1504_s13   ;;  %s1285_s12 = sphi %s1335_s12, %s1503_s12  }
   0x5   : > { %p33_p0 = scmp.ge.s32.totalorder %s31_s19, 2  ;;  %s72_s20 = sadd.s32 1, %s1293_s14 }
   0x6   : > { %p79_p1 = scmp.ne.s32.totalorder %s1293_s14, %s1289_s13  ;;  %p80_p2 = scmp.eq.s32.totalorder %s1305_s17, 0 }
   0x7   : > { %s1509_s19 = smov (%p33_p0, %s31_s19), 0  ;;  %p85_p4 = scmp.ne.s32.totalorder %s1289_s13, %s1285_s12 }
   0x8   : > { %p81_p3 = por %p80_p2, %p79_p1  ;;  %s68_s21 = ssub.s32 %s1301_s16, %s1509_s19 }
   0x9   : > { %p86_p5 = scmp.eq.s32.totalorder %s1030_s18, 0  ;;  %p70_p6 = scmp.eq.s32.totalorder %s68_s21, 0 }
   0xa   : > { %p1099_p8 = scmp.lt.s32.totalorder %s1305_s17, 2  ;;  %s172_s24 = sand.u32 1, %s1293_s14  }
   0xb   : > { %p1374_p7 = por %p86_p5, %p85_p4  ;;  %s1090_s25 = smul.u32 384, %s1301_s16 }
   0xc   : > { %s1380_s23 = scalar_select %p70_p6, %s1293_s14, %s72_s20  }
   0xd   : > { %s1091_s26 = smul.u32 384, %s172_s24  ;;  %s185_s29 = scalar_lea.hbm %s1498_s1, %s1090_s25 }
   0xe   : > { %p1387_p9 = pnand %p1099_p8, %p81_p3  ;;  %p1036_p10 = scmp.ge.s32.totalorder %s1305_s17, 1 }
   0xf   : > { %s176_s4 = scalar_lea.vmem [#allocation3], %s1091_s26  ;;  %s173_s6 = scalar_lea.sflag [#allocation4], %s172_s24 }
  0x10   : > { %s186_s5 = sshll.u32 %s176_s4, 4  ;;  %p1229_p11 = pneg %p1387_p9  ;;  %s187_s5 = int_to_ptr.vmem [resolvable:$true] %s186_s5 }
  0x11   : > { %s1240_s7 = scalar_lea.vmem %s187_s5, 6144  ;;  %s1307_s8 = smov [#allocation3]  }
  0x12   : > { %p1241_p12 = scmp.ne.s32.totalorder %s187_s5, %s1240_s7  ;;  %s1245_s9 = sshll.u32 %s1307_s8, 4  ;;  %s1246_s9 = int_to_ptr.vmem [resolvable:$false] %s1245_s9 }
  0x13   : > { %s1247_s10 = scalar_lea.vmem %s1246_s9, 12288  ;;  %p1248_p1 = scmp.lt.s32.totalorder %s187_s5, %s1246_s9 }
  0x14   : > { %p1243_p13 = pnand %p1241_p12, %p1229_p11  ;;  %p1249_p2 = scmp.lt.s32.totalorder %s1247_s10, %s1240_s7 }
  0x16   : > { %p1244_p0 = pneg %p1243_p13  ;;  %p1250_p3 = por %p1249_p2, %p1248_p1 }
  0x18   : > { %p1251_p4 = pnand %p1250_p3, %p1244_p0 }
  0x1a   : > { %1254 = shalt.err (!%p1251_p4)
}
  0x1b   : > { %s1308_s11 = smov 768   ;;  %s1309_s12 = smov 384  }
  0x1c   : > { %s1310_s18 = smov 24   ;;  %p202_p5 = scmp.lt.s32.totalorder %s1305_s17, 3 }
  0x1d   : > { %1098 = dma.hbm_to_vmem [thread:$0]  (!%p1387_p9), %s185_s29, 6144, %s187_s5, %s173_s6, %s1308_s11, %s1309_s12, %s1310_s18  }
  0x1e   : > { %p203_p6 = pnand %p1036_p10, %p202_p5 }
  0x1f   : > { %s208_s20 = sand.u32 (!%p203_p6), 1, %s1289_s13  }
  0x20   : > { %206 = sbr.rel (%p203_p6) target bundleno = 328 (0x148), region = 32  ;;  %s209_s24 = scalar_lea.sflag (!%p203_p6), [#allocation4], %s208_s20 }
  0x21   : > { %s1092_s21 = smul.u32 (!%p203_p6), 384, %s208_s20 }
  0x23   : > { %s1400_s25 = scalar_lea.vmem (!%p203_p6), [#allocation3], %s1092_s21 }
  0x25   : > { %1280 = dma.done.wait (%p1374_p7), %s209_s24, 6144  }
  0x26   : > { %1282 = vsyncadd (%p1374_p7), %s209_s24, 4294961152  ;;  %v1311_v0 = vmov 0   ;;  %v1155_v1 = vld [vmem:[%s1400_s25 + $0x154] ss:$24 sps:$4 sm:$0xff]   ;;  %v1159_v3 = vld [vmem:[%s1400_s25 + $0x150] ss:$24 sps:$4 sm:$0xff]   ;;  %v702_v53 = vlaneseq }
  0x27   : > { %600 = vmatprep.mubr.bf16.mxu0 %v1311_v0  ;;  %641 = vmatprep.mubr.bf16.mxu1 %v1311_v0  ;;  %v1157_v2 = vld [vmem:[%s1400_s25 + $0x15c] ss:$24 sps:$4 sm:$0xff]   ;;  %v1160_v4 = vld [vmem:[%s1400_s25 + $0x158] ss:$24 sps:$4 sm:$0xff]   ;;  %v1163_v6 = vld [vmem:[%s1400_s25 + $0x12c] ss:$24 sps:$4 sm:$0xff]  }
  0x28   : > { %568 = vmatprep.subr.bf16.mxu0 %v1155_v1  ;;  %609 = vmatprep.subr.bf16.mxu1 %v1157_v2  ;;  %v1161_v5 = vld [vmem:[%s1400_s25 + $0x124] ss:$24 sps:$4 sm:$0xff]   ;;  %v1165_v7 = vld [vmem:[%s1400_s25 + $0x120] ss:$24 sps:$4 sm:$0xff]   ;;  %v1167_v9 = vld [vmem:[%s1400_s25 + $0xf4] ss:$24 sps:$4 sm:$0xff]  }
  0x29   : > { %569 = vmatpush1.bf16.msra.mxu0 %v1159_v3  ;;  %610 = vmatpush1.bf16.msra.mxu1 %v1160_v4  ;;  %v1166_v8 = vld [vmem:[%s1400_s25 + $0x128] ss:$24 sps:$4 sm:$0xff]   ;;  %v1169_v10 = vld [vmem:[%s1400_s25 + $0xfc] ss:$24 sps:$4 sm:$0xff]   ;;  %v1172_v12 = vld [vmem:[%s1400_s25 + $0xf8] ss:$24 sps:$4 sm:$0xff]  }
  0x2a   : > { %570 = vmatprep.subr.bf16.mxu0 %v1161_v5  ;;  %611 = vmatprep.subr.bf16.mxu1 %v1163_v6  ;;  %v1171_v11 = vld [vmem:[%s1400_s25 + $0xf0] ss:$24 sps:$4 sm:$0xff]   ;;  %v1173_v13 = vld [vmem:[%s1400_s25 + $0xc4] ss:$24 sps:$4 sm:$0xff]   ;;  %v1177_v15 = vld [vmem:[%s1400_s25 + $0xc0] ss:$24 sps:$4 sm:$0xff]  }
  0x2b   : > { %v1175_v14 = vld [vmem:[%s1400_s25 + $0xcc] ss:$24 sps:$4 sm:$0xff]   ;;  %v1178_v16 = vld [vmem:[%s1400_s25 + $0xc8] ss:$24 sps:$4 sm:$0xff]   ;;  %v1181_v18 = vld [vmem:[%s1400_s25 + $0x9c] ss:$24 sps:$4 sm:$0xff]  }
  0x2c   : > { %v1179_v17 = vld [vmem:[%s1400_s25 + $0x94] ss:$24 sps:$4 sm:$0xff]   ;;  %v1183_v19 = vld [vmem:[%s1400_s25 + $0x90] ss:$24 sps:$4 sm:$0xff]   ;;  %v1185_v21 = vld [vmem:[%s1400_s25 + $0x64] ss:$24 sps:$4 sm:$0xff]  }
  0x2d   : > { %571 = vmatpush1.bf16.msra.mxu0 %v1165_v7  ;;  %612 = vmatpush1.bf16.msra.mxu1 %v1166_v8  ;;  %v1184_v20 = vld [vmem:[%s1400_s25 + $0x98] ss:$24 sps:$4 sm:$0xff]   ;;  %v1187_v22 = vld [vmem:[%s1400_s25 + $0x6c] ss:$24 sps:$4 sm:$0xff]   ;;  %v1190_v24 = vld [vmem:[%s1400_s25 + $0x68] ss:$24 sps:$4 sm:$0xff]  }
  0x2e   : > { %572 = vmatprep.subr.bf16.mxu0 %v1167_v9  ;;  %613 = vmatprep.subr.bf16.mxu1 %v1169_v10  ;;  %v1189_v23 = vld [vmem:[%s1400_s25 + $0x60] ss:$24 sps:$4 sm:$0xff]   ;;  %v1191_v25 = vld [vmem:[%s1400_s25 + $0x34] ss:$24 sps:$4 sm:$0xff]   ;;  %v1195_v27 = vld [vmem:[%s1400_s25 + $0x30] ss:$24 sps:$4 sm:$0xff]  }
  0x2f   : > { %v1193_v26 = vld [vmem:[%s1400_s25 + $0x3c] ss:$24 sps:$4 sm:$0xff]   ;;  %v1196_v28 = vld [vmem:[%s1400_s25 + $0x38] ss:$24 sps:$4 sm:$0xff]   ;;  %v1199_v30 = vld [vmem:[%s1400_s25 + $0xc] ss:$24 sps:$4 sm:$0xff]  }
  0x30   : > { %v1197_v29 = vld [vmem:[%s1400_s25 + $0x4] ss:$24 sps:$4 sm:$0xff]   ;;  %v1201_v31 = vld [vmem:[%s1400_s25] ss:$24 sps:$4 sm:$0xff]   ;;  %v279_v34 = vld [vmem:[%s1497_s0] sm:$0x1] }
  0x31   : > { %573 = vmatpush1.bf16.msra.mxu0 %v1171_v11  ;;  %614 = vmatpush1.bf16.msra.mxu1 %v1172_v12  ;;  %v1202_v32 = vld [vmem:[%s1400_s25 + $0x8] ss:$24 sps:$4 sm:$0xff]   ;;  %v1205_v33 = vld [vmem:[%s1400_s25 + $0x164] ss:$24 sps:$4 sm:$0xff]   ;;  %v1208_v36 = vld [vmem:[%s1400_s25 + $0x134] ss:$24 sps:$4 sm:$0xff]  }
  0x32   : > { %574 = vmatprep.subr.bf16.mxu0 %v1173_v13  ;;  %615 = vmatprep.subr.bf16.mxu1 %v1175_v14  ;;  %v1203_v35 = vld [vmem:[%s1400_s25 + $0x160] ss:$24 sps:$4 sm:$0xff]   ;;  %v1206_v37 = vld [vmem:[%s1400_s25 + $0x130] ss:$24 sps:$4 sm:$0xff]   ;;  %v1211_v38 = vld [vmem:[%s1400_s25 + $0x104] ss:$24 sps:$4 sm:$0xff]  }
  0x33   : > { %v1209_v39 = vld [vmem:[%s1400_s25 + $0x100] ss:$24 sps:$4 sm:$0xff]   ;;  %v1214_v40 = vld [vmem:[%s1400_s25 + $0xd4] ss:$24 sps:$4 sm:$0xff]   ;;  %v1212_v41 = vld [vmem:[%s1400_s25 + $0xd0] ss:$24 sps:$4 sm:$0xff]  }
  0x34   : > { %v1217_v42 = vld [vmem:[%s1400_s25 + $0xa4] ss:$24 sps:$4 sm:$0xff]   ;;  %v1215_v43 = vld [vmem:[%s1400_s25 + $0xa0] ss:$24 sps:$4 sm:$0xff]   ;;  %v1220_v44 = vld [vmem:[%s1400_s25 + $0x74] ss:$24 sps:$4 sm:$0xff]  }
  0x35   : > { %575 = vmatpush1.bf16.msra.mxu0 %v1177_v15  ;;  %616 = vmatpush1.bf16.msra.mxu1 %v1178_v16  ;;  %v1218_v45 = vld [vmem:[%s1400_s25 + $0x70] ss:$24 sps:$4 sm:$0xff]   ;;  %v1223_v46 = vld [vmem:[%s1400_s25 + $0x44] ss:$24 sps:$4 sm:$0xff]   ;;  %v1221_v47 = vld [vmem:[%s1400_s25 + $0x40] ss:$24 sps:$4 sm:$0xff]  }
  0x36   : > { %576 = vmatprep.subr.bf16.mxu0 %v1179_v17  ;;  %617 = vmatprep.subr.bf16.mxu1 %v1181_v18  ;;  %v1226_v48 = vld [vmem:[%s1400_s25 + $0x14] ss:$24 sps:$4 sm:$0xff]   ;;  %v1224_v49 = vld [vmem:[%s1400_s25 + $0x10] ss:$24 sps:$4 sm:$0xff]   ;;  %v1312_v50 = vmov 0.0   ;;  %s256_s27 = smul.u32 6, %s1297_s15 }
  0x37   : > { %276 = vst [vmem:[#allocation2 + $0x8] sm:$0xf] %v1312_v50  ;;  %v1313_v51 = vmov 1983009808   ;;  %v1463_v55 = vshrl.u32 %v702_v53, 7 }
  0x38   : > { %p257_p7 = scmp.lt.s32.totalorder %s256_s27, 11  ;;  %v700_v52 = vunpack.c.l.s4 %v1313_v51 }
  0x39   : > { %577 = vmatpush1.bf16.msra.mxu0 %v1183_v19  ;;  %618 = vmatpush1.bf16.msra.mxu1 %v1184_v20  ;;  %v740_v4 = vsub.s32 0, %v1463_v55  ;;  %v744_v9 = vsub.s32 2, %v1463_v55  ;;  %v748_v10 = vsub.s32 4, %v1463_v55  ;;  %v752_v11 = vsub.s32 6, %v1463_v55 }
  0x3a   : > { %578 = vmatprep.subr.bf16.mxu0 %v1185_v21  ;;  %619 = vmatprep.subr.bf16.mxu1 %v1187_v22  ;;  %s1511_s27 = smov (!%p257_p7, %s256_s27), 11  ;;  %v701_v54 = vunpack.c.0.s8 %v700_v52 }
  0x3b   : > { %s259_s30 = scalar_lea.vmem %s1499_s2, %s1511_s27  ;;  %s268_s5 = scalar_lea.vmem %s1500_s3, %s1511_s27 }
  0x3c   : > { %v704_v58 = vsub.s32 %v701_v54, %v1463_v55  ;;  %v733_v63 = vld [vmem:[%s259_s30] sm:$0x3f] }
  0x3d   : > { %579 = vmatpush1.bf16.msra.mxu0 %v1189_v23  ;;  %620 = vmatpush1.bf16.msra.mxu1 %v1190_v24  ;;  %v734_v5 = vunpack.c.l.bf16 %v733_v63 }
  0x3e   : > { %580 = vmatprep.subr.bf16.mxu0 %v1191_v25  ;;  %621 = vmatprep.subr.bf16.mxu1 %v1193_v26  ;;  %v735_v25 = vunpack.c.h.bf16 %v733_v63 }
  0x3f   : > { %v741_v12 = vrot.slane %v734_v5, %v740_v4  ;;  %v745_v13 = vrot.slane %v734_v5, %v744_v9  ;;  %v749_v14 = vrot.slane %v734_v5, %v748_v10  ;;  %v753_v15 = vrot.slane %v734_v5, %v752_v11 }
  0x41   : > { %581 = vmatpush1.bf16.msra.mxu0 %v1195_v27  ;;  %622 = vmatpush1.bf16.msra.mxu1 %v1196_v28  ;;  %v771_v16 = vrot.slane %v741_v12, %v740_v4  ;;  %v775_v17 = vrot.slane %v745_v13, %v740_v4  ;;  %v779_v18 = vrot.slane %v749_v14, %v740_v4 }
  0x42   : > { %582 = vmatprep.subr.bf16.mxu0 %v1197_v29  ;;  %623 = vmatprep.subr.bf16.mxu1 %v1199_v30  ;;  %v783_v19 = vrot.slane %v753_v15, %v740_v4  ;;  %v757_v28 = vrot.slane %v735_v25, %v740_v4  ;;  %v761_v29 = vrot.slane %v735_v25, %v744_v9 }
  0x43   : > { %v798_v20 = vcombine.low %v771_v16, %v775_v17 }
  0x44   : > { %v799_v21 = vcombine.low %v779_v18, %v783_v19 }
  0x45   : > { %583 = vmatpush1.bf16.msra.mxu0 %v1201_v31  ;;  %624 = vmatpush1.bf16.msra.mxu1 %v1202_v32  ;;  %v806_v22 = vrot.slane %v798_v20, %v704_v58 }
  0x46   : > { %650 = vmatprep.subr.bf16.mxu0 %v1205_v33  ;;  %v813_v23 = vrot.slane %v799_v21, %v704_v58  ;;  %v278_v33 = vld [vmem:[#allocation2 + $0x8] sm:$0xf] }
  0x48   : > { %601 = vmatmul.mubr.bf16.vlgmr.msra.gmra.mxu0 %v279_v34  ;;  %642 = vmatmul.mubr.bf16.vlgmr.msra.gmra.mxu1 %v279_v34  ;;  %v814_v24 = vcombine.low %v806_v22, %v813_v23 }
  0x49   : > { %651 = vmatpush1.bf16.msra.mxu0 %v1203_v35  ;;  %682 = vmatprep.mubr.bf16.mxu0 %v1311_v0 }
  0x4a   : > { %652 = vmatprep.subr.bf16.mxu0 %v1208_v36  ;;  %v787_v36 = vrot.slane %v757_v28, %v740_v4 }
  0x4d   : > { %653 = vmatpush1.bf16.msra.mxu0 %v1206_v37  ;;  %v791_v37 = vrot.slane %v761_v29, %v740_v4 }
  0x4e   : > { %654 = vmatprep.subr.bf16.mxu0 %v1211_v38 }
  0x51   : > { %655 = vmatpush1.bf16.msra.mxu0 %v1209_v39 }
  0x52   : > { %656 = vmatprep.subr.bf16.mxu0 %v1214_v40 }
  0x55   : > { %657 = vmatpush1.bf16.msra.mxu0 %v1212_v41 }
  0x56   : > { %658 = vmatprep.subr.bf16.mxu0 %v1217_v42  ;;  %v1314_v42 = vmov 1966171168  }
  0x59   : > { %659 = vmatpush1.bf16.msra.mxu0 %v1215_v43  ;;  %v876_v43 = vunpack.c.l.s4 %v1314_v42 }
  0x5a   : > { %660 = vmatprep.subr.bf16.mxu0 %v1220_v44  ;;  %v815_v44 = vcombine.low %v787_v36, %v791_v37 }
  0x5d   : > { %661 = vmatpush1.bf16.msra.mxu0 %v1218_v45 }
  0x5e   : > { %662 = vmatprep.subr.bf16.mxu0 %v1223_v46 }
  0x61   : > { %663 = vmatpush1.bf16.msra.mxu0 %v1221_v47  ;;  %v877_v47 = vunpack.c.0.s8 %v876_v43 }
  0x62   : > { %664 = vmatprep.subr.bf16.mxu0 %v1226_v48  ;;  %v822_v48 = vrot.slane %v815_v44, %v704_v58 }
  0x63   : > { %v880_v52 = vsub.s32 %v877_v47, %v1463_v55 }
  0x65   : > { %665 = vmatpush1.bf16.msra.mxu0 %v1224_v49 }
  0x68   : > { %683 = vmatmul.mubr.bf16.vlgmr.msra.gmra.mxu0 %v279_v34 }
 0x108   : > { %v602_v56 = vpop.f32.mrf.mxu0  ;;  %v643_v57 = vpop.f32.mrf.mxu1 }
 0x10a   : > { %v604_v59 = vpop.f32.mrf.mxu0  ;;  %v645_v60 = vpop.f32.mrf.mxu1 }
 0x10b   : > { %v697_v61 = vcombine.low %v602_v56, %v604_v59  ;;  %v698_v62 = vcombine.low %v643_v57, %v645_v60 }
 0x10c   : > { %v606_v0 = vpop.f32.mrf.mxu0  ;;  %v647_v1 = vpop.f32.mrf.mxu1 }
 0x10d   : > { %v705_v2 = vrot.slane %v697_v61, %v704_v58  ;;  %v712_v3 = vrot.slane %v698_v62, %v704_v58 }
 0x10e   : > { %v607_v6 = vpop.f32.mrf.mxu0  ;;  %v648_v7 = vpop.f32.mrf.mxu1 }
 0x10f   : > { %v713_v8 = vcombine.low %v705_v2, %v712_v3 }
 0x111   : > { %v825_v26 = vadd.f32 %v814_v24, %v713_v8 }
 0x113   : > { %v829_v31 = vcombine.high %v825_v26, %v825_v26  ;;  %v836_v41 = vrot.slane %v825_v26, %v704_v58 }
 0x115   : > { %v843_v39 = vrot.slane %v829_v31, %v704_v58  ;;  %v844_v46 = vcombine.high %v836_v41, %v836_v41 }
 0x117   : > { %v845_v45 = vcombine.high %v843_v39, %v843_v39  ;;  %v1085_v51 = vpack.c.bf16 %v844_v46, %v836_v41 }
 0x119   : > { %v1086_v49 = vpack.c.bf16 %v845_v45, %v843_v39  ;;  %v881_v57 = vrot.slane %v1085_v51, %v880_v52 }
 0x11b   : > { %v888_v54 = vrot.slane %v1086_v49, %v880_v52 }
 0x11d   : > { %v896_v60 = vcombine.low %v881_v57, %v888_v54 }
 0x11f   : > { %v903_v63 = vrot.slane %v896_v60, %v880_v52 }
 0x128   : > { %v684_v27 = vpop.f32.mrf.mxu0 }
 0x12a   : > { %v686_v30 = vpop.f32.mrf.mxu0 }
 0x12b   : > { %v714_v32 = vcombine.low %v684_v27, %v686_v30 }
 0x12c   : > { %v688_v34 = vpop.f32.mrf.mxu0 }
 0x12d   : > { %v721_v35 = vrot.slane %v714_v32, %v704_v58 }
 0x12e   : > { %v689_v38 = vpop.f32.mrf.mxu0 }
 0x12f   : > { %v725_v40 = vadd.f32 %v721_v35, %v278_v33 }
 0x131   : > { %727 = vst [vmem:[#allocation2 + $0x8] sm:$0xf] %v725_v40 }
 0x138   : > { %v732_v50 = vld [vmem:[#allocation2 + $0x8] sm:$0xf] }
 0x139   : > { %v826_v53 = vadd.f32 %v822_v48, %v732_v50 }
 0x13b   : > { %v852_v56 = vrot.slane %v826_v53, %v704_v58 }
 0x13d   : > { %v853_v59 = vcombine.high %v852_v56, %v852_v56 }
 0x13f   : > { %v1087_v61 = vpack.c.bf16 %v853_v59, %v852_v56 }
 0x141   : > { %v895_v62 = vrot.slane %v1087_v61, %v880_v52 }
 0x143   : > { %v910_v0 = vrot.slane %v895_v62, %v880_v52 }
 0x145   : > { %v911_v1 = vcombine.low %v903_v63, %v910_v0 }
 0x147   : > { %913 = vst [vmem:[%s268_s5] sm:$0x3f] %v911_v1 }
 0x148 PF: > { %s16_s17 = sadd.s32 1, %s1305_s17   ;;  %s1503_s12 = smov %s1289_s13 }
 0x149   : > { %p13_p8 = scmp.ge.s32.totalorder %s16_s17, 4   ;;  %s1504_s13 = smov %s1293_s14 }
 0x14a   : > { %s1505_s14 = smov %s1380_s23  ;;  %s1506_s15 = smov %s1301_s16 }
 0x14b   : > { %s1507_s16 = smov %s1509_s19  ;;  %15 = sbr.rel (!%p13_p8) target bundleno = 4 (0x4), region = 86 }
 0x150   :  { %942 = vsyncpa [#allocation4], 1 }
 0x151   :  { %944 = vsyncpa [#allocation4 + $0x1], 1 }

// kernel: hidream_block_forward.23
= control target key start
LH: loop header
LB: loop body
LE: loop exit
PB: predicated region body
PF: predicated region fallthrough
CT: control target
= control target key end

     0   :  { %v941_v1 = vmov 0   ;;  %v610_v51 = vlaneseq  ;;  %s1177_s1 = inlined_call_operand.vmem [shape: bf16[128,768], index: 1, kind: input, shape index: {}]   ;;  %s1178_s0 = inlined_call_operand.vmem [shape: bf16[32,128], index: 0, kind: input, shape index: {}]   ;;  %s1179_s2 = inlined_call_operand.vmem [shape: bf16[1,768], index: 2, kind: input, shape index: {}]   ;;  %s1180_s3 = inlined_call_operand.vmem [shape: bf16[32,768], index: 3, kind: output, shape index: {}]  }
   0x1   :  { %v867_v0 = vld [vmem:[%s1177_s1 + $0x154] ss:$24 sps:$4 sm:$0xff]   ;;  %403 = vmatprep.mubr.bf16.mxu0 %v941_v1  ;;  %456 = vmatprep.mubr.bf16.mxu1 %v941_v1  ;;  %v871_v3 = vld [vmem:[%s1177_s1 + $0x150] ss:$24 sps:$4 sm:$0xff]   ;;  %v873_v5 = vld [vmem:[%s1177_s1 + $0x124] ss:$24 sps:$4 sm:$0xff]  }
   0x2   :  { %v869_v2 = vld [vmem:[%s1177_s1 + $0x15c] ss:$24 sps:$4 sm:$0xff]   ;;  %371 = vmatprep.subr.bf16.mxu0 %v867_v0  ;;  %v872_v4 = vld [vmem:[%s1177_s1 + $0x158] ss:$24 sps:$4 sm:$0xff]   ;;  %v875_v6 = vld [vmem:[%s1177_s1 + $0x12c] ss:$24 sps:$4 sm:$0xff]  }
   0x3   :  { %424 = vmatprep.subr.bf16.mxu1 %v869_v2  ;;  %372 = vmatpush1.bf16.msra.mxu0 %v871_v3  ;;  %v877_v7 = vld [vmem:[%s1177_s1 + $0x120] ss:$24 sps:$4 sm:$0xff]   ;;  %v879_v9 = vld [vmem:[%s1177_s1 + $0xf4] ss:$24 sps:$4 sm:$0xff]   ;;  %v883_v11 = vld [vmem:[%s1177_s1 + $0xf0] ss:$24 sps:$4 sm:$0xff]  }
   0x4   :  { %425 = vmatpush1.bf16.msra.mxu1 %v872_v4  ;;  %373 = vmatprep.subr.bf16.mxu0 %v873_v5  ;;  %v878_v8 = vld [vmem:[%s1177_s1 + $0x128] ss:$24 sps:$4 sm:$0xff]   ;;  %v881_v10 = vld [vmem:[%s1177_s1 + $0xfc] ss:$24 sps:$4 sm:$0xff]   ;;  %v884_v12 = vld [vmem:[%s1177_s1 + $0xf8] ss:$24 sps:$4 sm:$0xff]  }
   0x5   :  { %426 = vmatprep.subr.bf16.mxu1 %v875_v6  ;;  %v885_v13 = vld [vmem:[%s1177_s1 + $0xc4] ss:$24 sps:$4 sm:$0xff]   ;;  %v889_v15 = vld [vmem:[%s1177_s1 + $0xc0] ss:$24 sps:$4 sm:$0xff]   ;;  %v891_v17 = vld [vmem:[%s1177_s1 + $0x94] ss:$24 sps:$4 sm:$0xff]  }
   0x6   :  { %v887_v14 = vld [vmem:[%s1177_s1 + $0xcc] ss:$24 sps:$4 sm:$0xff]   ;;  %v890_v16 = vld [vmem:[%s1177_s1 + $0xc8] ss:$24 sps:$4 sm:$0xff]   ;;  %v893_v18 = vld [vmem:[%s1177_s1 + $0x9c] ss:$24 sps:$4 sm:$0xff]  }
   0x7   :  { %374 = vmatpush1.bf16.msra.mxu0 %v877_v7  ;;  %v895_v19 = vld [vmem:[%s1177_s1 + $0x90] ss:$24 sps:$4 sm:$0xff]   ;;  %v897_v21 = vld [vmem:[%s1177_s1 + $0x64] ss:$24 sps:$4 sm:$0xff]   ;;  %v901_v23 = vld [vmem:[%s1177_s1 + $0x60] ss:$24 sps:$4 sm:$0xff]  }
   0x8   :  { %427 = vmatpush1.bf16.msra.mxu1 %v878_v8  ;;  %375 = vmatprep.subr.bf16.mxu0 %v879_v9  ;;  %v896_v20 = vld [vmem:[%s1177_s1 + $0x98] ss:$24 sps:$4 sm:$0xff]   ;;  %v899_v22 = vld [vmem:[%s1177_s1 + $0x6c] ss:$24 sps:$4 sm:$0xff]   ;;  %v902_v24 = vld [vmem:[%s1177_s1 + $0x68] ss:$24 sps:$4 sm:$0xff]  }
   0x9   :  { %428 = vmatprep.subr.bf16.mxu1 %v881_v10  ;;  %v903_v25 = vld [vmem:[%s1177_s1 + $0x34] ss:$24 sps:$4 sm:$0xff]   ;;  %v907_v27 = vld [vmem:[%s1177_s1 + $0x30] ss:$24 sps:$4 sm:$0xff]   ;;  %v909_v29 = vld [vmem:[%s1177_s1 + $0x4] ss:$24 sps:$4 sm:$0xff]  }
   0xa   :  { %v905_v26 = vld [vmem:[%s1177_s1 + $0x3c] ss:$24 sps:$4 sm:$0xff]   ;;  %v908_v28 = vld [vmem:[%s1177_s1 + $0x38] ss:$24 sps:$4 sm:$0xff]   ;;  %v911_v30 = vld [vmem:[%s1177_s1 + $0xc] ss:$24 sps:$4 sm:$0xff]  }
   0xb   :  { %376 = vmatpush1.bf16.msra.mxu0 %v883_v11  ;;  %v913_v31 = vld [vmem:[%s1177_s1] ss:$24 sps:$4 sm:$0xff]   ;;  %v918_v33 = vld [vmem:[%s1177_s1 + $0x164] ss:$24 sps:$4 sm:$0xff]   ;;  %v921_v36 = vld [vmem:[%s1177_s1 + $0x134] ss:$24 sps:$4 sm:$0xff]  }
   0xc   :  { %429 = vmatpush1.bf16.msra.mxu1 %v884_v12  ;;  %377 = vmatprep.subr.bf16.mxu0 %v885_v13  ;;  %v914_v32 = vld [vmem:[%s1177_s1 + $0x8] ss:$24 sps:$4 sm:$0xff]   ;;  %v924_v38 = vld [vmem:[%s1177_s1 + $0x104] ss:$24 sps:$4 sm:$0xff]   ;;  %v927_v41 = vld [vmem:[%s1177_s1 + $0xd4] ss:$24 sps:$4 sm:$0xff]  }
   0xd   :  { %430 = vmatprep.subr.bf16.mxu1 %v887_v14  ;;  %v915_v34 = vld [vmem:[%s1178_s0] sm:$0xff]   ;;  %v919_v37 = vld [vmem:[%s1177_s1 + $0x130] ss:$24 sps:$4 sm:$0xff]   ;;  %v934_v45 = vld [vmem:[%s1177_s1 + $0x74] ss:$24 sps:$4 sm:$0xff]   ;;  %v1118_v52 = vshrl.u32 %v610_v51, 7 }
   0xe   :  { %v916_v35 = vld [vmem:[%s1177_s1 + $0x160] ss:$24 sps:$4 sm:$0xff]   ;;  %v931_v39 = vld [vmem:[%s1178_s0 + $0x8] sm:$0xff]   ;;  %v930_v43 = vld [vmem:[%s1177_s1 + $0xa4] ss:$24 sps:$4 sm:$0xff]  }
   0xf   :  { %378 = vmatpush1.bf16.msra.mxu0 %v889_v15  ;;  %v922_v40 = vld [vmem:[%s1177_s1 + $0x100] ss:$24 sps:$4 sm:$0xff]   ;;  %v925_v42 = vld [vmem:[%s1177_s1 + $0xd0] ss:$24 sps:$4 sm:$0xff]   ;;  %v937_v47 = vld [vmem:[%s1177_s1 + $0x44] ss:$24 sps:$4 sm:$0xff]  }
  0x10   :  { %431 = vmatpush1.bf16.msra.mxu1 %v890_v16  ;;  %379 = vmatprep.subr.bf16.mxu0 %v891_v17  ;;  %v928_v44 = vld [vmem:[%s1177_s1 + $0xa0] ss:$24 sps:$4 sm:$0xff]   ;;  %v932_v46 = vld [vmem:[%s1177_s1 + $0x70] ss:$24 sps:$4 sm:$0xff]   ;;  %v940_v49 = vld [vmem:[%s1177_s1 + $0x14] ss:$24 sps:$4 sm:$0xff]  }
  0x11   :  { %432 = vmatprep.subr.bf16.mxu1 %v893_v18  ;;  %v935_v48 = vld [vmem:[%s1177_s1 + $0x40] ss:$24 sps:$4 sm:$0xff]   ;;  %v938_v50 = vld [vmem:[%s1177_s1 + $0x10] ss:$24 sps:$4 sm:$0xff]   ;;  %v1127_v55 = vsub.s32 0, %v1118_v52  ;;  %v620_v56 = vsub.s32 4, %v1118_v52 }
  0x12   :  { %v1123_v53 = vld [vmem:[%s1179_s2] sm:$0x3f]  ;;  %v616_v57 = vsub.s32 2, %v1118_v52  ;;  %v624_v58 = vsub.s32 6, %v1118_v52 }
  0x13   :  { %380 = vmatpush1.bf16.msra.mxu0 %v895_v19  ;;  %v606_v54 = vunpack.c.l.bf16 %v1123_v53 }
  0x14   :  { %433 = vmatpush1.bf16.msra.mxu1 %v896_v20  ;;  %381 = vmatprep.subr.bf16.mxu0 %v897_v21 }
  0x15   :  { %434 = vmatprep.subr.bf16.mxu1 %v899_v22  ;;  %v613_v59 = vrot.slane %v606_v54, %v1127_v55  ;;  %v621_v60 = vrot.slane %v606_v54, %v620_v56  ;;  %v617_v61 = vrot.slane %v606_v54, %v616_v57  ;;  %v625_v62 = vrot.slane %v606_v54, %v624_v58 }
  0x17   :  { %382 = vmatpush1.bf16.msra.mxu0 %v901_v23  ;;  %v643_v63 = vrot.slane %v613_v59, %v1127_v55  ;;  %v651_v0 = vrot.slane %v621_v60, %v1127_v55  ;;  %v655_v2 = vrot.slane %v625_v62, %v1127_v55 }
  0x18   :  { %435 = vmatpush1.bf16.msra.mxu1 %v902_v24  ;;  %383 = vmatprep.subr.bf16.mxu0 %v903_v25 }
  0x19   :  { %436 = vmatprep.subr.bf16.mxu1 %v905_v26 }
  0x1b   :  { %384 = vmatpush1.bf16.msra.mxu0 %v907_v27 }
  0x1c   :  { %437 = vmatpush1.bf16.msra.mxu1 %v908_v28  ;;  %385 = vmatprep.subr.bf16.mxu0 %v909_v29 }
  0x1d   :  { %438 = vmatprep.subr.bf16.mxu1 %v911_v30 }
  0x1f   :  { %386 = vmatpush1.bf16.msra.mxu0 %v913_v31 }
  0x20   :  { %439 = vmatpush1.bf16.msra.mxu1 %v914_v32  ;;  %477 = vmatprep.subr.bf16.mxu0 %v918_v33 }
  0x21   :  { %850 = vmatprep.subr.bf16.mxu1 %v918_v33 }
  0x22   :  { %404 = vmatmul.mubr.bf16.vlgmr.msra.gmra.mxu0 %v915_v34 }
  0x23   :  { %457 = vmatmul.mubr.bf16.vlgmr.msra.gmra.mxu1 %v915_v34  ;;  %478 = vmatpush1.bf16.msra.mxu0 %v916_v35 }
  0x24   :  { %858 = vmatpush1.bf16.msra.mxu1 %v916_v35  ;;  %479 = vmatprep.subr.bf16.mxu0 %v921_v36 }
  0x25   :  { %851 = vmatprep.subr.bf16.mxu1 %v921_v36  ;;  %413 = vmatprep.mubr.bf16.mxu0 %v941_v1 }
  0x26   :  { %466 = vmatprep.mubr.bf16.mxu1 %v941_v1 }
  0x27   :  { %480 = vmatpush1.bf16.msra.mxu0 %v919_v37 }
  0x28   :  { %859 = vmatpush1.bf16.msra.mxu1 %v919_v37  ;;  %481 = vmatprep.subr.bf16.mxu0 %v924_v38 }
  0x29   :  { %852 = vmatprep.subr.bf16.mxu1 %v924_v38 }
  0x2a   :  { %414 = vmatmul.mubr.bf16.gmra.mxu0 %v931_v39 }
  0x2b   :  { %467 = vmatmul.mubr.bf16.gmra.mxu1 %v931_v39  ;;  %482 = vmatpush1.bf16.msra.mxu0 %v922_v40 }
  0x2c   :  { %860 = vmatpush1.bf16.msra.mxu1 %v922_v40  ;;  %483 = vmatprep.subr.bf16.mxu0 %v927_v41 }
  0x2d   :  { %853 = vmatprep.subr.bf16.mxu1 %v927_v41  ;;  %509 = vmatprep.mubr.bf16.mxu0 %v941_v1 }
  0x2e   :  { %519 = vmatprep.mubr.bf16.mxu1 %v941_v1  ;;  %v647_v1 = vrot.slane %v617_v61, %v1127_v55 }
  0x2f   :  { %484 = vmatpush1.bf16.msra.mxu0 %v925_v42 }
  0x30   :  { %861 = vmatpush1.bf16.msra.mxu1 %v925_v42  ;;  %485 = vmatprep.subr.bf16.mxu0 %v930_v43 }
  0x31   :  { %854 = vmatprep.subr.bf16.mxu1 %v930_v43  ;;  %v607_v43 = vunpack.c.h.bf16 %v1123_v53 }
  0x33   :  { %486 = vmatpush1.bf16.msra.mxu0 %v928_v44 }
  0x34   :  { %862 = vmatpush1.bf16.msra.mxu1 %v928_v44  ;;  %487 = vmatprep.subr.bf16.mxu0 %v934_v45  ;;  %v629_v44 = vrot.slane %v607_v43, %v1127_v55 }
  0x35   :  { %855 = vmatprep.subr.bf16.mxu1 %v934_v45  ;;  %v633_v45 = vrot.slane %v607_v43, %v616_v57 }
  0x37   :  { %488 = vmatpush1.bf16.msra.mxu0 %v932_v46 }
  0x38   :  { %863 = vmatpush1.bf16.msra.mxu1 %v932_v46  ;;  %489 = vmatprep.subr.bf16.mxu0 %v937_v47  ;;  %v659_v46 = vrot.slane %v629_v44, %v1127_v55 }
  0x39   :  { %856 = vmatprep.subr.bf16.mxu1 %v937_v47  ;;  %v663_v47 = vrot.slane %v633_v45, %v1127_v55 }
  0x3b   :  { %490 = vmatpush1.bf16.msra.mxu0 %v935_v48 }
  0x3c   :  { %864 = vmatpush1.bf16.msra.mxu1 %v935_v48  ;;  %491 = vmatprep.subr.bf16.mxu0 %v940_v49 }
  0x3d   :  { %857 = vmatprep.subr.bf16.mxu1 %v940_v49 }
  0x3f   :  { %492 = vmatpush1.bf16.msra.mxu0 %v938_v50 }
  0x40   :  { %865 = vmatpush1.bf16.msra.mxu1 %v938_v50 }
  0x42   :  { %510 = vmatmul.mubr.bf16.vlgmr.msra.gmra.mxu0 %v915_v34 }
  0x43   :  { %520 = vmatmul.mubr.bf16.vlgmr.msra.gmra.mxu1 %v931_v39 }
  0xe2   :  { %v405_v3 = vpop.f32.mrf.mxu0 }
  0xe3   :  { %v458_v4 = vpop.f32.mrf.mxu1  ;;  %v664_v5 = vadd.f32 %v643_v63, %v405_v3 }
  0xe4   :  { %v666_v6 = vadd.f32 %v651_v0, %v458_v4  ;;  %v407_v7 = vpop.f32.mrf.mxu0 }
  0xe5   :  { %v460_v8 = vpop.f32.mrf.mxu1  ;;  %v665_v9 = vadd.f32 %v647_v1, %v407_v7 }
  0xe6   :  { %v667_v10 = vadd.f32 %v655_v2, %v460_v8  ;;  %v409_v11 = vpop.f32.mrf.mxu0 }
  0xe7   :  { %v462_v12 = vpop.f32.mrf.mxu1  ;;  %v838_v13 = vpack.c.bf16 %v665_v9, %v664_v5  ;;  %v670_v17 = vadd.f32 %v643_v63, %v409_v11 }
  0xe8   :  { %v839_v14 = vpack.c.bf16 %v667_v10, %v666_v6  ;;  %v411_v15 = vpop.f32.mrf.mxu0  ;;  %v672_v18 = vadd.f32 %v651_v0, %v462_v12 }
  0xe9   :  { %v464_v16 = vpop.f32.mrf.mxu1  ;;  %760 = vst [vmem:[%s1180_s3] sm:$0xff] %v838_v13  ;;  %v671_v19 = vadd.f32 %v647_v1, %v411_v15 }
  0xea   :  { %761 = vst [vmem:[%s1180_s3 + $0x8] sm:$0xff] %v839_v14  ;;  %v673_v20 = vadd.f32 %v655_v2, %v464_v16  ;;  %v415_v21 = vpop.f32.mrf.mxu0 }
  0xeb   :  { %v468_v22 = vpop.f32.mrf.mxu1  ;;  %v841_v23 = vpack.c.bf16 %v671_v19, %v670_v17  ;;  %v676_v25 = vadd.f32 %v643_v63, %v415_v21 }
  0xec   :  { %v842_v24 = vpack.c.bf16 %v673_v20, %v672_v18  ;;  %v678_v26 = vadd.f32 %v651_v0, %v468_v22  ;;  %v417_v27 = vpop.f32.mrf.mxu0 }
  0xed   :  { %v470_v28 = vpop.f32.mrf.mxu1  ;;  %763 = vst [vmem:[%s1180_s3 + $0x18] sm:$0xff] %v841_v23  ;;  %v677_v29 = vadd.f32 %v647_v1, %v417_v27 }
  0xee   :  { %764 = vst [vmem:[%s1180_s3 + $0x20] sm:$0xff] %v842_v24  ;;  %v679_v30 = vadd.f32 %v655_v2, %v470_v28  ;;  %v419_v31 = vpop.f32.mrf.mxu0 }
  0xef   :  { %v472_v32 = vpop.f32.mrf.mxu1  ;;  %v844_v33 = vpack.c.bf16 %v677_v29, %v676_v25  ;;  %v682_v35 = vadd.f32 %v643_v63, %v419_v31 }
  0xf0   :  { %v845_v34 = vpack.c.bf16 %v679_v30, %v678_v26  ;;  %v684_v36 = vadd.f32 %v651_v0, %v472_v32  ;;  %v421_v37 = vpop.f32.mrf.mxu0 }
  0xf1   :  { %v474_v38 = vpop.f32.mrf.mxu1  ;;  %766 = vst [vmem:[%s1180_s3 + $0x30] sm:$0xff] %v844_v33  ;;  %v683_v39 = vadd.f32 %v647_v1, %v421_v37 }
  0xf2   :  { %767 = vst [vmem:[%s1180_s3 + $0x38] sm:$0xff] %v845_v34  ;;  %v685_v40 = vadd.f32 %v655_v2, %v474_v38 }
  0xf3   :  { %v847_v41 = vpack.c.bf16 %v683_v39, %v682_v35 }
  0xf4   :  { %v848_v42 = vpack.c.bf16 %v685_v40, %v684_v36 }
  0xf5   :  { %769 = vst [vmem:[%s1180_s3 + $0x48] sm:$0xff] %v847_v41 }
  0xf6   :  { %770 = vst [vmem:[%s1180_s3 + $0x50] sm:$0xff] %v848_v42 }
 0x102   :  { %v511_v48 = vpop.f32.mrf.mxu0 }
 0x103   :  { %v521_v49 = vpop.f32.mrf.mxu1  ;;  %v668_v52 = vadd.f32 %v659_v46, %v511_v48 }
 0x104   :  { %v513_v50 = vpop.f32.mrf.mxu0  ;;  %v680_v54 = vadd.f32 %v659_v46, %v521_v49 }
 0x105   :  { %v523_v51 = vpop.f32.mrf.mxu1  ;;  %v669_v56 = vadd.f32 %v663_v47, %v513_v50 }
 0x106   :  { %v681_v58 = vadd.f32 %v663_v47, %v523_v51  ;;  %v515_v59 = vpop.f32.mrf.mxu0 }
 0x107   :  { %v525_v60 = vpop.f32.mrf.mxu1  ;;  %v840_v61 = vpack.c.bf16 %v669_v56, %v668_v52  ;;  %v674_v55 = vadd.f32 %v659_v46, %v515_v59 }
 0x108   :  { %v846_v62 = vpack.c.bf16 %v681_v58, %v680_v54  ;;  %v517_v53 = vpop.f32.mrf.mxu0  ;;  %v686_v57 = vadd.f32 %v659_v46, %v525_v60 }
 0x109   :  { %v527_v63 = vpop.f32.mrf.mxu1  ;;  %762 = vst [vmem:[%s1180_s3 + $0x10] sm:$0xff] %v840_v61  ;;  %v675_v0 = vadd.f32 %v663_v47, %v517_v53 }
 0x10a   :  { %768 = vst [vmem:[%s1180_s3 + $0x40] sm:$0xff] %v846_v62  ;;  %v687_v1 = vadd.f32 %v663_v47, %v527_v63 }
 0x10b   :  { %v843_v2 = vpack.c.bf16 %v675_v0, %v674_v55 }
 0x10c   :  { %v849_v3 = vpack.c.bf16 %v687_v1, %v686_v57 }
 0x10d   :  { %765 = vst [vmem:[%s1180_s3 + $0x28] sm:$0xff] %v843_v2 }
 0x10e   :  { %771 = vst [vmem:[%s1180_s3 + $0x58] sm:$0xff] %v849_v3 }

// kernel: hidream_block_forward.22
= control target key start
LH: loop header
LB: loop body
LE: loop exit
PB: predicated region body
PF: predicated region fallthrough
CT: control target
= control target key end

     0   :  { %s427_s12 = smov 0   ;;  %s429_s13 = smov 0   ;;  %s475_s0 = inlined_call_operand.vmem [shape: bf16[2,8,128], index: 0, kind: input, shape index: {}]   ;;  %s476_s1 = inlined_call_operand.vmem [shape: bf16[2,1,128], index: 1, kind: input, shape index: {}]   ;;  %s477_s2 = inlined_call_operand.vmem [shape: bf16[2,1,128], index: 2, kind: input, shape index: {}]   ;;  %s478_s3 = inlined_call_operand.vmem [shape: bf16[2,8,128], index: 3, kind: output, shape index: {}]  }
   0x1   :  { %s431_s14 = smov 0  }
   0x2 LB: > { %s25_s15 = sadd.s32 1, %s401_s13  ;;  %p352_p0 = scmp.ge.s32.totalorder %s405_s14, 1  ;;  %s405_s14 = sphi %s431_s14, %s13_s14   ;;  %s401_s13 = sphi %s429_s13, %s480_s13   ;;  %s397_s12 = sphi %s427_s12, %s479_s12  }
   0x3   : > { %p27_p1 = scmp.ge.s32.totalorder %s25_s15, 2  ;;  %p171_p2 = scmp.lt.s32.totalorder %s405_s14, 3 }
   0x5   : > { %s482_s15 = smov (%p27_p1, %s25_s15), 0  ;;  %p172_p3 = pnand %p352_p0, %p171_p2 }
   0x6   : > { %p205_p4 = scmp.lt.s32.totalorder (!%p172_p3), %s397_s12, 1 }
   0x7   : > { %175 = sbr.rel (%p172_p3) target bundleno = 327 (0x147), region = 32 }
   0xc   : > { %s484_s12 = smov (!%p205_p4, %s397_s12), 1  ;;  %v244_v9 = vlaneseq }
   0xd   : > { %s353_s16 = sshll.u32 %s484_s12, 2  ;;  %s214_s22 = scalar_lea.vmem %s476_s1, %s484_s12 }
   0xe   : > { %s211_s19 = scalar_lea.vmem %s475_s0, %s353_s16  ;;  %v239_v10 = vld [vmem:[%s214_s22] sm:$0x1]  ;;  %s217_s25 = scalar_lea.vmem %s477_s2, %s484_s12  ;;  %v245_v12 = vshrl.u32 %v244_v9, 7 }
   0xf   : > { %v225_v0 = vld [vmem:[%s211_s19] sm:$0xf]  ;;  %v240_v11 = vunpack.c.l.bf16 %v239_v10  ;;  %s224_s28 = scalar_lea.vmem %s478_s3, %s353_s16 }
  0x10   : > { %v226_v1 = vunpack.c.l.bf16 %v225_v0  ;;  %v241_v13 = vld [vmem:[%s217_s25] sm:$0x1]  ;;  %v246_v15 = vsub.s32 0, %v245_v12 }
  0x11   : > { %v243_v14 = vadd.f32 1.0, %v240_v11  ;;  %v242_v16 = vunpack.c.l.bf16 %v241_v13 }
  0x12   : > { %227 = vadd.xlane.f32.xlu0 %v226_v1 }
  0x13   : > { %v247_v17 = vrot.slane %v243_v14, %v246_v15  ;;  %v252_v19 = vrot.slane %v242_v16, %v246_v15 }
  0x9b   : > { %v228_v2 = vpop.xlane.xlu0 %227 }
  0x9c   : > { %v230_v3 = vmul.f32 0.0078125, %v228_v2 }
  0x9e   : > { %v231_v4 = vsub.f32 %v226_v1, %v230_v3 }
  0xa0   : > { %v232_v5 = vmul.f32 %v231_v4, %v231_v4 }
  0xa2   : > { %233 = vadd.xlane.f32.xlu0 %v232_v5 }
 0x12b   : > { %v234_v6 = vpop.xlane.xlu0 %233 }
 0x12c   : > { %v235_v7 = vmul.f32 0.0078125, %v234_v6 }
 0x12e   : > { %v236_v8 = vadd.f32 1e-06, %v235_v7 }
 0x130   : > { %381 = vrsqrt.f32 %v236_v8 }
 0x13d   : > { %v382_v18 = vpop.eup %381 }
 0x13e   : > { %v238_v20 = vmul.f32 %v382_v18, %v231_v4 }
 0x140   : > { %v248_v21 = vmul.f32 %v247_v17, %v238_v20 }
 0x142   : > { %v253_v22 = vadd.f32 %v252_v19, %v248_v21 }
 0x144   : > { %v254_v23 = vpack.c.bf16 %v253_v22, %v253_v22 }
 0x146   : > { %255 = vst [vmem:[%s224_s28] sm:$0xf] %v254_v23 }
 0x147 PF: > { %s13_s14 = sadd.s32 1, %s405_s14   ;;  %s479_s12 = smov %s401_s13 }
 0x148   : > { %p10_p5 = scmp.ge.s32.totalorder %s13_s14, 4   ;;  %s480_s13 = smov %s482_s15 }
 0x14a   :  { %12 = sbr.rel (!%p10_p5) target bundleno = 2 (0x2), region = 68 }

// kernel: hidream_block_forward.27
= control target key start
LH: loop header
LB: loop body
LE: loop exit
PB: predicated region body
PF: predicated region fallthrough
CT: control target
= control target key end

     0   :  { %s399_s9 = smov 0   ;;  %s401_s10 = smov 0   ;;  %s442_s0 = inlined_call_operand.vmem [shape: bf16[2,8,256], index: 0, kind: input, shape index: {}]   ;;  %s443_s1 = inlined_call_operand.vmem [shape: bf16[1,256], index: 1, kind: input, shape index: {}]   ;;  %s444_s2 = inlined_call_operand.vmem [shape: bf16[2,8,256], index: 2, kind: output, shape index: {}]  }
   0x1   :  { %s403_s11 = smov 0  }
   0x2 LB: > { %s24_s12 = sadd.s32 1, %s378_s10  ;;  %p323_p0 = scmp.ge.s32.totalorder %s382_s11, 1  ;;  %s382_s11 = sphi %s403_s11, %s12_s11   ;;  %s378_s10 = sphi %s401_s10, %s446_s10   ;;  %s374_s9 = sphi %s399_s9, %s445_s9  }
   0x3   : > { %p26_p1 = scmp.ge.s32.totalorder %s24_s12, 2  ;;  %p132_p2 = scmp.lt.s32.totalorder %s382_s11, 3 }
   0x5   : > { %s448_s12 = smov (%p26_p1, %s24_s12), 0  ;;  %p133_p3 = pnand %p323_p0, %p132_p2 }
   0x6   : > { %p162_p4 = scmp.lt.s32.totalorder (!%p133_p3), %s374_s9, 1 }
   0x7   : > { %136 = sbr.rel (%p133_p3) target bundleno = 185 (0xb9), region = 28 }
   0xc   : > { %s450_s9 = smov (!%p162_p4, %s374_s9), 1  ;;  %v198_v8 = vlaneseq  ;;  %v190_v9 = vld [vmem:[%s443_s1] sm:$0x3] }
   0xd   : > { %s331_s13 = sshll.u32 %s450_s9, 3  ;;  %v191_v11 = vunpack.c.l.bf16 %v190_v9 }
   0xe   : > { %s170_s16 = scalar_lea.vmem %s442_s0, %s331_s13  ;;  %v199_v12 = vshrl.u32 %v198_v8, 7  ;;  %s179_s21 = scalar_lea.vmem %s444_s2, %s331_s13 }
   0xf   : > { %v180_v0 = vld [vmem:[%s170_s16] sm:$0xff]  ;;  %v192_v13 = vmul.f32 0.088388346, %v191_v11 }
  0x10   : > { %v181_v1 = vunpack.c.l.bf16 %v180_v0  ;;  %v182_v2 = vunpack.c.h.bf16 %v180_v0  ;;  %v200_v14 = vsub.s32 0, %v199_v12  ;;  %v204_v15 = vsub.s32 2, %v199_v12 }
  0x12   : > { %v183_v3 = vmul.f32 %v181_v1, %v181_v1  ;;  %v184_v4 = vmul.f32 %v182_v2, %v182_v2  ;;  %v201_v16 = vrot.slane %v192_v13, %v200_v14  ;;  %v205_v17 = vrot.slane %v192_v13, %v204_v15 }
  0x14   : > { %v185_v5 = vadd.f32 %v184_v4, %v183_v3  ;;  %v211_v18 = vrot.slane %v201_v16, %v200_v14  ;;  %v215_v19 = vrot.slane %v205_v17, %v200_v14 }
  0x16   : > { %186 = vadd.xlane.f32.xlu0 %v185_v5 }
  0x9f   : > { %v187_v6 = vpop.xlane.xlu0 %186 }
  0xa0   : > { %v189_v7 = vmul.f32 0.00390625, %v187_v6 }
  0xa2   : > { %v193_v10 = vadd.f32 1e-05, %v189_v7 }
  0xa4   : > { %358 = vrsqrt.f32 %v193_v10 }
  0xb1   : > { %v359_v20 = vpop.eup %358 }
  0xb2   : > { %v195_v21 = vmul.f32 %v359_v20, %v181_v1  ;;  %v196_v22 = vmul.f32 %v359_v20, %v182_v2 }
  0xb4   : > { %v216_v23 = vmul.f32 %v211_v18, %v195_v21  ;;  %v217_v24 = vmul.f32 %v215_v19, %v196_v22 }
  0xb6   : > { %v333_v25 = vpack.c.bf16 %v217_v24, %v216_v23 }
  0xb8   : > { %226 = vst [vmem:[%s179_s21] sm:$0xff] %v333_v25 }
  0xb9 PF: > { %s12_s11 = sadd.s32 1, %s382_s11   ;;  %s445_s9 = smov %s378_s10 }
  0xba   : > { %p9_p5 = scmp.ge.s32.totalorder %s12_s11, 4   ;;  %s446_s10 = smov %s448_s12 }
  0xbc   :  { %11 = sbr.rel (!%p9_p5) target bundleno = 2 (0x2), region = 58 }

// kernel: hidream_block_forward.26
= control target key start
LH: loop header
LB: loop body
LE: loop exit
PB: predicated region body
PF: predicated region fallthrough
CT: control target
= control target key end

     0   :  { %v759_v1 = vmov 0   ;;  %v512_v50 = vlaneseq  ;;  %s951_s1 = inlined_call_operand.vmem [shape: bf16[128,768], index: 1, kind: input, shape index: {}]   ;;  %s952_s0 = inlined_call_operand.vmem [shape: bf16[16,128], index: 0, kind: input, shape index: {}]   ;;  %s953_s2 = inlined_call_operand.vmem [shape: bf16[1,768], index: 2, kind: input, shape index: {}]   ;;  %s954_s3 = inlined_call_operand.vmem [shape: bf16[16,768], index: 3, kind: output, shape index: {}]  }
   0x1   :  { %v686_v0 = vld [vmem:[%s951_s1 + $0x154] ss:$24 sps:$4 sm:$0xff]   ;;  %371 = vmatprep.mubr.bf16.mxu0 %v759_v1  ;;  %414 = vmatprep.mubr.bf16.mxu1 %v759_v1  ;;  %v688_v2 = vld [vmem:[%s951_s1 + $0x150] ss:$24 sps:$4 sm:$0xff]   ;;  %v689_v3 = vld [vmem:[%s951_s1 + $0x124] ss:$24 sps:$4 sm:$0xff]  }
   0x2   :  { %339 = vmatprep.subr.bf16.mxu0 %v686_v0  ;;  %v691_v4 = vld [vmem:[%s951_s1 + $0x120] ss:$24 sps:$4 sm:$0xff]   ;;  %v692_v5 = vld [vmem:[%s951_s1 + $0xf4] ss:$24 sps:$4 sm:$0xff]   ;;  %v694_v6 = vld [vmem:[%s951_s1 + $0xf0] ss:$24 sps:$4 sm:$0xff]  }
   0x3   :  { %340 = vmatpush1.bf16.msra.mxu0 %v688_v2  ;;  %v695_v7 = vld [vmem:[%s951_s1 + $0xc4] ss:$24 sps:$4 sm:$0xff]   ;;  %v709_v9 = vld [vmem:[%s951_s1 + $0x158] ss:$24 sps:$4 sm:$0xff]   ;;  %v698_v11 = vld [vmem:[%s951_s1 + $0x94] ss:$24 sps:$4 sm:$0xff]  }
   0x4   :  { %341 = vmatprep.subr.bf16.mxu0 %v689_v3  ;;  %v707_v8 = vld [vmem:[%s951_s1 + $0x15c] ss:$24 sps:$4 sm:$0xff]   ;;  %v697_v10 = vld [vmem:[%s951_s1 + $0xc0] ss:$24 sps:$4 sm:$0xff]   ;;  %v713_v12 = vld [vmem:[%s951_s1 + $0x12c] ss:$24 sps:$4 sm:$0xff]  }
   0x5   :  { %382 = vmatprep.subr.bf16.mxu1 %v707_v8  ;;  %v715_v13 = vld [vmem:[%s951_s1 + $0x128] ss:$24 sps:$4 sm:$0xff]   ;;  %v701_v15 = vld [vmem:[%s951_s1 + $0x64] ss:$24 sps:$4 sm:$0xff]   ;;  %v722_v17 = vld [vmem:[%s951_s1 + $0xf8] ss:$24 sps:$4 sm:$0xff]  }
   0x6   :  { %383 = vmatpush1.bf16.msra.mxu1 %v709_v9  ;;  %v700_v14 = vld [vmem:[%s951_s1 + $0x90] ss:$24 sps:$4 sm:$0xff]   ;;  %v720_v16 = vld [vmem:[%s951_s1 + $0xfc] ss:$24 sps:$4 sm:$0xff]   ;;  %v703_v18 = vld [vmem:[%s951_s1 + $0x60] ss:$24 sps:$4 sm:$0xff]  }
   0x7   :  { %342 = vmatpush1.bf16.msra.mxu0 %v691_v4  ;;  %384 = vmatprep.subr.bf16.mxu1 %v713_v12  ;;  %v726_v19 = vld [vmem:[%s951_s1 + $0xcc] ss:$24 sps:$4 sm:$0xff]   ;;  %v728_v21 = vld [vmem:[%s951_s1 + $0xc8] ss:$24 sps:$4 sm:$0xff]   ;;  %v732_v22 = vld [vmem:[%s951_s1 + $0x9c] ss:$24 sps:$4 sm:$0xff]  }
   0x8   :  { %343 = vmatprep.subr.bf16.mxu0 %v692_v5  ;;  %v704_v20 = vld [vmem:[%s951_s1 + $0x34] ss:$24 sps:$4 sm:$0xff]   ;;  %v706_v23 = vld [vmem:[%s951_s1 + $0x30] ss:$24 sps:$4 sm:$0xff]   ;;  %v710_v24 = vld [vmem:[%s951_s1 + $0x4] ss:$24 sps:$4 sm:$0xff]  }
   0x9   :  { %v734_v25 = vld [vmem:[%s951_s1 + $0x98] ss:$24 sps:$4 sm:$0xff]   ;;  %v738_v26 = vld [vmem:[%s951_s1 + $0x6c] ss:$24 sps:$4 sm:$0xff]   ;;  %v740_v30 = vld [vmem:[%s951_s1 + $0x68] ss:$24 sps:$4 sm:$0xff]  }
   0xa   :  { %385 = vmatpush1.bf16.msra.mxu1 %v715_v13  ;;  %v712_v27 = vld [vmem:[%s951_s1] ss:$24 sps:$4 sm:$0xff]   ;;  %v719_v29 = vld [vmem:[%s951_s1 + $0x164] ss:$24 sps:$4 sm:$0xff]   ;;  %v725_v33 = vld [vmem:[%s951_s1 + $0x134] ss:$24 sps:$4 sm:$0xff]  }
   0xb   :  { %344 = vmatpush1.bf16.msra.mxu0 %v694_v6  ;;  %386 = vmatprep.subr.bf16.mxu1 %v720_v16  ;;  %v716_v28 = vld [vmem:[%s952_s0] sm:$0xff]   ;;  %v744_v31 = vld [vmem:[%s951_s1 + $0x3c] ss:$24 sps:$4 sm:$0xff]   ;;  %v746_v34 = vld [vmem:[%s951_s1 + $0x38] ss:$24 sps:$4 sm:$0xff]   ;;  %v513_v51 = vshrl.u32 %v512_v50, 7 }
   0xc   :  { %345 = vmatprep.subr.bf16.mxu0 %v695_v7  ;;  %v717_v32 = vld [vmem:[%s951_s1 + $0x160] ss:$24 sps:$4 sm:$0xff]   ;;  %v750_v35 = vld [vmem:[%s951_s1 + $0xc] ss:$24 sps:$4 sm:$0xff]   ;;  %v723_v36 = vld [vmem:[%s951_s1 + $0x130] ss:$24 sps:$4 sm:$0xff]  }
   0xd   :  { %v731_v37 = vld [vmem:[%s951_s1 + $0x104] ss:$24 sps:$4 sm:$0xff]   ;;  %v752_v38 = vld [vmem:[%s951_s1 + $0x8] ss:$24 sps:$4 sm:$0xff]   ;;  %v737_v40 = vld [vmem:[%s951_s1 + $0xd4] ss:$24 sps:$4 sm:$0xff]  }
   0xe   :  { %387 = vmatpush1.bf16.msra.mxu1 %v722_v17  ;;  %v729_v39 = vld [vmem:[%s951_s1 + $0x100] ss:$24 sps:$4 sm:$0xff]   ;;  %v735_v41 = vld [vmem:[%s951_s1 + $0xd0] ss:$24 sps:$4 sm:$0xff]   ;;  %v743_v42 = vld [vmem:[%s951_s1 + $0xa4] ss:$24 sps:$4 sm:$0xff]  }
   0xf   :  { %346 = vmatpush1.bf16.msra.mxu0 %v697_v10  ;;  %388 = vmatprep.subr.bf16.mxu1 %v726_v19  ;;  %v741_v43 = vld [vmem:[%s951_s1 + $0xa0] ss:$24 sps:$4 sm:$0xff]   ;;  %v749_v44 = vld [vmem:[%s951_s1 + $0x74] ss:$24 sps:$4 sm:$0xff]   ;;  %v747_v45 = vld [vmem:[%s951_s1 + $0x70] ss:$24 sps:$4 sm:$0xff]  }
  0x10   :  { %347 = vmatprep.subr.bf16.mxu0 %v698_v11  ;;  %v755_v46 = vld [vmem:[%s951_s1 + $0x44] ss:$24 sps:$4 sm:$0xff]   ;;  %v753_v47 = vld [vmem:[%s951_s1 + $0x40] ss:$24 sps:$4 sm:$0xff]   ;;  %v758_v48 = vld [vmem:[%s951_s1 + $0x14] ss:$24 sps:$4 sm:$0xff]  }
  0x11   :  { %v756_v49 = vld [vmem:[%s951_s1 + $0x10] ss:$24 sps:$4 sm:$0xff]   ;;  %v507_v52 = vld [vmem:[%s953_s2] sm:$0x3f]  ;;  %v514_v54 = vsub.s32 0, %v513_v51  ;;  %v518_v55 = vsub.s32 2, %v513_v51 }
  0x12   :  { %389 = vmatpush1.bf16.msra.mxu1 %v728_v21  ;;  %v508_v53 = vunpack.c.l.bf16 %v507_v52  ;;  %v522_v60 = vsub.s32 4, %v513_v51  ;;  %v526_v63 = vsub.s32 6, %v513_v51 }
  0x13   :  { %348 = vmatpush1.bf16.msra.mxu0 %v700_v14  ;;  %390 = vmatprep.subr.bf16.mxu1 %v732_v22  ;;  %v509_v22 = vunpack.c.h.bf16 %v507_v52 }
  0x14   :  { %349 = vmatprep.subr.bf16.mxu0 %v701_v15  ;;  %v515_v56 = vrot.slane %v508_v53, %v514_v54  ;;  %v519_v57 = vrot.slane %v508_v53, %v518_v55  ;;  %v523_v2 = vrot.slane %v508_v53, %v522_v60  ;;  %v527_v5 = vrot.slane %v508_v53, %v526_v63 }
  0x16   :  { %391 = vmatpush1.bf16.msra.mxu1 %v734_v25  ;;  %v545_v58 = vrot.slane %v515_v56, %v514_v54  ;;  %v549_v59 = vrot.slane %v519_v57, %v514_v54  ;;  %v553_v9 = vrot.slane %v523_v2, %v514_v54  ;;  %v557_v11 = vrot.slane %v527_v5, %v514_v54 }
  0x17   :  { %350 = vmatpush1.bf16.msra.mxu0 %v703_v18  ;;  %392 = vmatprep.subr.bf16.mxu1 %v738_v26 }
  0x18   :  { %351 = vmatprep.subr.bf16.mxu0 %v704_v20 }
  0x1a   :  { %393 = vmatpush1.bf16.msra.mxu1 %v740_v30 }
  0x1b   :  { %352 = vmatpush1.bf16.msra.mxu0 %v706_v23  ;;  %394 = vmatprep.subr.bf16.mxu1 %v744_v31  ;;  %v531_v23 = vrot.slane %v509_v22, %v514_v54 }
  0x1c   :  { %353 = vmatprep.subr.bf16.mxu0 %v710_v24  ;;  %v535_v24 = vrot.slane %v509_v22, %v518_v55 }
  0x1d   :  { %v561_v25 = vrot.slane %v531_v23, %v514_v54 }
  0x1e   :  { %395 = vmatpush1.bf16.msra.mxu1 %v746_v34  ;;  %v565_v26 = vrot.slane %v535_v24, %v514_v54 }
  0x1f   :  { %354 = vmatpush1.bf16.msra.mxu0 %v712_v27  ;;  %396 = vmatprep.subr.bf16.mxu1 %v750_v35 }
  0x20   :  { %425 = vmatprep.subr.bf16.mxu0 %v719_v29 }
  0x22   :  { %372 = vmatmul.mubr.bf16.vlgmr.msra.gmra.mxu0 %v716_v28  ;;  %397 = vmatpush1.bf16.msra.mxu1 %v752_v38 }
  0x23   :  { %426 = vmatpush1.bf16.msra.mxu0 %v717_v32  ;;  %457 = vmatprep.mubr.bf16.mxu0 %v759_v1 }
  0x24   :  { %427 = vmatprep.subr.bf16.mxu0 %v725_v33 }
  0x25   :  { %415 = vmatmul.mubr.bf16.vlgmr.msra.gmra.mxu1 %v716_v28 }
  0x27   :  { %428 = vmatpush1.bf16.msra.mxu0 %v723_v36 }
  0x28   :  { %429 = vmatprep.subr.bf16.mxu0 %v731_v37 }
  0x2b   :  { %430 = vmatpush1.bf16.msra.mxu0 %v729_v39 }
  0x2c   :  { %431 = vmatprep.subr.bf16.mxu0 %v737_v40 }
  0x2f   :  { %432 = vmatpush1.bf16.msra.mxu0 %v735_v41 }
  0x30   :  { %433 = vmatprep.subr.bf16.mxu0 %v743_v42 }
  0x33   :  { %434 = vmatpush1.bf16.msra.mxu0 %v741_v43 }
  0x34   :  { %435 = vmatprep.subr.bf16.mxu0 %v749_v44 }
  0x37   :  { %436 = vmatpush1.bf16.msra.mxu0 %v747_v45 }
  0x38   :  { %437 = vmatprep.subr.bf16.mxu0 %v755_v46 }
  0x3b   :  { %438 = vmatpush1.bf16.msra.mxu0 %v753_v47 }
  0x3c   :  { %439 = vmatprep.subr.bf16.mxu0 %v758_v48 }
  0x3f   :  { %440 = vmatpush1.bf16.msra.mxu0 %v756_v49 }
  0x42   :  { %458 = vmatmul.mubr.bf16.vlgmr.msra.gmra.mxu0 %v716_v28 }
  0xe2   :  { %v373_v61 = vpop.f32.mrf.mxu0 }
  0xe3   :  { %v566_v62 = vadd.f32 %v545_v58, %v373_v61 }
  0xe4   :  { %v375_v0 = vpop.f32.mrf.mxu0 }
  0xe5   :  { %v567_v1 = vadd.f32 %v549_v59, %v375_v0  ;;  %v416_v12 = vpop.f32.mrf.mxu1 }
  0xe6   :  { %v377_v3 = vpop.f32.mrf.mxu0  ;;  %v568_v13 = vadd.f32 %v553_v9, %v416_v12 }
  0xe7   :  { %v679_v4 = vpack.c.bf16 %v567_v1, %v566_v62  ;;  %v572_v7 = vadd.f32 %v545_v58, %v377_v3  ;;  %v418_v14 = vpop.f32.mrf.mxu1 }
  0xe8   :  { %v379_v6 = vpop.f32.mrf.mxu0  ;;  %v569_v15 = vadd.f32 %v557_v11, %v418_v14 }
  0xe9   :  { %614 = vst [vmem:[%s954_s3] sm:$0xff] %v679_v4  ;;  %v573_v8 = vadd.f32 %v549_v59, %v379_v6  ;;  %v420_v16 = vpop.f32.mrf.mxu1 }
  0xea   :  { %v680_v17 = vpack.c.bf16 %v569_v15, %v568_v13  ;;  %v574_v18 = vadd.f32 %v553_v9, %v420_v16 }
  0xeb   :  { %v682_v10 = vpack.c.bf16 %v573_v8, %v572_v7  ;;  %v422_v19 = vpop.f32.mrf.mxu1 }
  0xec   :  { %615 = vst [vmem:[%s954_s3 + $0x8] sm:$0xff] %v680_v17  ;;  %v575_v20 = vadd.f32 %v557_v11, %v422_v19 }
  0xed   :  { %617 = vst [vmem:[%s954_s3 + $0x18] sm:$0xff] %v682_v10 }
  0xee   :  { %v683_v21 = vpack.c.bf16 %v575_v20, %v574_v18 }
  0xf0   :  { %618 = vst [vmem:[%s954_s3 + $0x20] sm:$0xff] %v683_v21 }
 0x102   :  { %v459_v27 = vpop.f32.mrf.mxu0 }
 0x103   :  { %v570_v29 = vadd.f32 %v561_v25, %v459_v27 }
 0x104   :  { %v461_v28 = vpop.f32.mrf.mxu0 }
 0x105   :  { %v571_v30 = vadd.f32 %v565_v26, %v461_v28 }
 0x106   :  { %v463_v31 = vpop.f32.mrf.mxu0 }
 0x107   :  { %v681_v32 = vpack.c.bf16 %v571_v30, %v570_v29  ;;  %v576_v34 = vadd.f32 %v561_v25, %v463_v31 }
 0x108   :  { %v465_v33 = vpop.f32.mrf.mxu0 }
 0x109   :  { %616 = vst [vmem:[%s954_s3 + $0x10] sm:$0xff] %v681_v32  ;;  %v577_v35 = vadd.f32 %v565_v26, %v465_v33 }
 0x10b   :  { %v684_v36 = vpack.c.bf16 %v577_v35, %v576_v34 }
 0x10d   :  { %619 = vst [vmem:[%s954_s3 + $0x28] sm:$0xff] %v684_v36 }

// kernel: hidream_block_forward.25
= control target key start
LH: loop header
LB: loop body
LE: loop exit
PB: predicated region body
PF: predicated region fallthrough
CT: control target
= control target key end

     0   :  { %s434_s9 = smov 0   ;;  %s436_s10 = smov 0   ;;  %s477_s0 = inlined_call_operand.vmem [shape: bf16[2,16,256], index: 0, kind: input, shape index: {}]   ;;  %s478_s1 = inlined_call_operand.vmem [shape: bf16[1,256], index: 1, kind: input, shape index: {}]   ;;  %s479_s2 = inlined_call_operand.vmem [shape: bf16[2,16,256], index: 2, kind: output, shape index: {}]  }
   0x1   :  { %s438_s11 = smov 0  }
   0x2 LB: > { %s24_s12 = sadd.s32 1, %s413_s10  ;;  %p354_p0 = scmp.ge.s32.totalorder %s417_s11, 1  ;;  %s417_s11 = sphi %s438_s11, %s12_s11   ;;  %s413_s10 = sphi %s436_s10, %s481_s10   ;;  %s409_s9 = sphi %s434_s9, %s480_s9  }
   0x3   : > { %p26_p1 = scmp.ge.s32.totalorder %s24_s12, 2  ;;  %p134_p2 = scmp.lt.s32.totalorder %s417_s11, 3 }
   0x5   : > { %s483_s12 = smov (%p26_p1, %s24_s12), 0  ;;  %p135_p3 = pnand %p354_p0, %p134_p2 }
   0x6   : > { %p167_p4 = scmp.lt.s32.totalorder (!%p135_p3), %s409_s9, 1 }
   0x7   : > { %138 = sbr.rel (%p135_p3) target bundleno = 189 (0xbd), region = 28 }
   0xc   : > { %s485_s9 = smov (!%p167_p4, %s409_s9), 1  ;;  %v218_v13 = vlaneseq  ;;  %v207_v19 = vld [vmem:[%s478_s1] sm:$0x3] }
   0xd   : > { %s363_s13 = sshll.u32 %s485_s9, 4  ;;  %v208_v21 = vunpack.c.l.bf16 %v207_v19 }
   0xe   : > { %s175_s16 = scalar_lea.vmem %s477_s0, %s363_s13  ;;  %v219_v17 = vshrl.u32 %v218_v13, 7  ;;  %s186_s21 = scalar_lea.vmem %s479_s2, %s363_s13 }
   0xf   : > { %v188_v0 = vld [vmem:[%s175_s16] sm:$0xff]  ;;  %v189_v1 = vld [vmem:[%s175_s16 + $0x8] sm:$0xff] }
  0x10   : > { %v190_v2 = vunpack.c.l.bf16 %v188_v0  ;;  %v191_v3 = vunpack.c.h.bf16 %v188_v0  ;;  %v192_v4 = vunpack.c.l.bf16 %v189_v1  ;;  %v193_v5 = vunpack.c.h.bf16 %v189_v1 }
  0x11   : > { %v220_v22 = vsub.s32 0, %v219_v17  ;;  %v224_v23 = vsub.s32 2, %v219_v17 }
  0x12   : > { %v194_v6 = vmul.f32 %v190_v2, %v190_v2  ;;  %v195_v7 = vmul.f32 %v191_v3, %v191_v3  ;;  %v196_v8 = vmul.f32 %v192_v4, %v192_v4  ;;  %v197_v9 = vmul.f32 %v193_v5, %v193_v5 }
  0x13   : > { %v221_v24 = vrot.slane %v208_v21, %v220_v22  ;;  %v225_v25 = vrot.slane %v208_v21, %v224_v23 }
  0x14   : > { %v198_v10 = vadd.f32 %v195_v7, %v194_v6  ;;  %v201_v11 = vadd.f32 %v197_v9, %v196_v8 }
  0x15   : > { %v231_v26 = vrot.slane %v221_v24, %v220_v22  ;;  %v235_v27 = vrot.slane %v225_v25, %v220_v22 }
  0x16   : > { %199 = vadd.xlane.f32.xlu0 %v198_v10 }
  0x1a   : > { %202 = vadd.xlane.f32.xlu0 %v201_v11 }
  0x9f   : > { %v200_v12 = vpop.xlane.xlu0 %199 }
  0xa0   : > { %v205_v14 = vmul.f32 0.00390625, %v200_v12 }
  0xa2   : > { %v209_v15 = vadd.f32 1e-05, %v205_v14 }
  0xa3   : > { %v203_v16 = vpop.xlane.xlu0 %202 }
  0xa4   : > { %391 = vrsqrt.f32 %v209_v15  ;;  %v206_v18 = vmul.f32 0.00390625, %v203_v16 }
  0xa6   : > { %v210_v20 = vadd.f32 1e-05, %v206_v18 }
  0xa8   : > { %393 = vrsqrt.f32 %v210_v20 }
  0xb1   : > { %v392_v28 = vpop.eup %391 }
  0xb2   : > { %v213_v29 = vmul.f32 %v392_v28, %v190_v2  ;;  %v214_v30 = vmul.f32 %v392_v28, %v191_v3 }
  0xb4   : > { %v236_v31 = vmul.f32 %v231_v26, %v213_v29  ;;  %v237_v32 = vmul.f32 %v235_v27, %v214_v30 }
  0xb5   : > { %v394_v33 = vpop.eup %393 }
  0xb6   : > { %v365_v34 = vpack.c.bf16 %v237_v32, %v236_v31  ;;  %v215_v35 = vmul.f32 %v394_v33, %v192_v4  ;;  %v216_v36 = vmul.f32 %v394_v33, %v193_v5 }
  0xb8   : > { %252 = vst [vmem:[%s186_s21] sm:$0xff] %v365_v34  ;;  %v238_v37 = vmul.f32 %v231_v26, %v215_v35  ;;  %v239_v38 = vmul.f32 %v235_v27, %v216_v36 }
  0xba   : > { %v366_v39 = vpack.c.bf16 %v239_v38, %v238_v37 }
  0xbc   : > { %253 = vst [vmem:[%s186_s21 + $0x8] sm:$0xff] %v366_v39 }
  0xbd PF: > { %s12_s11 = sadd.s32 1, %s417_s11   ;;  %s480_s9 = smov %s413_s10 }
  0xbe   : > { %p9_p5 = scmp.ge.s32.totalorder %s12_s11, 4   ;;  %s481_s10 = smov %s483_s12 }
  0xc0   :  { %11 = sbr.rel (!%p9_p5) target bundleno = 2 (0x2), region = 58 }

// kernel: hidream_block_forward.28
= control target key start
LH: loop header
LB: loop body
LE: loop exit
PB: predicated region body
PF: predicated region fallthrough
CT: control target
= control target key end

     0   :  { %s398_s9 = smov 0   ;;  %s400_s10 = smov 0   ;;  %s437_s0 = inlined_call_operand.vmem [shape: bf16[2,8,256], index: 0, kind: input, shape index: {}]   ;;  %s438_s1 = inlined_call_operand.vmem [shape: bf16[1,256], index: 1, kind: input, shape index: {}]   ;;  %s439_s2 = inlined_call_operand.vmem [shape: bf16[2,8,256], index: 2, kind: output, shape index: {}]  }
   0x1   :  { %s402_s11 = smov 0  }
   0x2 LB: > { %s24_s12 = sadd.s32 1, %s377_s10  ;;  %p322_p0 = scmp.ge.s32.totalorder %s381_s11, 1  ;;  %s381_s11 = sphi %s402_s11, %s12_s11   ;;  %s377_s10 = sphi %s400_s10, %s441_s10   ;;  %s373_s9 = sphi %s398_s9, %s440_s9  }
   0x3   : > { %p26_p1 = scmp.ge.s32.totalorder %s24_s12, 2  ;;  %p132_p2 = scmp.lt.s32.totalorder %s381_s11, 3 }
   0x5   : > { %s443_s12 = smov (%p26_p1, %s24_s12), 0  ;;  %p133_p3 = pnand %p322_p0, %p132_p2 }
   0x6   : > { %p162_p4 = scmp.lt.s32.totalorder (!%p133_p3), %s373_s9, 1 }
   0x7   : > { %136 = sbr.rel (%p133_p3) target bundleno = 185 (0xb9), region = 28 }
   0xc   : > { %s445_s9 = smov (!%p162_p4, %s373_s9), 1  ;;  %v197_v8 = vlaneseq  ;;  %v190_v11 = vld [vmem:[%s438_s1] sm:$0x3] }
   0xd   : > { %s330_s13 = sshll.u32 %s445_s9, 3  ;;  %v191_v12 = vunpack.c.l.bf16 %v190_v11 }
   0xe   : > { %s170_s16 = scalar_lea.vmem %s437_s0, %s330_s13  ;;  %v198_v10 = vshrl.u32 %v197_v8, 7  ;;  %s179_s21 = scalar_lea.vmem %s439_s2, %s330_s13 }
   0xf   : > { %v180_v0 = vld [vmem:[%s170_s16] sm:$0xff] }
  0x10   : > { %v181_v1 = vunpack.c.l.bf16 %v180_v0  ;;  %v182_v2 = vunpack.c.h.bf16 %v180_v0  ;;  %v199_v13 = vsub.s32 0, %v198_v10  ;;  %v203_v14 = vsub.s32 2, %v198_v10 }
  0x12   : > { %v183_v3 = vmul.f32 %v181_v1, %v181_v1  ;;  %v184_v4 = vmul.f32 %v182_v2, %v182_v2  ;;  %v200_v15 = vrot.slane %v191_v12, %v199_v13  ;;  %v204_v16 = vrot.slane %v191_v12, %v203_v14 }
  0x14   : > { %v185_v5 = vadd.f32 %v184_v4, %v183_v3  ;;  %v210_v17 = vrot.slane %v200_v15, %v199_v13  ;;  %v214_v18 = vrot.slane %v204_v16, %v199_v13 }
  0x16   : > { %186 = vadd.xlane.f32.xlu0 %v185_v5 }
  0x9f   : > { %v187_v6 = vpop.xlane.xlu0 %186 }
  0xa0   : > { %v189_v7 = vmul.f32 0.00390625, %v187_v6 }
  0xa2   : > { %v192_v9 = vadd.f32 1e-05, %v189_v7 }
  0xa4   : > { %357 = vrsqrt.f32 %v192_v9 }
  0xb1   : > { %v358_v19 = vpop.eup %357 }
  0xb2   : > { %v194_v20 = vmul.f32 %v358_v19, %v181_v1  ;;  %v195_v21 = vmul.f32 %v358_v19, %v182_v2 }
  0xb4   : > { %v215_v22 = vmul.f32 %v210_v17, %v194_v20  ;;  %v216_v23 = vmul.f32 %v214_v18, %v195_v21 }
  0xb6   : > { %v332_v24 = vpack.c.bf16 %v216_v23, %v215_v22 }
  0xb8   : > { %225 = vst [vmem:[%s179_s21] sm:$0xff] %v332_v24 }
  0xb9 PF: > { %s12_s11 = sadd.s32 1, %s381_s11   ;;  %s440_s9 = smov %s377_s10 }
  0xba   : > { %p9_p5 = scmp.ge.s32.totalorder %s12_s11, 4   ;;  %s441_s10 = smov %s443_s12 }
  0xbc   :  { %11 = sbr.rel (!%p9_p5) target bundleno = 2 (0x2), region = 58 }

// kernel: hidream_block_forward.31
= control target key start
LH: loop header
LB: loop body
LE: loop exit
PB: predicated region body
PF: predicated region fallthrough
CT: control target
= control target key end

     0   :  { %s924_s18 = smov 0   ;;  %s926_s19 = smov 0   ;;  %s1019_s0 = inlined_call_operand.vmem [shape: bf16[2,8,256], index: 0, kind: input, shape index: {}]   ;;  %s1020_s1 = inlined_call_operand.vmem [shape: bf16[256,128], index: 1, kind: input, shape index: {}]   ;;  %s1021_s2 = inlined_call_operand.vmem [shape: bf16[1,128], index: 2, kind: input, shape index: {}]   ;;  %s1022_s3 = inlined_call_operand.vmem [shape: bf16[2,1,128], index: 3, kind: input, shape index: {}]   ;;  %s1023_s4 = inlined_call_operand.vmem [shape: bf16[2,8,128], index: 4, kind: input, shape index: {}]   ;;  %s1024_s5 = inlined_call_operand.vmem [shape: bf16[2,8,128], index: 5, kind: output, shape index: {}]  }
   0x1   :  { %s928_s20 = smov 0  }
   0x2 LB: > { %s41_s21 = sadd.s32 1, %s888_s19  ;;  %p780_p0 = scmp.ge.s32.totalorder %s892_s20, 1  ;;  %s892_s20 = sphi %s928_s20, %s15_s20   ;;  %s888_s19 = sphi %s926_s19, %s1026_s19   ;;  %s884_s18 = sphi %s924_s18, %s1025_s18  }
   0x3   : > { %p43_p1 = scmp.ge.s32.totalorder %s41_s21, 2  ;;  %p286_p2 = scmp.lt.s32.totalorder %s892_s20, 3 }
   0x5   : > { %s1028_s21 = smov (%p43_p1, %s41_s21), 0  ;;  %p287_p3 = pnand %p780_p0, %p286_p2 }
   0x6   : > { %p355_p4 = scmp.lt.s32.totalorder (!%p287_p3), %s884_s18, 1 }
   0x7   : > { %290 = sbr.rel (%p287_p3) target bundleno = 251 (0xfb), region = 40 }
   0xc   : > { %v852_v0 = vld [vmem:[%s1020_s1 + $0x78] sm:$0xff]   ;;  %v854_v2 = vld [vmem:[%s1020_s1 + $0x70] sm:$0xff]   ;;  %v856_v4 = vld [vmem:[%s1020_s1 + $0x68] sm:$0xff]   ;;  %s1030_s18 = smov (!%p355_p4, %s884_s18), 1  ;;  %v597_v19 = vlaneseq }
   0xd   : > { %v853_v1 = vld [vmem:[%s1020_s1 + $0x38] sm:$0xff]   ;;  %806 = vmatprep.subr.bf16.mxu0 %v852_v0  ;;  %v855_v3 = vld [vmem:[%s1020_s1 + $0x30] sm:$0xff]   ;;  %v857_v5 = vld [vmem:[%s1020_s1 + $0x28] sm:$0xff]   ;;  %s805_s11 = sshll.u32 %s1030_s18, 3  ;;  %s385_s14 = scalar_lea.vmem %s1022_s3, %s1030_s18 }
   0xe   : > { %807 = vmatpush3.bf16.msra.mxu0 %v853_v1  ;;  %v858_v6 = vld [vmem:[%s1020_s1 + $0x60] sm:$0xff]   ;;  %v860_v8 = vld [vmem:[%s1020_s1 + $0x58] sm:$0xff]   ;;  %s366_s22 = scalar_lea.vmem %s1019_s0, %s805_s11  ;;  %v862_v10 = vld [vmem:[%s1020_s1 + $0x50] sm:$0xff]   ;;  %v598_v20 = vshrl.u32 %v597_v19, 7  ;;  %s783_s17 = sshll.u32 %s1030_s18, 2 }
   0xf   : > { %808 = vmatprep.subr.bf16.mxu0 %v854_v2  ;;  %v859_v7 = vld [vmem:[%s1020_s1 + $0x20] sm:$0xff]   ;;  %v861_v9 = vld [vmem:[%s1020_s1 + $0x18] sm:$0xff]   ;;  %v863_v13 = vld [vmem:[%s1020_s1 + $0x10] sm:$0xff]   ;;  %s395_s24 = scalar_lea.vmem %s1023_s4, %s783_s17  ;;  %s405_s26 = scalar_lea.vmem %s1024_s5, %s783_s17 }
  0x10   : > { %v413_v11 = vld [vmem:[%s366_s22] sm:$0xff]  ;;  %v864_v14 = vld [vmem:[%s1020_s1 + $0x48] sm:$0xff]   ;;  %v599_v24 = vsub.s32 0, %v598_v20 }
  0x11   : > { %v786_v12 = vcombine.high %v413_v11, %v413_v11  ;;  %v865_v15 = vld [vmem:[%s1020_s1 + $0x8] sm:$0xff]   ;;  %v866_v16 = vld [vmem:[%s1020_s1 + $0x40] sm:$0xff]   ;;  %v785_v18 = vcombine.low %v413_v11, %v413_v11 }
  0x12   : > { %809 = vmatpush3.bf16.msra.mxu0 %v855_v3  ;;  %v867_v17 = vld [vmem:[%s1020_s1] sm:$0xff]  }
  0x13   : > { %810 = vmatprep.subr.bf16.mxu0 %v856_v4  ;;  %581 = vmatprep.mubr.bf16.mxu0 %v786_v12  ;;  %v595_v21 = vld [vmem:[%s1021_s2] sm:$0x1] }
  0x14   : > { %v602_v22 = vld [vmem:[%s385_s14] sm:$0x1]  ;;  %v596_v23 = vunpack.c.l.bf16 %v595_v21 }
  0x15   : > { %v603_v25 = vunpack.c.l.bf16 %v602_v22  ;;  %v609_v29 = vld [vmem:[%s395_s24] sm:$0xf] }
  0x16   : > { %811 = vmatpush3.bf16.msra.mxu0 %v857_v5  ;;  %v600_v27 = vrot.slane %v596_v23, %v599_v24  ;;  %v610_v34 = vunpack.c.l.bf16 %v609_v29 }
  0x17   : > { %812 = vmatprep.subr.bf16.mxu0 %v858_v6  ;;  %v607_v31 = vrot.slane %v603_v25, %v599_v24 }
  0x1a   : > { %813 = vmatpush3.bf16.msra.mxu0 %v859_v7 }
  0x1b   : > { %814 = vmatprep.subr.bf16.mxu0 %v860_v8 }
  0x1e   : > { %815 = vmatpush3.bf16.msra.mxu0 %v861_v9 }
  0x1f   : > { %816 = vmatprep.subr.bf16.mxu0 %v862_v10 }
  0x22   : > { %817 = vmatpush3.bf16.msra.mxu0 %v863_v13 }
  0x23   : > { %818 = vmatprep.subr.bf16.mxu0 %v864_v14 }
  0x26   : > { %819 = vmatpush3.bf16.msra.mxu0 %v865_v15 }
  0x27   : > { %820 = vmatprep.subr.bf16.mxu0 %v866_v16 }
  0x2a   : > { %821 = vmatpush3.bf16.msra.mxu0 %v867_v17 }
  0x2d   : > { %582 = vmatmul.mubr.bf16.vlgmr.msra.gmra.mxu0 %v785_v18 }
  0xed   : > { %v822_v26 = vpop.f32.mrf.mxu0 }
  0xef   : > { %v823_v28 = vpop.f32.mrf.mxu0 }
  0xf0   : > { %v824_v30 = vadd.f32 %v823_v28, %v822_v26 }
  0xf1   : > { %v825_v32 = vpop.f32.mrf.mxu0 }
  0xf2   : > { %v601_v33 = vadd.f32 %v824_v30, %v600_v27 }
  0xf3   : > { %v826_v35 = vpop.f32.mrf.mxu0 }
  0xf4   : > { %v608_v36 = vmul.f32 %v607_v31, %v601_v33 }
  0xf6   : > { %v611_v37 = vadd.f32 %v610_v34, %v608_v36 }
  0xf8   : > { %v612_v38 = vpack.c.bf16 %v611_v37, %v611_v37 }
  0xfa   : > { %613 = vst [vmem:[%s405_s26] sm:$0xf] %v612_v38 }
  0xfb PF: > { %s15_s20 = sadd.s32 1, %s892_s20   ;;  %s1025_s18 = smov %s888_s19 }
  0xfc   : > { %p12_p5 = scmp.ge.s32.totalorder %s15_s20, 4   ;;  %s1026_s19 = smov %s1028_s21 }
  0xfe   :  { %14 = sbr.rel (!%p12_p5) target bundleno = 2 (0x2), region = 90 }

// kernel: hidream_block_forward.29
= control target key start
LH: loop header
LB: loop body
LE: loop exit
PB: predicated region body
PF: predicated region fallthrough
CT: control target
= control target key end

     0   :  { %s1143_s12 = smov 0   ;;  %s1145_s13 = smov 0   ;;  %s1287_s0 = inlined_call_operand.vmem [shape: bf16[2,24,256], index: 0, kind: input, shape index: {}]   ;;  %s1288_s1 = inlined_call_operand.vmem [shape: bf16[2,24,256], index: 1, kind: input, shape index: {}]   ;;  %s1289_s2 = inlined_call_operand.vmem [shape: bf16[2,24,256], index: 2, kind: input, shape index: {}]   ;;  %s1290_s3 = inlined_call_operand.vmem [shape: bf16[2,24,256], index: 3, kind: output, shape index: {}]  }
   0x1   :  { %s1147_s14 = smov 0   ;;  %s1149_s15 = smov 0  }
   0x2   :  { %s1151_s16 = smov 0   ;;  %s1153_s17 = smov 0  }
   0x3   :  { %s1155_s18 = smov 0  }
   0x4 LB: > { %s35_s19 = sadd.s32 1, %s1110_s16  ;;  %s39_s20 = sadd.s32 1, %s1114_s17  ;;  %s1118_s18 = sphi %s1155_s18, %s13_s18   ;;  %s1114_s17 = sphi %s1153_s17, %s1298_s17   ;;  %s1110_s16 = sphi %s1151_s16, %s1297_s16   ;;  %s1106_s15 = sphi %s1149_s15, %s1296_s15   ;;  %s1102_s14 = sphi %s1147_s14, %s1295_s14   ;;  %s1098_s13 = sphi %s1145_s13, %s1294_s13   ;;  %s1094_s12 = sphi %s1143_s12, %s1293_s12  }
   0x5   : > { %p37_p0 = scmp.ge.s32.totalorder %s35_s19, 2  ;;  %s916_s21 = sadd.s32 4294967295, %s1118_s18  }
   0x6   : > { %p57_p1 = scmp.ne.s32.totalorder %s1098_s13, %s1094_s12  ;;  %p58_p2 = scmp.eq.s32.totalorder %s1118_s18, 0 }
   0x7   : > { %s1300_s19 = smov (%p37_p0, %s35_s19), 0  ;;  %s1302_s20 = smov (!%p37_p0, %s39_s20), %s1114_s17 }
   0x8   : > { %p41_p3 = scmp.ge.s32.totalorder %s1302_s20, 2  ;;  %p151_p4 = scmp.eq.s32.totalorder %s916_s21, 3 }
   0x9   : > { %s46_s22 = ssub.s32 %s1110_s16, %s1300_s19  ;;  %p1189_p5 = por %p58_p2, %p57_p1 }
   0xa   : > { %s1304_s20 = smov (%p41_p3, %s1302_s20), 0  ;;  %p1195_p6 = por %p151_p4, %p57_p1 }
   0xb   : > { %s43_s25 = ssub.s32 %s1114_s17, %s1304_s20  ;;  %s50_s27 = sadd.s32 1, %s1098_s13 }
   0xc   : > { %s47_s26 = sor.u32 %s46_s22, %s43_s25  ;;  %p919_p8 = scmp.ge.s32.totalorder %s1118_s18, 4 }
   0xd   : > { %p48_p7 = scmp.eq.s32.totalorder %s47_s26, 0 }
   0xe   : > { %173 = sbr.rel (%p919_p8) target bundleno = 46 (0x2e), region = 16 }
   0xf   : > { %s1203_s28 = scalar_select %p48_p7, %s1098_s13, %s50_s27  }
  0x13   : > { %176 = sbr.rel (!%p1189_p5) target bundleno = 28 (0x1c), region = 20  ;;  %s178_s29 = sand.u32 (%p1189_p5), 1, %s1098_s13  }
  0x14   : > { %s972_s30 = smul.u32 (%p1189_p5), 6, %s1114_s17 }
  0x15   : > { %s971_s4 = smul.u32 (%p1189_p5), 12, %s178_s29 }
  0x16   : > { %s185_s5 = sadd.s32 (%p1189_p5), %s1110_s16, %s972_s30 }
  0x17   : > { %s920_s6 = sshll.u32 (%p1189_p5), %s185_s5, 2  ;;  %s180_s10 = scalar_lea.vmem (%p1189_p5), [#allocation5], %s971_s4 }
  0x18   : > { %s187_s9 = scalar_lea.vmem %s1287_s0, %s920_s6 }
  0x19   : > { %v204_v0 = vld [vmem:[%s187_s9] sm:$0xf]  ;;  %v206_v1 = vld [vmem:[%s187_s9 + $0x8] sm:$0xf]  ;;  %v208_v2 = vld [vmem:[%s187_s9 + $0x10] sm:$0xf] }
  0x1a   : > { %205 = vst [vmem:[%s180_s10] sm:$0xf] %v204_v0  ;;  %207 = vst [vmem:[%s180_s10 + $0x4] sm:$0xf] %v206_v1 }
  0x1b   : > { %209 = vst [vmem:[%s180_s10 + $0x8] sm:$0xf] %v208_v2 }
  0x1c PF: > { %239 = sbr.rel (!%p1189_p5) target bundleno = 37 (0x25), region = 61  ;;  %s241_s11 = sand.u32 (%p1189_p5), 1, %s1098_s13  }
  0x1d   : > { %s974_s21 = smul.u32 (%p1189_p5), 6, %s1114_s17 }
  0x1e   : > { %s973_s22 = smul.u32 (%p1189_p5), 12, %s241_s11 }
  0x1f   : > { %s248_s25 = sadd.s32 (%p1189_p5), %s1110_s16, %s974_s21 }
  0x20   : > { %s921_s26 = sshll.u32 (%p1189_p5), %s248_s25, 2  ;;  %s243_s4 = scalar_lea.vmem (%p1189_p5), [#allocation6], %s973_s22 }
  0x21   : > { %s250_s30 = scalar_lea.vmem %s1288_s1, %s921_s26 }
  0x22   : > { %v267_v3 = vld [vmem:[%s250_s30] sm:$0xf]  ;;  %v269_v4 = vld [vmem:[%s250_s30 + $0x8] sm:$0xf]  ;;  %v271_v5 = vld [vmem:[%s250_s30 + $0x10] sm:$0xf] }
  0x23   : > { %268 = vst [vmem:[%s243_s4] sm:$0xf] %v267_v3  ;;  %270 = vst [vmem:[%s243_s4 + $0x4] sm:$0xf] %v269_v4 }
  0x24   : > { %272 = vst [vmem:[%s243_s4 + $0x8] sm:$0xf] %v271_v5 }
  0x25 PF: > { %302 = sbr.rel (!%p1189_p5) target bundleno = 46 (0x2e), region = 102  ;;  %s304_s5 = sand.u32 (%p1189_p5), 1, %s1098_s13  }
  0x26   : > { %s976_s6 = smul.u32 (%p1189_p5), 6, %s1114_s17 }
  0x27   : > { %s975_s7 = smul.u32 (%p1189_p5), 12, %s304_s5 }
  0x28   : > { %s311_s8 = sadd.s32 (%p1189_p5), %s1110_s16, %s976_s6 }
  0x29   : > { %s922_s9 = sshll.u32 (%p1189_p5), %s311_s8, 2  ;;  %s306_s22 = scalar_lea.vmem (%p1189_p5), [#allocation7], %s975_s7 }
  0x2a   : > { %s313_s21 = scalar_lea.vmem %s1289_s2, %s922_s9 }
  0x2b   : > { %v330_v6 = vld [vmem:[%s313_s21] sm:$0xf]  ;;  %v332_v7 = vld [vmem:[%s313_s21 + $0x8] sm:$0xf]  ;;  %v334_v8 = vld [vmem:[%s313_s21 + $0x10] sm:$0xf] }
  0x2c   : > { %331 = vst [vmem:[%s306_s22] sm:$0xf] %v330_v6  ;;  %333 = vst [vmem:[%s306_s22 + $0x4] sm:$0xf] %v332_v7 }
  0x2d   : > { %335 = vst [vmem:[%s306_s22 + $0x8] sm:$0xf] %v334_v8 }
  0x2e PF: > { %p923_p9 = scmp.ge.s32.totalorder %s1118_s18, 1  ;;  %p364_p10 = scmp.lt.s32.totalorder %s1118_s18, 5 }
  0x30   : > { %p365_p11 = pnand %p923_p9, %p364_p10 }
  0x31   : > { %s371_s23 = sand.u32 (!%p365_p11), 1, %s1094_s12  }
  0x32   : > { %368 = sbr.rel (%p365_p11) target bundleno = 859 (0x35b), region = 143 }
  0x33   : > { %s1233_s25 = smul.u32 (!%p365_p11), 12, %s371_s23 }
  0x35   : > { %s380_s26 = scalar_lea.vmem (!%p365_p11), [#allocation6], %s1233_s25  ;;  %s373_s27 = scalar_lea.vmem (!%p365_p11), [#allocation5], %s1233_s25 }
  0x36   : > { %s387_s12 = scalar_lea.vmem (!%p365_p11), [#allocation7], %s1233_s25  ;;  %s414_s29 = scalar_lea.vmem (!%p365_p11), [#allocation8], %s1233_s25 }
  0x37   : > { %v1040_v9 = vld [vmem:[%s380_s26 + $0x8] ss:$0 sps:$4 sm:$0xff]   ;;  %v1041_v10 = vld [vmem:[%s380_s26] sm:$0xff]   ;;  %v1043_v12 = vld [vmem:[%s373_s27 + $0x8] ss:$0 sps:$4 sm:$0xff]   ;;  %vm424_vm0 = vcmask 7168  }
  0x38   : > { %954 = vmatprep.subr.bf16.mxu0 %v1040_v9  ;;  %v1042_v11 = vld [vmem:[%s373_s27] sm:$0xff]   ;;  %v1120_v13 = vmov -inf   ;;  %vm514_vm1 = vcmask 195584   ;;  %v1121_v21 = vmov 0   ;;  %v1122_v22 = vmov 0.0   ;;  %v1045_v37 = vld [vmem:[%s387_s12] sm:$0xff]  }
  0x39   : > { %955 = vmatpush3.bf16.xpose.msra.mxu0 %v1040_v9  ;;  %958 = vmatprep.mubr.bf16.mxu0 %v1042_v11  ;;  %427 = vst.msk [vmem:[#allocation2 + $0x10] sm:$0xff] %vm424_vm0, %v1120_v13  ;;  %425 = vst.msk [vmem:[#allocation2] sm:$0xff] %vm424_vm0, %v1120_v13  ;;  %vm620_vm2 = vcmask 1043456   ;;  %v1044_v35 = vld [vmem:[%s387_s12 + $0x8] ss:$0 sps:$4 sm:$0xff]   ;;  %s978_s30 = smul.u32 (%p1195_p6), 6, %s1106_s15 }
  0x3a   : > { %956 = vmatprep.subr.bf16.mxu0 %v1041_v10  ;;  %426 = vst.msk [vmem:[#allocation2 + $0x8] sm:$0xff] %vm424_vm0, %v1120_v13  ;;  %1038 = vset.pattern.permute.xlu1 %v1121_v21  ;;  %428 = vst.msk [vmem:[#allocation3] sm:$0xff] %vm424_vm0, %v1122_v22  ;;  %v622_v36 = vsel %vm620_vm2, %v1044_v35, 0 }
  0x3b   : > { %1039 = vset.pattern.permute.xlu0 %v1121_v21  ;;  %429 = vst.msk [vmem:[#allocation3 + $0x8] sm:$0xff] %vm424_vm0, %v1122_v22  ;;  %430 = vst.msk [vmem:[#allocation3 + $0x10] sm:$0xff] %vm424_vm0, %v1122_v22  ;;  %970 = vmatprep.subr.msk.bf16.mxu1 %vm620_vm2, %v1044_v35  ;;  %s738_s4 = sadd.s32 (%p1195_p6), %s1102_s14, %s978_s30 }
  0x3c   : > { %963 = vmatpush3.bf16.msra.mxu1 %v622_v36  ;;  %s935_s5 = sshll.u32 (%p1195_p6), %s738_s4, 2 }
  0x3d   : > { %964 = vmatprep.subr.bf16.mxu1 %v1045_v37  ;;  %s740_s8 = scalar_lea.vmem (%p1195_p6), %s1290_s3, %s935_s5 }
  0x40   : > { %v513_v23 = vld [vmem:[#allocation2 + $0x10] sm:$0xff]  ;;  %v511_v25 = vld [vmem:[#allocation2] sm:$0xff]  ;;  %965 = vmatpush3.bf16.msra.mxu1 %v1045_v37 }
  0x41   : > { %957 = vmatpush3.bf16.xpose.msra.mxu0 %v1041_v10  ;;  %v512_v30 = vld [vmem:[#allocation2 + $0x8] sm:$0xff]  ;;  %v560_v61 = vld [vmem:[#allocation3] sm:$0xff] }
  0x42   : > { %v562_v0 = vld [vmem:[#allocation3 + $0x10] sm:$0xff]  ;;  %v561_v2 = vld [vmem:[#allocation3 + $0x8] sm:$0xff] }
  0x48   : > { %959 = vmatmul.mubr.bf16.vlgmr.msra.gmra.mxu0 %v1043_v12 }
 0x108   : > { %v960_v14 = vpop.f32.mrf.mxu0 }
 0x109   : > { %v521_v15 = vsel %vm514_vm1, %v960_v14, -inf }
 0x10a   : > { %522 = vmax.xlane.f32.xlu1 %v521_v15  ;;  %v497_v16 = vpop.f32.mrf.mxu0 }
 0x10b   : > { %v515_v17 = vsel %vm514_vm1, %v497_v16, -inf }
 0x10c   : > { %516 = vmax.xlane.f32.xlu0 %v515_v17  ;;  %v961_v18 = vpop.f32.mrf.mxu0 }
 0x10e   : > { %v500_v19 = vpop.f32.mrf.mxu0 }
 0x10f   : > { %v518_v20 = vsel %vm514_vm1, %v500_v19, -inf }
 0x110   : > { %519 = vmax.xlane.f32.xlu0 %v518_v20 }
 0x193   : > { %v523_v24 = vpop.xlane.xlu1 %522 }
 0x194   : > { %v526_v26 = vmax.f32 %v513_v23, %v523_v24 }
 0x195   : > { %v517_v27 = vpop.xlane.xlu0 %516 }
 0x196   : > { %v529_v28 = vsub.f32 %v513_v23, %v526_v26  ;;  %680 = vst.msk [vmem:[#allocation2 + $0x10] sm:$0xff] %vm424_vm0, %v526_v26  ;;  %v524_v29 = vmax.f32 %v511_v25, %v517_v27 }
 0x198   : > { %v527_v31 = vsub.f32 %v511_v25, %v524_v29  ;;  %678 = vst.msk [vmem:[#allocation2] sm:$0xff] %vm424_vm0, %v524_v29  ;;  %538 = vperm.xlu1 %1038, %v524_v29   ;;  %v534_v57 = vmul.f32 1.442695, %v529_v28 }
 0x199   : > { %v520_v32 = vpop.xlane.xlu0 %519 }
 0x19a   : > { %v525_v33 = vmax.f32 %v512_v30, %v520_v32  ;;  %v530_v51 = vmul.f32 1.442695, %v527_v31 }
 0x19c   : > { %v528_v34 = vsub.f32 %v512_v30, %v525_v33  ;;  %679 = vst.msk [vmem:[#allocation2 + $0x8] sm:$0xff] %vm424_vm0, %v525_v33  ;;  %548 = vperm.xlu1 %1038, %v526_v26   ;;  %543 = vperm.xlu0 %1039, %v525_v33  }
 0x19e   : > { %v532_v56 = vmul.f32 1.442695, %v528_v34 }
 0x213   : > { %v539_v38 = vpop.permute.xlu1 %538 }
 0x214   : > { %v551_v39 = vsub.f32 %v497_v16, %v539_v38 }
 0x216   : > { %v554_v40 = vmul.f32 1.442695, %v551_v39 }
 0x217   : > { %v549_v41 = vpop.permute.xlu1 %548  ;;  %v544_v42 = vpop.permute.xlu0 %543 }
 0x218   : > { %1046 = vpow2.f32 %v554_v40  ;;  %v553_v43 = vsub.f32 %v960_v14, %v549_v41  ;;  %v552_v44 = vsub.f32 %v500_v19, %v544_v42 }
 0x21a   : > { %v558_v45 = vmul.f32 1.442695, %v553_v43  ;;  %v556_v46 = vmul.f32 1.442695, %v552_v44 }
 0x21c   : > { %1048 = vpow2.f32 %v558_v45 }
 0x21d   : > { %1050 = vpow2.f32 %v556_v46 }
 0x21e   : > { %1052 = vpow2.f32 %v530_v51 }
 0x21f   : > { %1054 = vpow2.f32 %v532_v56 }
 0x220   : > { %1056 = vpow2.f32 %v534_v57 }
 0x225   : > { %v1047_v47 = vpop.eup %1046 }
 0x226   : > { %v566_v48 = vsel %vm514_vm1, %v1047_v47, 0.0 }
 0x227   : > { %567 = vadd.xlane.f32.xlu1 %v566_v48 }
 0x229   : > { %v1049_v49 = vpop.eup %1048 }
 0x22a   : > { %v1051_v50 = vpop.eup %1050  ;;  %v572_v52 = vsel %vm514_vm1, %v1049_v49, 0.0  ;;  %v604_v53 = vpack.c.bf16 %v1049_v49, %v1049_v49 }
 0x22b   : > { %573 = vadd.xlane.f32.xlu1 %v572_v52  ;;  %v569_v54 = vsel %vm514_vm1, %v1051_v50, 0.0  ;;  %v603_v55 = vpack.c.bf16 %v1051_v50, %v1047_v47  ;;  %v1053_v58 = vpop.eup %1052 }
 0x22c   : > { %570 = vadd.xlane.f32.xlu0 %v569_v54  ;;  %v1055_v59 = vpop.eup %1054  ;;  %v563_v62 = vmul.f32 %v1053_v58, %v560_v61 }
 0x22d   : > { %966 = vmatprep.mubr.msk.bf16.mxu1 %vm514_vm1, %v603_v55  ;;  %v1057_v60 = vpop.eup %1056  ;;  %v564_v5 = vmul.f32 %v1055_v59, %v561_v2 }
 0x22e   : > { %967 = vmatmul.mubr.msk.bf16.vlgmr.msra.gmra.mxu1 %vm514_vm1, %v604_v53  ;;  %v565_v3 = vmul.f32 %v1057_v60, %v562_v0 }
 0x23c   : > { %587 = vperm.xlu1 %1038, %v1053_v58  }
 0x240   : > { %592 = vperm.xlu1 %1038, %v1055_v59  }
 0x242   : > { %597 = vperm.xlu0 %1039, %v1057_v60  }
 0x2b0   : > { %v568_v63 = vpop.xlane.xlu1 %567 }
 0x2b1   : > { %v575_v1 = vadd.f32 %v568_v63, %v563_v62 }
 0x2b3   : > { %579 = vst.msk [vmem:[#allocation3] sm:$0xff] %vm424_vm0, %v575_v1 }
 0x2b4   : > { %v574_v4 = vpop.xlane.xlu1 %573 }
 0x2b5   : > { %v577_v6 = vadd.f32 %v574_v4, %v565_v3  ;;  %v571_v7 = vpop.xlane.xlu0 %570 }
 0x2b6   : > { %v576_v8 = vadd.f32 %v571_v7, %v564_v5 }
 0x2b7   : > { %581 = vst.msk [vmem:[#allocation3 + $0x10] sm:$0xff] %vm424_vm0, %v577_v6 }
 0x2b8   : > { %580 = vst.msk [vmem:[#allocation3 + $0x8] sm:$0xff] %vm424_vm0, %v576_v8  ;;  %v588_v18 = vpop.permute.xlu1 %587 }
 0x2b9   : > { %v600_v22 = vmul.f32 0.0, %v588_v18 }
 0x2ba   : > { %v687_v9 = vld [vmem:[#allocation3] sm:$0xff] }
 0x2bb   : > { %1058 = vrcp.f32 %v687_v9 }
 0x2bc   : > { %v593_v19 = vpop.permute.xlu1 %592 }
 0x2bd   : > { %v601_v23 = vmul.f32 0.0, %v593_v19  ;;  %v598_v24 = vpop.permute.xlu0 %597 }
 0x2be   : > { %v689_v11 = vld [vmem:[#allocation3 + $0x10] sm:$0xff]  ;;  %v602_v28 = vmul.f32 0.0, %v598_v24 }
 0x2bf   : > { %v688_v10 = vld [vmem:[#allocation3 + $0x8] sm:$0xff] }
 0x2c0   : > { %1060 = vrcp.f32 %v688_v10 }
 0x2c1   : > { %1062 = vrcp.f32 %v689_v11 }
 0x2c8   : > { %v1059_v12 = vpop.eup %1058 }
 0x2c9   : > { %695 = vperm.xlu1 %1038, %v1059_v12  }
 0x2cd   : > { %v1061_v13 = vpop.eup %1060 }
 0x2ce   : > { %700 = vperm.xlu1 %1038, %v1061_v13   ;;  %v1063_v14 = vpop.eup %1062 }
 0x2d2   : > { %705 = vperm.xlu1 %1038, %v1063_v14  }
 0x2ee   : > { %v968_v15 = vpop.f32.mrf.mxu1 }
 0x2ef   : > { %v674_v31 = vadd.f32 %v968_v15, %v602_v28 }
 0x2f0   : > { %v658_v16 = vpop.f32.mrf.mxu1 }
 0x2f1   : > { %v672_v25 = vadd.f32 %v658_v16, %v600_v22 }
 0x2f2   : > { %v969_v17 = vpop.f32.mrf.mxu1 }
 0x2f4   : > { %v661_v21 = vpop.f32.mrf.mxu1 }
 0x2f5   : > { %v673_v26 = vadd.f32 %v661_v21, %v601_v23 }
 0x344   : > { %v696_v20 = vpop.permute.xlu1 %695 }
 0x345   : > { %v708_v29 = vmul.f32 %v696_v20, %v672_v25 }
 0x349   : > { %v701_v27 = vpop.permute.xlu1 %700 }
 0x34a   : > { %v709_v30 = vmul.f32 %v701_v27, %v673_v26 }
 0x34c   : > { %v944_v32 = vpack.c.bf16 %v709_v30, %v708_v29 }
 0x34d   : > { %v706_v33 = vpop.permute.xlu1 %705 }
 0x34e   : > { %945 = vst [vmem:[%s414_s29] sm:$0xff] %v944_v32   ;;  %v710_v34 = vmul.f32 %v706_v33, %v674_v31  ;;  %733 = sbr.rel (!%p1195_p6) target bundleno = 859 (0x35b), region = 167 }
 0x350   : > { %v940_v35 = vpack.c.bf16 %v710_v34, %v710_v34 }
 0x352   : > { %726 = vst [vmem:[%s414_s29 + $0x8] sm:$0xf] %v940_v35 }
 0x355   : > { %v757_v36 = vld [vmem:[%s414_s29] sm:$0xf]  ;;  %v759_v37 = vld [vmem:[%s414_s29 + $0x4] sm:$0xf] }
 0x356   : > { %758 = vst [vmem:[%s740_s8] sm:$0xf] %v757_v36  ;;  %760 = vst [vmem:[%s740_s8 + $0x8] sm:$0xf] %v759_v37 }
 0x359   : > { %v761_v38 = vld [vmem:[%s414_s29 + $0x8] sm:$0xf] }
 0x35a   : > { %762 = vst [vmem:[%s740_s8 + $0x10] sm:$0xf] %v761_v38 }
 0x35b PF: > { %s13_s18 = sadd.s32 1, %s1118_s18   ;;  %s1293_s12 = smov %s1098_s13 }
 0x35c   : > { %p10_p12 = scmp.ge.s32.totalorder %s13_s18, 6   ;;  %s1294_s13 = smov %s1203_s28 }
 0x35d   : > { %s1295_s14 = smov %s1110_s16  ;;  %s1296_s15 = smov %s1114_s17 }
 0x35e   : > { %s1297_s16 = smov %s1300_s19  ;;  %s1298_s17 = smov %s1304_s20 }
 0x35f   :  { %12 = sbr.rel (!%p10_p12) target bundleno = 4 (0x4), region = 255 }

// kernel: hidream_block_forward.30
= control target key start
LH: loop header
LB: loop body
LE: loop exit
PB: predicated region body
PF: predicated region fallthrough
CT: control target
= control target key end

     0   :  { %s995_s18 = smov 0   ;;  %s997_s19 = smov 0   ;;  %s1090_s0 = inlined_call_operand.vmem [shape: bf16[2,16,256], index: 0, kind: input, shape index: {}]   ;;  %s1091_s1 = inlined_call_operand.vmem [shape: bf16[256,128], index: 1, kind: input, shape index: {}]   ;;  %s1092_s2 = inlined_call_operand.vmem [shape: bf16[1,128], index: 2, kind: input, shape index: {}]   ;;  %s1093_s3 = inlined_call_operand.vmem [shape: bf16[2,1,128], index: 3, kind: input, shape index: {}]   ;;  %s1094_s4 = inlined_call_operand.vmem [shape: bf16[2,16,128], index: 4, kind: input, shape index: {}]   ;;  %s1095_s5 = inlined_call_operand.vmem [shape: bf16[2,16,128], index: 5, kind: output, shape index: {}]  }
   0x1   :  { %s999_s20 = smov 0  }
   0x2 LB: > { %s41_s21 = sadd.s32 1, %s959_s19  ;;  %p833_p0 = scmp.ge.s32.totalorder %s963_s20, 1  ;;  %s963_s20 = sphi %s999_s20, %s15_s20   ;;  %s959_s19 = sphi %s997_s19, %s1097_s19   ;;  %s955_s18 = sphi %s995_s18, %s1096_s18  }
   0x3   : > { %p43_p1 = scmp.ge.s32.totalorder %s41_s21, 2  ;;  %p291_p2 = scmp.lt.s32.totalorder %s963_s20, 3 }
   0x5   : > { %s1099_s21 = smov (%p43_p1, %s41_s21), 0  ;;  %p292_p3 = pnand %p833_p0, %p291_p2 }
   0x6   : > { %p366_p4 = scmp.lt.s32.totalorder (!%p292_p3), %s955_s18, 1 }
   0x7   : > { %295 = sbr.rel (%p292_p3) target bundleno = 255 (0xff), region = 40 }
   0xc   : > { %v922_v0 = vld [vmem:[%s1091_s1 + $0x78] sm:$0xff]   ;;  %v924_v2 = vld [vmem:[%s1091_s1 + $0x70] sm:$0xff]   ;;  %v926_v4 = vld [vmem:[%s1091_s1 + $0x68] sm:$0xff]   ;;  %s1101_s18 = smov (!%p366_p4, %s955_s18), 1  ;;  %v625_v18 = vlaneseq }
   0xd   : > { %v923_v1 = vld [vmem:[%s1091_s1 + $0x38] sm:$0xff]   ;;  %876 = vmatprep.subr.bf16.mxu0 %v922_v0  ;;  %v925_v3 = vld [vmem:[%s1091_s1 + $0x30] sm:$0xff]   ;;  %v927_v5 = vld [vmem:[%s1091_s1 + $0x28] sm:$0xff]   ;;  %s862_s13 = sshll.u32 %s1101_s18, 4  ;;  %s397_s16 = scalar_lea.vmem %s1093_s3, %s1101_s18 }
   0xe   : > { %877 = vmatpush3.bf16.msra.mxu0 %v923_v1  ;;  %v928_v6 = vld [vmem:[%s1091_s1 + $0x60] sm:$0xff]   ;;  %v930_v8 = vld [vmem:[%s1091_s1 + $0x58] sm:$0xff]   ;;  %s377_s22 = scalar_lea.vmem %s1090_s0, %s862_s13  ;;  %v932_v10 = vld [vmem:[%s1091_s1 + $0x50] sm:$0xff]   ;;  %v626_v19 = vshrl.u32 %v625_v18, 7  ;;  %s863_s17 = sshll.u32 %s1101_s18, 3 }
   0xf   : > { %878 = vmatprep.subr.bf16.mxu0 %v924_v2  ;;  %v929_v7 = vld [vmem:[%s1091_s1 + $0x20] sm:$0xff]   ;;  %v931_v9 = vld [vmem:[%s1091_s1 + $0x18] sm:$0xff]   ;;  %v933_v12 = vld [vmem:[%s1091_s1 + $0x10] sm:$0xff]   ;;  %s409_s24 = scalar_lea.vmem %s1094_s4, %s863_s17  ;;  %s422_s26 = scalar_lea.vmem %s1095_s5, %s863_s17 }
  0x10   : > { %v940_v11 = vld [vmem:[%s377_s22 + $0x4] ss:$8 sps:$4 sm:$0xff]   ;;  %v938_v17 = vld [vmem:[%s377_s22] ss:$8 sps:$4 sm:$0xff]   ;;  %v627_v22 = vsub.s32 0, %v626_v19 }
  0x11   : > { %605 = vmatprep.mubr.bf16.mxu0 %v940_v11  ;;  %v934_v13 = vld [vmem:[%s1091_s1 + $0x48] sm:$0xff]   ;;  %v936_v15 = vld [vmem:[%s1091_s1 + $0x40] sm:$0xff]  }
  0x12   : > { %879 = vmatpush3.bf16.msra.mxu0 %v925_v3  ;;  %v935_v14 = vld [vmem:[%s1091_s1 + $0x8] sm:$0xff]   ;;  %v937_v16 = vld [vmem:[%s1091_s1] sm:$0xff]  }
  0x13   : > { %880 = vmatprep.subr.bf16.mxu0 %v926_v4  ;;  %v623_v20 = vld [vmem:[%s1092_s2] sm:$0x1] }
  0x14   : > { %v624_v21 = vunpack.c.l.bf16 %v623_v20  ;;  %v631_v23 = vld [vmem:[%s397_s16] sm:$0x1] }
  0x15   : > { %v632_v26 = vunpack.c.l.bf16 %v631_v23  ;;  %v868_v32 = vld [vmem:[%s409_s24] sm:$0xff]  }
  0x16   : > { %881 = vmatpush3.bf16.msra.mxu0 %v927_v5  ;;  %v628_v25 = vrot.slane %v624_v21, %v627_v22  ;;  %v869_v36 = vunpack.c.l.bf16 %v868_v32  ;;  %v870_v38 = vunpack.c.h.bf16 %v868_v32 }
  0x17   : > { %882 = vmatprep.subr.bf16.mxu0 %v928_v6  ;;  %v636_v31 = vrot.slane %v632_v26, %v627_v22 }
  0x1a   : > { %883 = vmatpush3.bf16.msra.mxu0 %v929_v7 }
  0x1b   : > { %884 = vmatprep.subr.bf16.mxu0 %v930_v8 }
  0x1e   : > { %885 = vmatpush3.bf16.msra.mxu0 %v931_v9 }
  0x1f   : > { %886 = vmatprep.subr.bf16.mxu0 %v932_v10 }
  0x22   : > { %887 = vmatpush3.bf16.msra.mxu0 %v933_v12 }
  0x23   : > { %888 = vmatprep.subr.bf16.mxu0 %v934_v13 }
  0x26   : > { %889 = vmatpush3.bf16.msra.mxu0 %v935_v14 }
  0x27   : > { %890 = vmatprep.subr.bf16.mxu0 %v936_v15 }
  0x2a   : > { %891 = vmatpush3.bf16.msra.mxu0 %v937_v16 }
  0x2d   : > { %606 = vmatmul.mubr.bf16.vlgmr.msra.gmra.mxu0 %v938_v17 }
  0xed   : > { %v892_v24 = vpop.f32.mrf.mxu0 }
  0xef   : > { %v893_v27 = vpop.f32.mrf.mxu0 }
  0xf0   : > { %v894_v28 = vadd.f32 %v893_v27, %v892_v24 }
  0xf1   : > { %v895_v29 = vpop.f32.mrf.mxu0 }
  0xf2   : > { %v629_v30 = vadd.f32 %v894_v28, %v628_v25 }
  0xf3   : > { %v896_v33 = vpop.f32.mrf.mxu0 }
  0xf4   : > { %v897_v34 = vadd.f32 %v896_v33, %v895_v29  ;;  %v637_v35 = vmul.f32 %v636_v31, %v629_v30 }
  0xf6   : > { %v630_v37 = vadd.f32 %v897_v34, %v628_v25  ;;  %v643_v40 = vadd.f32 %v869_v36, %v637_v35 }
  0xf8   : > { %v638_v39 = vmul.f32 %v636_v31, %v630_v37 }
  0xfa   : > { %v644_v41 = vadd.f32 %v870_v38, %v638_v39 }
  0xfc   : > { %v874_v42 = vpack.c.bf16 %v644_v41, %v643_v40 }
  0xfe   : > { %875 = vst [vmem:[%s422_s26] sm:$0xff] %v874_v42  }
  0xff PF: > { %s15_s20 = sadd.s32 1, %s963_s20   ;;  %s1096_s18 = smov %s959_s19 }
 0x100   : > { %p12_p5 = scmp.ge.s32.totalorder %s15_s20, 4   ;;  %s1097_s19 = smov %s1099_s21 }
 0x102   :  { %14 = sbr.rel (!%p12_p5) target bundleno = 2 (0x2), region = 90 }

// kernel: hidream_block_forward.39
= control target key start
LH: loop header
LB: loop body
LE: loop exit
PB: predicated region body
PF: predicated region fallthrough
CT: control target
= control target key end

     0   :  { %12 = vsyncpa [#allocation4], 0  ;;  %s2465_s0 = inlined_call_operand.vmem [shape: bf16[2,8,128], index: 0, kind: input, shape index: {}]   ;;  %s2466_s1 = inlined_call_operand.vmem [shape: bf16[128,512], index: 1, kind: input, shape index: {}]   ;;  %s2467_s2 = inlined_call_operand.vmem [shape: bf16[128,512], index: 2, kind: input, shape index: {}]   ;;  %s2468_s3 = inlined_call_operand.vmem [shape: bf16[512,128], index: 3, kind: input, shape index: {}]   ;;  %s2469_s4 = inlined_call_operand.vmem [shape: bf16[2,1,128], index: 4, kind: input, shape index: {}]   ;;  %s2470_s5 = inlined_call_operand.vmem [shape: f32[2,8,1], index: 5, kind: input, shape index: {}]   ;;  %s2471_s6 = inlined_call_operand.vmem [shape: bf16[2,8,128], index: 6, kind: input, shape index: {}]   ;;  %s2472_s7 = inlined_call_operand.hbm [shape: bf16[2,8,128], index: 7, kind: output, shape index: {}]  }
   0x1   :  { %14 = vsyncpa [#allocation4 + $0x1], 0  ;;  %s2049_s24 = smov 0   ;;  %s2051_s25 = smov 0  }
   0x2   :  { %s2053_s26 = smov 0   ;;  %s2055_s27 = smov 0  }
   0x3   :  { %s2057_s28 = smov 0   ;;  %s2059_s29 = smov 0  }
   0x4 LB: > { %s1568_s30 = sadd.s32 4294967295, %s2005_s29   ;;  %s1569_s8 = sadd.s32 4294967294, %s2005_s29   ;;  %s2005_s29 = sphi %s2059_s29, %s20_s29   ;;  %s2001_s28 = sphi %s2057_s28, %s2481_s28   ;;  %s1997_s27 = sphi %s2055_s27, %s2480_s27   ;;  %s1993_s26 = sphi %s2053_s26, %s2479_s26   ;;  %s1989_s25 = sphi %s2051_s25, %s2478_s25   ;;  %s1985_s24 = sphi %s2049_s24, %s2477_s24  }
   0x5   : > { %s39_s9 = sadd.s32 1, %s2001_s28  ;;  %s236_s10 = sadd.s32 1, %s1993_s26 }
   0x6   : > { %p41_p0 = scmp.ge.s32.totalorder %s39_s9, 2  ;;  %p246_p1 = scmp.ne.s32.totalorder %s1993_s26, %s1989_s25 }
   0x7   : > { %p247_p2 = scmp.eq.s32.totalorder %s1568_s30, 1  ;;  %p252_p3 = scmp.ne.s32.totalorder %s1989_s25, %s1985_s24 }
   0x8   : > { %s2483_s9 = smov (%p41_p0, %s39_s9), 0  ;;  %p253_p5 = scmp.eq.s32.totalorder %s1569_s8, 1 }
   0x9   : > { %p2089_p4 = por %p247_p2, %p246_p1  ;;  %s231_s12 = ssub.s32 %s2001_s28, %s2483_s9 }
   0xa   : > { %p1575_p6 = scmp.ge.s32.totalorder %s2005_s29, 1  ;;  %p234_p7 = scmp.eq.s32.totalorder %s231_s12, 0 }
   0xb   : > { %p2096_p8 = por %p253_p5, %p252_p3  ;;  %p334_p9 = scmp.lt.s32.totalorder %s2005_s29, 3 }
   0xc   : > { %s2102_s14 = scalar_select %p234_p7, %s1993_s26, %s236_s10  }
   0xd   : > { %p335_p10 = pnand %p1575_p6, %p334_p9 }
   0xe   : > { %p400_p11 = scmp.lt.s32.totalorder (!%p335_p10), %s1997_s27, 1  ;;  %s397_s18 = sand.u32 (!%p335_p10), 1, %s1989_s25  }
   0xf   : > { %338 = sbr.rel (%p335_p10) target bundleno = 509 (0x1fd), region = 48  ;;  %s2008_s12 = smov (!%p335_p10), [#allocation3]  }
  0x10   : > { %s1933_s16 = sshll.u32 (!%p335_p10), %s2008_s12, 4  ;;  %s1934_s16 = int_to_ptr.vmem [resolvable:$false] %s1933_s16 }
  0x14   : > { %v1785_v0 = vld [vmem:[%s2466_s1 + $0xe4] ss:$16 sps:$4 sm:$0xff]   ;;  %v1787_v1 = vld [vmem:[%s2466_s1 + $0xec] ss:$16 sps:$4 sm:$0xff]   ;;  %v2007_v2 = vmov 0   ;;  %s2187_s15 = scalar_select %p400_p11, %s1997_s27, 1 }
  0x15   : > { %673 = vmatprep.mubr.bf16.mxu0 %v2007_v2  ;;  %714 = vmatprep.mubr.bf16.mxu1 %v2007_v2  ;;  %v1789_v3 = vld [vmem:[%s2466_s1 + $0xe0] ss:$16 sps:$4 sm:$0xff]   ;;  %v1790_v4 = vld [vmem:[%s2466_s1 + $0xe8] ss:$16 sps:$4 sm:$0xff]   ;;  %v1791_v5 = vld [vmem:[%s2466_s1 + $0xc4] ss:$16 sps:$4 sm:$0xff]  }
  0x16   : > { %641 = vmatprep.subr.bf16.mxu0 %v1785_v0  ;;  %1784 = vset.pattern.permute.xlu0 %v2007_v2  ;;  %v1793_v6 = vld [vmem:[%s2466_s1 + $0xcc] ss:$16 sps:$4 sm:$0xff]   ;;  %v1795_v7 = vld [vmem:[%s2466_s1 + $0xc0] ss:$16 sps:$4 sm:$0xff]   ;;  %v1796_v8 = vld [vmem:[%s2466_s1 + $0xc8] ss:$16 sps:$4 sm:$0xff]   ;;  %s427_s8 = scalar_lea.vmem %s2469_s4, %s2187_s15 }
  0x17   : > { %682 = vmatprep.subr.bf16.mxu1 %v1787_v1  ;;  %642 = vmatpush1.bf16.msra.mxu0 %v1789_v3  ;;  %v1797_v9 = vld [vmem:[%s2466_s1 + $0xa4] ss:$16 sps:$4 sm:$0xff]   ;;  %v1799_v10 = vld [vmem:[%s2466_s1 + $0xac] ss:$16 sps:$4 sm:$0xff]   ;;  %v1801_v11 = vld [vmem:[%s2466_s1 + $0xa0] ss:$16 sps:$4 sm:$0xff]  }
  0x18   : > { %683 = vmatpush1.bf16.msra.mxu1 %v1790_v4  ;;  %643 = vmatprep.subr.bf16.mxu0 %v1791_v5  ;;  %v1802_v12 = vld [vmem:[%s2466_s1 + $0xa8] ss:$16 sps:$4 sm:$0xff]   ;;  %v1803_v13 = vld [vmem:[%s2466_s1 + $0x84] ss:$16 sps:$4 sm:$0xff]   ;;  %v1805_v14 = vld [vmem:[%s2466_s1 + $0x8c] ss:$16 sps:$4 sm:$0xff]  }
  0x19   : > { %684 = vmatprep.subr.bf16.mxu1 %v1793_v6  ;;  %v1807_v15 = vld [vmem:[%s2466_s1 + $0x80] ss:$16 sps:$4 sm:$0xff]   ;;  %v1808_v16 = vld [vmem:[%s2466_s1 + $0x88] ss:$16 sps:$4 sm:$0xff]   ;;  %v1809_v17 = vld [vmem:[%s2466_s1 + $0x64] ss:$16 sps:$4 sm:$0xff]  }
  0x1a   : > { %v1811_v18 = vld [vmem:[%s2466_s1 + $0x6c] ss:$16 sps:$4 sm:$0xff]   ;;  %v1813_v19 = vld [vmem:[%s2466_s1 + $0x60] ss:$16 sps:$4 sm:$0xff]   ;;  %v1814_v20 = vld [vmem:[%s2466_s1 + $0x68] ss:$16 sps:$4 sm:$0xff]  }
  0x1b   : > { %644 = vmatpush1.bf16.msra.mxu0 %v1795_v7  ;;  %v1815_v21 = vld [vmem:[%s2466_s1 + $0x44] ss:$16 sps:$4 sm:$0xff]   ;;  %v1817_v22 = vld [vmem:[%s2466_s1 + $0x4c] ss:$16 sps:$4 sm:$0xff]   ;;  %v1819_v23 = vld [vmem:[%s2466_s1 + $0x40] ss:$16 sps:$4 sm:$0xff]  }
  0x1c   : > { %685 = vmatpush1.bf16.msra.mxu1 %v1796_v8  ;;  %645 = vmatprep.subr.bf16.mxu0 %v1797_v9  ;;  %v1820_v24 = vld [vmem:[%s2466_s1 + $0x48] ss:$16 sps:$4 sm:$0xff]   ;;  %v1821_v25 = vld [vmem:[%s2466_s1 + $0x24] ss:$16 sps:$4 sm:$0xff]   ;;  %v1823_v26 = vld [vmem:[%s2466_s1 + $0x2c] ss:$16 sps:$4 sm:$0xff]  }
  0x1d   : > { %686 = vmatprep.subr.bf16.mxu1 %v1799_v10  ;;  %v1825_v27 = vld [vmem:[%s2466_s1 + $0x20] ss:$16 sps:$4 sm:$0xff]   ;;  %v1826_v28 = vld [vmem:[%s2466_s1 + $0x28] ss:$16 sps:$4 sm:$0xff]   ;;  %v1827_v29 = vld [vmem:[%s2466_s1 + $0x4] ss:$16 sps:$4 sm:$0xff]  }
  0x1e   : > { %v1829_v30 = vld [vmem:[%s2466_s1 + $0xc] ss:$16 sps:$4 sm:$0xff]   ;;  %s2473_s30 = sshll.u32 %s2187_s15, 2  ;;  %v1831_v31 = vld [vmem:[%s2466_s1] ss:$16 sps:$4 sm:$0xff]   ;;  %s2476_s10 = sshll.u32 %s2187_s15, 2 }
  0x1f   : > { %646 = vmatpush1.bf16.msra.mxu0 %v1801_v11  ;;  %v1832_v32 = vld [vmem:[%s2466_s1 + $0x8] ss:$16 sps:$4 sm:$0xff]   ;;  %s406_s19 = scalar_lea.vmem %s2465_s0, %s2473_s30  ;;  %v1835_v33 = vld [vmem:[%s2467_s2 + $0xe4] ss:$16 sps:$4 sm:$0xff]   ;;  %v1838_v34 = vld [vmem:[%s2467_s2 + $0xec] ss:$16 sps:$4 sm:$0xff]   ;;  %s441_s17 = scalar_lea.vmem %s2471_s6, %s2476_s10 }
  0x20   : > { %687 = vmatpush1.bf16.msra.mxu1 %v1802_v12  ;;  %647 = vmatprep.subr.bf16.mxu0 %v1803_v13  ;;  %v2219_v35 = vld [vmem:[%s406_s19] sm:$0xf]  ;;  %v1836_v37 = vld [vmem:[%s2467_s2 + $0xe8] ss:$16 sps:$4 sm:$0xff]   ;;  %v1841_v38 = vld [vmem:[%s2467_s2 + $0xc4] ss:$16 sps:$4 sm:$0xff]  }
  0x21   : > { %688 = vmatprep.subr.bf16.mxu1 %v1805_v14  ;;  %v1833_v36 = vld [vmem:[%s2467_s2 + $0xe0] ss:$16 sps:$4 sm:$0xff]   ;;  %v1844_v39 = vld [vmem:[%s2467_s2 + $0xcc] ss:$16 sps:$4 sm:$0xff]   ;;  %v1842_v41 = vld [vmem:[%s2467_s2 + $0xc8] ss:$16 sps:$4 sm:$0xff]  }
  0x22   : > { %v1839_v40 = vld [vmem:[%s2467_s2 + $0xc0] ss:$16 sps:$4 sm:$0xff]   ;;  %v1847_v42 = vld [vmem:[%s2467_s2 + $0xa4] ss:$16 sps:$4 sm:$0xff]   ;;  %v1850_v43 = vld [vmem:[%s2467_s2 + $0xac] ss:$16 sps:$4 sm:$0xff]  }
  0x23   : > { %648 = vmatpush1.bf16.msra.mxu0 %v1807_v15  ;;  %v1845_v44 = vld [vmem:[%s2467_s2 + $0xa0] ss:$16 sps:$4 sm:$0xff]   ;;  %v1848_v45 = vld [vmem:[%s2467_s2 + $0xa8] ss:$16 sps:$4 sm:$0xff]   ;;  %v1853_v46 = vld [vmem:[%s2467_s2 + $0x84] ss:$16 sps:$4 sm:$0xff]  }
  0x24   : > { %689 = vmatpush1.bf16.msra.mxu1 %v1808_v16  ;;  %649 = vmatprep.subr.bf16.mxu0 %v1809_v17  ;;  %v1856_v47 = vld [vmem:[%s2467_s2 + $0x8c] ss:$16 sps:$4 sm:$0xff]   ;;  %v1851_v48 = vld [vmem:[%s2467_s2 + $0x80] ss:$16 sps:$4 sm:$0xff]   ;;  %v1854_v49 = vld [vmem:[%s2467_s2 + $0x88] ss:$16 sps:$4 sm:$0xff]  }
  0x25   : > { %690 = vmatprep.subr.bf16.mxu1 %v1811_v18  ;;  %v1859_v50 = vld [vmem:[%s2467_s2 + $0x64] ss:$16 sps:$4 sm:$0xff]   ;;  %v1862_v51 = vld [vmem:[%s2467_s2 + $0x6c] ss:$16 sps:$4 sm:$0xff]   ;;  %v1857_v52 = vld [vmem:[%s2467_s2 + $0x60] ss:$16 sps:$4 sm:$0xff]  }
  0x26   : > { %v1860_v53 = vld [vmem:[%s2467_s2 + $0x68] ss:$16 sps:$4 sm:$0xff]   ;;  %v1865_v54 = vld [vmem:[%s2467_s2 + $0x44] ss:$16 sps:$4 sm:$0xff]   ;;  %v1868_v55 = vld [vmem:[%s2467_s2 + $0x4c] ss:$16 sps:$4 sm:$0xff]  }
  0x27   : > { %650 = vmatpush1.bf16.msra.mxu0 %v1813_v19  ;;  %v1863_v56 = vld [vmem:[%s2467_s2 + $0x40] ss:$16 sps:$4 sm:$0xff]   ;;  %v1866_v57 = vld [vmem:[%s2467_s2 + $0x48] ss:$16 sps:$4 sm:$0xff]   ;;  %v1871_v58 = vld [vmem:[%s2467_s2 + $0x24] ss:$16 sps:$4 sm:$0xff]  }
  0x28   : > { %691 = vmatpush1.bf16.msra.mxu1 %v1814_v20  ;;  %651 = vmatprep.subr.bf16.mxu0 %v1815_v21  ;;  %v1874_v59 = vld [vmem:[%s2467_s2 + $0x2c] ss:$16 sps:$4 sm:$0xff]   ;;  %v1869_v60 = vld [vmem:[%s2467_s2 + $0x20] ss:$16 sps:$4 sm:$0xff]   ;;  %v1872_v61 = vld [vmem:[%s2467_s2 + $0x28] ss:$16 sps:$4 sm:$0xff]  }
  0x29   : > { %692 = vmatprep.subr.bf16.mxu1 %v1817_v22  ;;  %v1877_v62 = vld [vmem:[%s2467_s2 + $0x4] ss:$16 sps:$4 sm:$0xff]   ;;  %v1880_v63 = vld [vmem:[%s2467_s2 + $0xc] ss:$16 sps:$4 sm:$0xff]   ;;  %v1875_v0 = vld [vmem:[%s2467_s2] ss:$16 sps:$4 sm:$0xff]  }
  0x2a   : > { %v1878_v1 = vld [vmem:[%s2467_s2 + $0x8] ss:$16 sps:$4 sm:$0xff]   ;;  %v1885_v6 = vld [vmem:[%s2468_s3 + $0x70] sm:$0xff]   ;;  %v1893_v14 = vld [vmem:[%s2468_s3 + $0x60] sm:$0xff]   ;;  %s1578_s30 = sshll.u32 %s2187_s15, 3  ;;  %s1681_s15 = sshll.u32 %s1997_s27, 6 }
  0x2b   : > { %652 = vmatpush1.bf16.msra.mxu0 %v1819_v23  ;;  %v1882_v3 = vld [vmem:[%s2468_s3 + $0xf8] sm:$0xff]   ;;  %v1886_v7 = vld [vmem:[%s2468_s3 + $0xf0] sm:$0xff]   ;;  %v1889_v10 = vld [vmem:[%s2468_s3 + $0x68] sm:$0xff]   ;;  %s434_s19 = scalar_lea.vmem %s2470_s5, %s1578_s30  ;;  %s1576_s30 = sshll.u32 %s397_s18, 2 }
  0x2c   : > { %693 = vmatpush1.bf16.msra.mxu1 %v1820_v24  ;;  %653 = vmatprep.subr.bf16.mxu0 %v1821_v25  ;;  %v1883_v4 = vld [vmem:[%s2468_s3 + $0x38] sm:$0xff]   ;;  %v1887_v8 = vld [vmem:[%s2468_s3 + $0x30] sm:$0xff]   ;;  %v1890_v11 = vld [vmem:[%s2468_s3 + $0xe8] sm:$0xff]   ;;  %s399_s20 = scalar_lea.vmem [#allocation3], %s1576_s30  ;;  %s1408_s23 = scalar_lea.hbm %s2472_s7, %s1681_s15 }
  0x2d   : > { %694 = vmatprep.subr.bf16.mxu1 %v1823_v26  ;;  %v1884_v5 = vld [vmem:[%s2468_s3 + $0xb8] sm:$0xff]   ;;  %v1888_v9 = vld [vmem:[%s2468_s3 + $0xb0] sm:$0xff]   ;;  %v1891_v12 = vld [vmem:[%s2468_s3 + $0x28] sm:$0xff]   ;;  %s1410_s21 = sshll.u32 %s399_s20, 4  ;;  %s1935_s27 = scalar_lea.vmem %s1934_s16, 128  ;;  %s1411_s21 = int_to_ptr.vmem [resolvable:$true] %s1410_s21 }
  0x2e   : > { %v1892_v13 = vld [vmem:[%s2468_s3 + $0xa8] sm:$0xff]   ;;  %v1894_v15 = vld [vmem:[%s2468_s3 + $0xe0] sm:$0xff]   ;;  %v1897_v18 = vld [vmem:[%s2468_s3 + $0x58] sm:$0xff]   ;;  %s1929_s10 = scalar_lea.vmem %s1411_s21, 64  ;;  %p1936_p1 = scmp.lt.s32.totalorder %s1411_s21, %s1934_s16 }
  0x2f   : > { %654 = vmatpush1.bf16.msra.mxu0 %v1825_v27  ;;  %v1895_v16 = vld [vmem:[%s2468_s3 + $0x20] sm:$0xff]   ;;  %v1898_v19 = vld [vmem:[%s2468_s3 + $0xd8] sm:$0xff]   ;;  %v1901_v22 = vld [vmem:[%s2468_s3 + $0x50] sm:$0xff]   ;;  %p1930_p12 = scmp.ne.s32.totalorder %s1411_s21, %s1929_s10  ;;  %p1937_p2 = scmp.lt.s32.totalorder %s1935_s27, %s1929_s10 }
  0x30   : > { %695 = vmatpush1.bf16.msra.mxu1 %v1826_v28  ;;  %655 = vmatprep.subr.bf16.mxu0 %v1827_v29  ;;  %v1896_v17 = vld [vmem:[%s2468_s3 + $0xa0] sm:$0xff]   ;;  %v1899_v20 = vld [vmem:[%s2468_s3 + $0x18] sm:$0xff]   ;;  %v1902_v23 = vld [vmem:[%s2468_s3 + $0xd0] sm:$0xff]  }
  0x31   : > { %696 = vmatprep.subr.bf16.mxu1 %v1829_v30  ;;  %v1900_v21 = vld [vmem:[%s2468_s3 + $0x98] sm:$0xff]   ;;  %v1903_v24 = vld [vmem:[%s2468_s3 + $0x10] sm:$0xff]   ;;  %v1905_v26 = vld [vmem:[%s2468_s3 + $0x48] sm:$0xff]   ;;  %p1931_p13 = pnand %p1930_p12, %p2089_p4  ;;  %p1938_p3 = por %p1937_p2, %p1936_p1 }
  0x32   : > { %v1904_v25 = vld [vmem:[%s2468_s3 + $0x90] sm:$0xff]   ;;  %v1906_v27 = vld [vmem:[%s2468_s3 + $0xc8] sm:$0xff]   ;;  %v1909_v30 = vld [vmem:[%s2468_s3 + $0x40] sm:$0xff]  }
  0x33   : > { %656 = vmatpush1.bf16.msra.mxu0 %v1831_v31  ;;  %v1907_v28 = vld [vmem:[%s2468_s3 + $0x8] sm:$0xff]   ;;  %v1910_v31 = vld [vmem:[%s2468_s3 + $0xc0] sm:$0xff]   ;;  %p1932_p0 = pneg %p1931_p13 }
  0x34   : > { %697 = vmatpush1.bf16.msra.mxu1 %v1832_v32  ;;  %915 = vmatprep.subr.bf16.mxu0 %v1835_v33  ;;  %v1908_v29 = vld [vmem:[%s2468_s3 + $0x88] sm:$0xff]   ;;  %v1911_v32 = vld [vmem:[%s2468_s3] sm:$0xff]  }
  0x35   : > { %956 = vmatprep.subr.bf16.mxu1 %v1838_v34  ;;  %v1912_v33 = vld [vmem:[%s2468_s3 + $0x80] sm:$0xff]   ;;  %p1939_p5 = pnand %p1938_p3, %p1932_p0 }
  0x36   : > { %674 = vmatmul.mubr.bf16.vlgmr.msra.gmra.mxu0 %v2219_v35  ;;  %v1376_v34 = vld [vmem:[%s434_s19] sm:$0xff] }
  0x37   : > { %715 = vmatmul.mubr.bf16.vlgmr.msra.gmra.mxu1 %v2219_v35  ;;  %916 = vmatpush1.bf16.msra.mxu0 %v1833_v36 }
  0x38   : > { %957 = vmatpush1.bf16.msra.mxu1 %v1836_v37  ;;  %917 = vmatprep.subr.bf16.mxu0 %v1841_v38 }
  0x39   : > { %958 = vmatprep.subr.bf16.mxu1 %v1844_v39  ;;  %947 = vmatprep.mubr.bf16.mxu0 %v2007_v2 }
  0x3a   : > { %988 = vmatprep.mubr.bf16.mxu1 %v2007_v2  ;;  %v1881_v2 = vld [vmem:[%s2468_s3 + $0x78] sm:$0xff]   ;;  %1379 = vperm.xlu0 %1784, %v1376_v34  }
  0x3b   : > { %918 = vmatpush1.bf16.msra.mxu0 %v1839_v40 }
  0x3c   : > { %959 = vmatpush1.bf16.msra.mxu1 %v1842_v41  ;;  %919 = vmatprep.subr.bf16.mxu0 %v1847_v42 }
  0x3d   : > { %960 = vmatprep.subr.bf16.mxu1 %v1850_v43 }
  0x3f   : > { %920 = vmatpush1.bf16.msra.mxu0 %v1845_v44 }
  0x40   : > { %961 = vmatpush1.bf16.msra.mxu1 %v1848_v45  ;;  %921 = vmatprep.subr.bf16.mxu0 %v1853_v46 }
  0x41   : > { %962 = vmatprep.subr.bf16.mxu1 %v1856_v47 }
  0x43   : > { %922 = vmatpush1.bf16.msra.mxu0 %v1851_v48 }
  0x44   : > { %963 = vmatpush1.bf16.msra.mxu1 %v1854_v49  ;;  %923 = vmatprep.subr.bf16.mxu0 %v1859_v50 }
  0x45   : > { %964 = vmatprep.subr.bf16.mxu1 %v1862_v51 }
  0x47   : > { %924 = vmatpush1.bf16.msra.mxu0 %v1857_v52 }
  0x48   : > { %965 = vmatpush1.bf16.msra.mxu1 %v1860_v53  ;;  %925 = vmatprep.subr.bf16.mxu0 %v1865_v54 }
  0x49   : > { %966 = vmatprep.subr.bf16.mxu1 %v1868_v55 }
  0x4b   : > { %926 = vmatpush1.bf16.msra.mxu0 %v1863_v56 }
  0x4c   : > { %967 = vmatpush1.bf16.msra.mxu1 %v1866_v57  ;;  %927 = vmatprep.subr.bf16.mxu0 %v1871_v58 }
  0x4d   : > { %968 = vmatprep.subr.bf16.mxu1 %v1874_v59 }
  0x4f   : > { %928 = vmatpush1.bf16.msra.mxu0 %v1869_v60 }
  0x50   : > { %969 = vmatpush1.bf16.msra.mxu1 %v1872_v61  ;;  %929 = vmatprep.subr.bf16.mxu0 %v1877_v62 }
  0x51   : > { %970 = vmatprep.subr.bf16.mxu1 %v1880_v63 }
  0x53   : > { %930 = vmatpush1.bf16.msra.mxu0 %v1875_v0 }
  0x54   : > { %971 = vmatpush1.bf16.msra.mxu1 %v1878_v1  ;;  %1684 = vmatprep.subr.bf16.mxu0 %v1881_v2 }
  0x55   : > { %1706 = vmatprep.subr.bf16.mxu1 %v1882_v3 }
  0x56   : > { %948 = vmatmul.mubr.bf16.vlgmr.msra.gmra.mxu0 %v2219_v35 }
  0x57   : > { %989 = vmatmul.mubr.bf16.vlgmr.msra.gmra.mxu1 %v2219_v35  ;;  %1685 = vmatpush3.bf16.msra.mxu0 %v1883_v4 }
  0x58   : > { %1707 = vmatpush3.bf16.msra.mxu1 %v1884_v5  ;;  %1686 = vmatprep.subr.bf16.mxu0 %v1885_v6 }
  0x59   : > { %1708 = vmatprep.subr.bf16.mxu1 %v1886_v7 }
  0x5b   : > { %1687 = vmatpush3.bf16.msra.mxu0 %v1887_v8 }
  0x5c   : > { %1709 = vmatpush3.bf16.msra.mxu1 %v1888_v9  ;;  %1688 = vmatprep.subr.bf16.mxu0 %v1889_v10 }
  0x5d   : > { %1710 = vmatprep.subr.bf16.mxu1 %v1890_v11 }
  0x5f   : > { %1689 = vmatpush3.bf16.msra.mxu0 %v1891_v12 }
  0x60   : > { %1711 = vmatpush3.bf16.msra.mxu1 %v1892_v13  ;;  %1690 = vmatprep.subr.bf16.mxu0 %v1893_v14 }
  0x61   : > { %1712 = vmatprep.subr.bf16.mxu1 %v1894_v15  ;;  %v1385_v15 = vlaneseq }
  0x63   : > { %1691 = vmatpush3.bf16.msra.mxu0 %v1895_v16  ;;  %v1386_v16 = vshrl.u32 %v1385_v15, 7 }
  0x64   : > { %1713 = vmatpush3.bf16.msra.mxu1 %v1896_v17  ;;  %1692 = vmatprep.subr.bf16.mxu0 %v1897_v18  ;;  %v1383_v17 = vld [vmem:[%s427_s8] sm:$0x1]  ;;  %s1396_s8 = scalar_lea.sflag [#allocation4], %s397_s18 }
  0x65   : > { %1714 = vmatprep.subr.bf16.mxu1 %v1898_v19 }
  0x67   : > { %1693 = vmatpush3.bf16.msra.mxu0 %v1899_v20 }
  0x68   : > { %1715 = vmatpush3.bf16.msra.mxu1 %v1900_v21  ;;  %1694 = vmatprep.subr.bf16.mxu0 %v1901_v22  ;;  %v1387_v21 = vsub.s32 0, %v1386_v16  ;;  %v1384_v22 = vunpack.c.l.bf16 %v1383_v17 }
  0x69   : > { %1716 = vmatprep.subr.bf16.mxu1 %v1902_v23 }
  0x6b   : > { %1695 = vmatpush3.bf16.msra.mxu0 %v1903_v24 }
  0x6c   : > { %1717 = vmatpush3.bf16.msra.mxu1 %v1904_v25  ;;  %1696 = vmatprep.subr.bf16.mxu0 %v1905_v26 }
  0x6d   : > { %1718 = vmatprep.subr.bf16.mxu1 %v1906_v27  ;;  %v1390_v27 = vld [vmem:[%s441_s17] sm:$0xf] }
  0x6e   : > { %v1391_v34 = vunpack.c.l.bf16 %v1390_v27 }
  0x6f   : > { %1697 = vmatpush3.bf16.msra.mxu0 %v1907_v28 }
  0x70   : > { %1719 = vmatpush3.bf16.msra.mxu1 %v1908_v29  ;;  %1698 = vmatprep.subr.bf16.mxu0 %v1909_v30 }
  0x71   : > { %1720 = vmatprep.subr.bf16.mxu1 %v1910_v31  ;;  %v1388_v31 = vrot.slane %v1384_v22, %v1387_v21 }
  0x73   : > { %1699 = vmatpush3.bf16.msra.mxu0 %v1911_v32 }
  0x74   : > { %1721 = vmatpush3.bf16.msra.mxu1 %v1912_v33 }
  0xb5   : > { %v1380_v29 = vpop.permute.xlu0 %1379 }
  0xf6   : > { %v675_v35 = vpop.f32.mrf.mxu0 }
  0xf7   : > { %v716_v36 = vpop.f32.mrf.mxu1  ;;  %v1644_v37 = vmul.f32 -1.442695, %v675_v35 }
  0xf8   : > { %v1646_v38 = vmul.f32 -1.442695, %v716_v36  ;;  %v677_v39 = vpop.f32.mrf.mxu0 }
  0xf9   : > { %v718_v40 = vpop.f32.mrf.mxu1  ;;  %1913 = vpow2.f32 %v1644_v37  ;;  %v1645_v41 = vmul.f32 -1.442695, %v677_v39 }
  0xfa   : > { %v1647_v42 = vmul.f32 -1.442695, %v718_v40  ;;  %1915 = vpow2.f32 %v1646_v38  ;;  %v679_v43 = vpop.f32.mrf.mxu0 }
  0xfb   : > { %v720_v44 = vpop.f32.mrf.mxu1  ;;  %1917 = vpow2.f32 %v1645_v41 }
  0xfc   : > { %1919 = vpow2.f32 %v1647_v42  ;;  %v680_v45 = vpop.f32.mrf.mxu0 }
  0xfd   : > { %v721_v46 = vpop.f32.mrf.mxu1 }
 0x106   : > { %v1914_v47 = vpop.eup %1913 }
 0x107   : > { %v1916_v48 = vpop.eup %1915  ;;  %v1009_v49 = vadd.f32 1.0, %v1914_v47 }
 0x108   : > { %v1918_v50 = vpop.eup %1917  ;;  %v1011_v51 = vadd.f32 1.0, %v1916_v48 }
 0x109   : > { %v1920_v52 = vpop.eup %1919  ;;  %1921 = vrcp.f32 %v1009_v49  ;;  %v1010_v53 = vadd.f32 1.0, %v1918_v50 }
 0x10a   : > { %1923 = vrcp.f32 %v1011_v51  ;;  %v1012_v54 = vadd.f32 1.0, %v1920_v52 }
 0x10b   : > { %1925 = vrcp.f32 %v1010_v53 }
 0x10c   : > { %1927 = vrcp.f32 %v1012_v54 }
 0x116   : > { %v1922_v55 = vpop.eup %1921  ;;  %v949_v56 = vpop.f32.mrf.mxu0 }
 0x117   : > { %v990_v57 = vpop.f32.mrf.mxu1  ;;  %v1924_v58 = vpop.eup %1923  ;;  %v1021_v59 = vmul.f32 %v1922_v55, %v675_v35 }
 0x118   : > { %v1926_v60 = vpop.eup %1925  ;;  %v1023_v61 = vmul.f32 %v1924_v58, %v716_v36  ;;  %v951_v62 = vpop.f32.mrf.mxu0 }
 0x119   : > { %v992_v63 = vpop.f32.mrf.mxu1  ;;  %v1928_v0 = vpop.eup %1927  ;;  %v1022_v1 = vmul.f32 %v1926_v60, %v677_v39  ;;  %v1025_v3 = vmul.f32 %v1021_v59, %v949_v56 }
 0x11a   : > { %v1024_v2 = vmul.f32 %v1928_v0, %v718_v40  ;;  %v953_v4 = vpop.f32.mrf.mxu0  ;;  %v1027_v6 = vmul.f32 %v1023_v61, %v990_v57 }
 0x11b   : > { %v994_v5 = vpop.f32.mrf.mxu1  ;;  %v1026_v7 = vmul.f32 %v1022_v1, %v951_v62  ;;  %v1030_v12 = vpack.c.bf16 %v1025_v3, %v1025_v3 }
 0x11c   : > { %v1028_v8 = vmul.f32 %v1024_v2, %v992_v63  ;;  %v954_v9 = vpop.f32.mrf.mxu0  ;;  %v1032_v14 = vpack.c.bf16 %v1027_v6, %v1027_v6 }
 0x11d   : > { %v995_v10 = vpop.f32.mrf.mxu1  ;;  %v1031_v11 = vpack.c.bf16 %v1026_v7, %v1026_v7 }
 0x11e   : > { %v1033_v13 = vpack.c.bf16 %v1028_v8, %v1028_v8 }
 0x11f   : > { %1322 = vmatprep.mubr.bf16.mxu0 %v1031_v11 }
 0x120   : > { %1362 = vmatprep.mubr.bf16.mxu1 %v1033_v13  ;;  %1323 = vmatmul.mubr.bf16.vlgmr.msra.gmra.mxu0 %v1030_v12 }
 0x121   : > { %1363 = vmatmul.mubr.bf16.vlgmr.msra.gmra.mxu1 %v1032_v14 }
 0x1e0   : > { %v1700_v18 = vpop.f32.mrf.mxu0 }
 0x1e1   : > { %v1722_v19 = vpop.f32.mrf.mxu1 }
 0x1e2   : > { %v1701_v20 = vpop.f32.mrf.mxu0 }
 0x1e3   : > { %v1702_v23 = vadd.f32 %v1701_v20, %v1700_v18  ;;  %v1723_v24 = vpop.f32.mrf.mxu1 }
 0x1e4   : > { %v1724_v25 = vadd.f32 %v1723_v24, %v1722_v19  ;;  %v1703_v26 = vpop.f32.mrf.mxu0 }
 0x1e5   : > { %v1725_v28 = vpop.f32.mrf.mxu1 }
 0x1e6   : > { %v1365_v30 = vadd.f32 %v1724_v25, %v1702_v23  ;;  %v1704_v32 = vpop.f32.mrf.mxu0 }
 0x1e7   : > { %v1726_v33 = vpop.f32.mrf.mxu1 }
 0x1e8   : > { %v1382_v35 = vmul.f32 %v1380_v29, %v1365_v30 }
 0x1ea   : > { %v1389_v36 = vmul.f32 %v1388_v31, %v1382_v35 }
 0x1ec   : > { %v1392_v37 = vadd.f32 %v1391_v34, %v1389_v36 }
 0x1ee   : > { %v1393_v38 = vpack.c.bf16 %v1392_v37, %v1392_v37 }
 0x1f0   : > { %1394 = vst [vmem:[%s399_s20] sm:$0xf] %v1393_v38 }
 0x1f1   : > { %1942 = shalt.err (!%p1939_p5)
}
 0x1f2   : > { %s1943_s17 = scalar_lea.hbm %s1408_s23, 64  ;;  %s1947_s15 = scalar_lea.hbm %s2472_s7, 128 }
 0x1f3   : > { %p1944_p6 = scmp.ne.s32.totalorder %s1408_s23, %s1943_s17  ;;  %p1948_p10 = scmp.lt.s32.totalorder %s1408_s23, %s2472_s7 }
 0x1f4   : > { %p1949_p11 = scmp.lt.s32.totalorder %s1947_s15, %s1943_s17 }
 0x1f5   : > { %p1945_p7 = pnand %p1944_p6, %p2089_p4 }
 0x1f6   : > { %p1950_p12 = por %p1949_p11, %p1948_p10 }
 0x1f7   : > { %p1946_p9 = pneg %p1945_p7 }
 0x1f9   : > { %p1951_p13 = pnand %p1950_p12, %p1946_p9 }
 0x1fb   : > { %1954 = shalt.err (!%p1951_p13)
}
 0x1fc   : > { %1728 = dma.vmem_to_hbm [thread:$0]  (%p2089_p4), %s1411_s21, 64, %s1408_s23, %s1396_s8  }
 0x1fd PF: > { %p1734_p0 = scmp.ge.s32.totalorder %s2005_s29, 2  ;;  %s1422_s22 = sand.u32 1, %s1985_s24  }
 0x1fe   : > { %s1423_s10 = scalar_lea.sflag [#allocation4], %s1422_s22 }
 0x1ff   : > { %p1731_p1 = pnand %p1734_p0, %p2096_p8 }
 0x201   : > { %p1732_p2 = pneg %p1731_p1 }
 0x203   : > { %1980 = dma.done.wait (%p1732_p2), %s1423_s10, 64  }
 0x204   : > { %1982 = vsyncadd (%p1732_p2), %s1423_s10, 4294967232  ;;  %s20_s29 = sadd.s32 1, %s2005_s29   ;;  %s2477_s24 = smov %s1989_s25 }
 0x205   : > { %p17_p3 = scmp.ge.s32.totalorder %s20_s29, 4   ;;  %s2478_s25 = smov %s1993_s26 }
 0x206   : > { %s2479_s26 = smov %s2102_s14  ;;  %s2480_s27 = smov %s2001_s28 }
 0x207   : > { %s2481_s28 = smov %s2483_s9  ;;  %19 = sbr.rel (!%p17_p3) target bundleno = 4 (0x4), region = 109 }
 0x20c   :  { %1428 = vsyncpa [#allocation4], 1 }
 0x20d   :  { %1430 = vsyncpa [#allocation4 + $0x1], 1 }

// kernel: hidream_block_forward.38
= control target key start
LH: loop header
LB: loop body
LE: loop exit
PB: predicated region body
PF: predicated region fallthrough
CT: control target
= control target key end

     0   :  { %12 = vsyncpa [#allocation4], 0  ;;  %s1853_s0 = inlined_call_operand.vmem [shape: bf16[2,16,128], index: 0, kind: input, shape index: {}]   ;;  %s1854_s1 = inlined_call_operand.vmem [shape: bf16[128,256], index: 1, kind: input, shape index: {}]   ;;  %s1855_s2 = inlined_call_operand.vmem [shape: bf16[128,256], index: 2, kind: input, shape index: {}]   ;;  %s1856_s3 = inlined_call_operand.vmem [shape: bf16[256,128], index: 3, kind: input, shape index: {}]   ;;  %s1857_s4 = inlined_call_operand.vmem [shape: bf16[2,1,128], index: 4, kind: input, shape index: {}]   ;;  %s1858_s5 = inlined_call_operand.vmem [shape: f32[2,16,1], index: 5, kind: input, shape index: {}]   ;;  %s1859_s6 = inlined_call_operand.vmem [shape: bf16[2,16,128], index: 6, kind: input, shape index: {}]   ;;  %s1860_s7 = inlined_call_operand.hbm [shape: bf16[2,16,128], index: 7, kind: output, shape index: {}]  }
   0x1   :  { %14 = vsyncpa [#allocation4 + $0x1], 0  ;;  %s1574_s24 = smov 0   ;;  %s1576_s25 = smov 0  }
   0x2   :  { %s1578_s26 = smov 0   ;;  %s1580_s27 = smov 0  }
   0x3   :  { %s1582_s28 = smov 0   ;;  %s1584_s29 = smov 0  }
   0x4 LB: > { %s1200_s30 = sadd.s32 4294967295, %s1528_s29   ;;  %s1201_s8 = sadd.s32 4294967294, %s1528_s29   ;;  %s1528_s29 = sphi %s1584_s29, %s20_s29   ;;  %s1524_s28 = sphi %s1582_s28, %s1867_s28   ;;  %s1520_s27 = sphi %s1580_s27, %s1866_s27   ;;  %s1516_s26 = sphi %s1578_s26, %s1865_s26   ;;  %s1512_s25 = sphi %s1576_s25, %s1864_s25   ;;  %s1508_s24 = sphi %s1574_s24, %s1863_s24  }
   0x5   : > { %s39_s9 = sadd.s32 1, %s1524_s28  ;;  %s236_s10 = sadd.s32 1, %s1516_s26 }
   0x6   : > { %p41_p0 = scmp.ge.s32.totalorder %s39_s9, 2  ;;  %p246_p1 = scmp.ne.s32.totalorder %s1516_s26, %s1512_s25 }
   0x7   : > { %p247_p2 = scmp.eq.s32.totalorder %s1200_s30, 1  ;;  %p252_p3 = scmp.ne.s32.totalorder %s1512_s25, %s1508_s24 }
   0x8   : > { %s1869_s9 = smov (%p41_p0, %s39_s9), 0  ;;  %p253_p5 = scmp.eq.s32.totalorder %s1201_s8, 1 }
   0x9   : > { %p1614_p4 = por %p247_p2, %p246_p1  ;;  %s231_s12 = ssub.s32 %s1524_s28, %s1869_s9 }
   0xa   : > { %p1207_p6 = scmp.ge.s32.totalorder %s1528_s29, 1  ;;  %p234_p7 = scmp.eq.s32.totalorder %s231_s12, 0 }
   0xb   : > { %p1621_p8 = por %p253_p5, %p252_p3  ;;  %p343_p9 = scmp.lt.s32.totalorder %s1528_s29, 3 }
   0xc   : > { %s1627_s14 = scalar_select %p234_p7, %s1516_s26, %s236_s10  }
   0xd   : > { %p344_p10 = pnand %p1207_p6, %p343_p9 }
   0xe   : > { %p416_p11 = scmp.lt.s32.totalorder (!%p344_p10), %s1520_s27, 1  ;;  %s412_s10 = sand.u32 (!%p344_p10), 1, %s1512_s25  }
   0xf   : > { %347 = sbr.rel (%p344_p10) target bundleno = 515 (0x203), region = 48  ;;  %s1808_s23 = scalar_lea.sflag (!%p344_p10), [#allocation4], %s412_s10 }
  0x14   : > { %v1371_v0 = vld [vmem:[%s1854_s1 + $0x74] ss:$8 sps:$4 sm:$0xff]   ;;  %v1373_v1 = vld [vmem:[%s1854_s1 + $0x70] ss:$8 sps:$4 sm:$0xff]   ;;  %v1530_v2 = vmov 0   ;;  %s1646_s8 = scalar_select %p416_p11, %s1520_s27, 1 }
  0x15   : > { %610 = vmatprep.mubr.bf16.mxu0 %v1530_v2  ;;  %749 = vmatprep.mubr.bf16.mxu1 %v1530_v2  ;;  %v1374_v3 = vld [vmem:[%s1854_s1 + $0x64] ss:$8 sps:$4 sm:$0xff]   ;;  %v1376_v4 = vld [vmem:[%s1854_s1 + $0x60] ss:$8 sps:$4 sm:$0xff]   ;;  %v1377_v5 = vld [vmem:[%s1854_s1 + $0x54] ss:$8 sps:$4 sm:$0xff]  }
  0x16   : > { %578 = vmatprep.subr.bf16.mxu0 %v1371_v0  ;;  %1370 = vset.pattern.permute.xlu0 %v1530_v2  ;;  %v1379_v6 = vld [vmem:[%s1854_s1 + $0x50] ss:$8 sps:$4 sm:$0xff]   ;;  %v1380_v7 = vld [vmem:[%s1854_s1 + $0x44] ss:$8 sps:$4 sm:$0xff]   ;;  %s1275_s17 = sshll.u32 %s1646_s8, 3  ;;  %s1276_s18 = sshll.u32 %s1646_s8, 4 }
  0x17   : > { %579 = vmatpush1.bf16.msra.mxu0 %v1373_v1  ;;  %v1382_v8 = vld [vmem:[%s1854_s1 + $0x40] ss:$8 sps:$4 sm:$0xff]   ;;  %v1394_v9 = vld [vmem:[%s1855_s2 + $0x74] ss:$8 sps:$4 sm:$0xff]   ;;  %v1397_v10 = vld [vmem:[%s1855_s2 + $0x70] ss:$8 sps:$4 sm:$0xff]   ;;  %s1669_s12 = scalar_lea.vmem %s1853_s0, %s1275_s17  ;;  %s454_s21 = scalar_lea.vmem %s1858_s5, %s1276_s18 }
  0x18   : > { %580 = vmatprep.subr.bf16.mxu0 %v1374_v3  ;;  %v1383_v11 = vld [vmem:[%s1854_s1 + $0x34] ss:$8 sps:$4 sm:$0xff]   ;;  %717 = vmatprep.subr.bf16.mxu1 %v1394_v9  ;;  %v1399_v12 = vld [vmem:[%s1855_s2 + $0x64] ss:$8 sps:$4 sm:$0xff]   ;;  %v1401_v13 = vld [vmem:[%s1855_s2 + $0x60] ss:$8 sps:$4 sm:$0xff]   ;;  %s445_s30 = scalar_lea.vmem %s1857_s4, %s1646_s8  ;;  %s464_s16 = scalar_lea.vmem %s1859_s6, %s1275_s17 }
  0x19   : > { %718 = vmatpush1.bf16.msra.mxu1 %v1397_v10  ;;  %v1385_v14 = vld [vmem:[%s1854_s1 + $0x30] ss:$8 sps:$4 sm:$0xff]   ;;  %v1402_v15 = vld [vmem:[%s1855_s2 + $0x54] ss:$8 sps:$4 sm:$0xff]   ;;  %v1386_v16 = vld [vmem:[%s1854_s1 + $0x24] ss:$8 sps:$4 sm:$0xff]  }
  0x1a   : > { %719 = vmatprep.subr.bf16.mxu1 %v1399_v12  ;;  %v1404_v17 = vld [vmem:[%s1855_s2 + $0x50] ss:$8 sps:$4 sm:$0xff]   ;;  %v1388_v18 = vld [vmem:[%s1854_s1 + $0x20] ss:$8 sps:$4 sm:$0xff]   ;;  %v1405_v19 = vld [vmem:[%s1855_s2 + $0x44] ss:$8 sps:$4 sm:$0xff]  }
  0x1b   : > { %581 = vmatpush1.bf16.msra.mxu0 %v1376_v4  ;;  %v1389_v20 = vld [vmem:[%s1854_s1 + $0x14] ss:$8 sps:$4 sm:$0xff]   ;;  %v1391_v21 = vld [vmem:[%s1854_s1 + $0x10] ss:$8 sps:$4 sm:$0xff]   ;;  %v1392_v22 = vld [vmem:[%s1854_s1 + $0x4] ss:$8 sps:$4 sm:$0xff]  }
  0x1c   : > { %582 = vmatprep.subr.bf16.mxu0 %v1377_v5  ;;  %v1407_v23 = vld [vmem:[%s1855_s2 + $0x40] ss:$8 sps:$4 sm:$0xff]   ;;  %v1408_v24 = vld [vmem:[%s1855_s2 + $0x34] ss:$8 sps:$4 sm:$0xff]   ;;  %v1410_v25 = vld [vmem:[%s1855_s2 + $0x30] ss:$8 sps:$4 sm:$0xff]  }
  0x1d   : > { %720 = vmatpush1.bf16.msra.mxu1 %v1401_v13  ;;  %v1396_v26 = vld [vmem:[%s1854_s1] ss:$8 sps:$4 sm:$0xff]   ;;  %v1411_v27 = vld [vmem:[%s1855_s2 + $0x24] ss:$8 sps:$4 sm:$0xff]   ;;  %v1414_v30 = vld [vmem:[%s1855_s2 + $0x14] ss:$8 sps:$4 sm:$0xff]  }
  0x1e   : > { %721 = vmatprep.subr.bf16.mxu1 %v1402_v15  ;;  %v1398_v28 = vld [vmem:[%s1669_s12] sm:$0xff]   ;;  %v1416_v31 = vld [vmem:[%s1855_s2 + $0x10] ss:$8 sps:$4 sm:$0xff]   ;;  %v1424_v38 = vld [vmem:[%s1856_s3 + $0x68] sm:$0xff]   ;;  %s1208_s18 = sshll.u32 %s412_s10, 3  ;;  %s1280_s8 = sshll.u32 %s1520_s27, 7 }
  0x1f   : > { %583 = vmatpush1.bf16.msra.mxu0 %v1379_v6  ;;  %v1413_v29 = vld [vmem:[%s1855_s2 + $0x20] ss:$8 sps:$4 sm:$0xff]   ;;  %v1417_v32 = vld [vmem:[%s1855_s2 + $0x4] ss:$8 sps:$4 sm:$0xff]   ;;  %v1420_v34 = vld [vmem:[%s1856_s3 + $0x78] sm:$0xff]   ;;  %s414_s19 = scalar_lea.vmem [#allocation3], %s1208_s18  ;;  %s1804_s22 = scalar_lea.hbm %s1860_s7, %s1280_s8 }
  0x20   : > { %584 = vmatprep.subr.bf16.mxu0 %v1380_v7  ;;  %v1419_v33 = vld [vmem:[%s1855_s2] ss:$8 sps:$4 sm:$0xff]   ;;  %v1421_v35 = vld [vmem:[%s1856_s3 + $0x38] sm:$0xff]   ;;  %v1422_v36 = vld [vmem:[%s1856_s3 + $0x70] sm:$0xff]   ;;  %s1028_s20 = sshll.u32 %s414_s19, 4  ;;  %s1531_s27 = smov [#allocation3]   ;;  %s1806_s20 = int_to_ptr.vmem [resolvable:$true] %s1028_s20 }
  0x21   : > { %722 = vmatpush1.bf16.msra.mxu1 %v1404_v17  ;;  %v1423_v37 = vld [vmem:[%s1856_s3 + $0x30] sm:$0xff]   ;;  %v1425_v39 = vld [vmem:[%s1856_s3 + $0x28] sm:$0xff]   ;;  %v1426_v40 = vld [vmem:[%s1856_s3 + $0x60] sm:$0xff]   ;;  %s1456_s15 = sshll.u32 %s1531_s27, 4  ;;  %s1457_s15 = int_to_ptr.vmem [resolvable:$false] %s1456_s15 }
  0x22   : > { %723 = vmatprep.subr.bf16.mxu1 %v1405_v19  ;;  %v1427_v41 = vld [vmem:[%s1856_s3 + $0x20] sm:$0xff]   ;;  %v1428_v42 = vld [vmem:[%s1856_s3 + $0x58] sm:$0xff]   ;;  %v1430_v44 = vld [vmem:[%s1856_s3 + $0x50] sm:$0xff]   ;;  %s1458_s12 = scalar_lea.vmem %s1457_s15, 256  ;;  %p1459_p1 = scmp.lt.s32.totalorder %s1806_s20, %s1457_s15 }
  0x23   : > { %585 = vmatpush1.bf16.msra.mxu0 %v1382_v8  ;;  %v1429_v43 = vld [vmem:[%s1856_s3 + $0x18] sm:$0xff]   ;;  %v1431_v45 = vld [vmem:[%s1856_s3 + $0x10] sm:$0xff]   ;;  %v1432_v46 = vld [vmem:[%s1856_s3 + $0x48] sm:$0xff]  }
  0x24   : > { %586 = vmatprep.subr.bf16.mxu0 %v1383_v11  ;;  %v1433_v47 = vld [vmem:[%s1856_s3 + $0x8] sm:$0xff]   ;;  %v1434_v48 = vld [vmem:[%s1856_s3 + $0x40] sm:$0xff]  }
  0x25   : > { %724 = vmatpush1.bf16.msra.mxu1 %v1407_v23  ;;  %v1435_v49 = vld [vmem:[%s1856_s3] sm:$0xff]   ;;  %v975_v51 = vld [vmem:[%s454_s21 + $0x8] sm:$0xff] }
  0x26   : > { %725 = vmatprep.subr.bf16.mxu1 %v1408_v24  ;;  %v974_v50 = vld [vmem:[%s454_s21] sm:$0xff] }
  0x27   : > { %587 = vmatpush1.bf16.msra.mxu0 %v1385_v14  ;;  %978 = vperm.xlu0 %1370, %v974_v50   ;;  %v988_v24 = vld [vmem:[%s445_s30] sm:$0x1]  ;;  %s1452_s30 = scalar_lea.vmem %s1806_s20, 128 }
  0x28   : > { %588 = vmatprep.subr.bf16.mxu0 %v1386_v16  ;;  %p1453_p12 = scmp.ne.s32.totalorder %s1806_s20, %s1452_s30  ;;  %p1460_p2 = scmp.lt.s32.totalorder %s1458_s12, %s1452_s30 }
  0x29   : > { %726 = vmatpush1.bf16.msra.mxu1 %v1410_v25 }
  0x2a   : > { %727 = vmatprep.subr.bf16.mxu1 %v1411_v27  ;;  %p1454_p13 = pnand %p1453_p12, %p1614_p4  ;;  %p1461_p3 = por %p1460_p2, %p1459_p1 }
  0x2b   : > { %589 = vmatpush1.bf16.msra.mxu0 %v1388_v18  ;;  %983 = vperm.xlu0 %1370, %v975_v51  }
  0x2c   : > { %590 = vmatprep.subr.bf16.mxu0 %v1389_v20  ;;  %p1455_p0 = pneg %p1454_p13 }
  0x2d   : > { %728 = vmatpush1.bf16.msra.mxu1 %v1413_v29 }
  0x2e   : > { %729 = vmatprep.subr.bf16.mxu1 %v1414_v30  ;;  %p1462_p5 = pnand %p1461_p3, %p1455_p0 }
  0x2f   : > { %591 = vmatpush1.bf16.msra.mxu0 %v1391_v21 }
  0x30   : > { %592 = vmatprep.subr.bf16.mxu0 %v1392_v22  ;;  %v990_v22 = vlaneseq }
  0x31   : > { %730 = vmatpush1.bf16.msra.mxu1 %v1416_v31 }
  0x32   : > { %731 = vmatprep.subr.bf16.mxu1 %v1417_v32  ;;  %v991_v23 = vshrl.u32 %v990_v22, 7 }
  0x33   : > { %593 = vmatpush1.bf16.msra.mxu0 %v1396_v26  ;;  %v989_v26 = vunpack.c.l.bf16 %v988_v24 }
  0x34   : > { %1290 = vmatprep.subr.bf16.mxu0 %v1420_v34  ;;  %v992_v27 = vsub.s32 0, %v991_v23  ;;  %v1282_v34 = vld [vmem:[%s464_s16] sm:$0xff]  }
  0x35   : > { %732 = vmatpush1.bf16.msra.mxu1 %v1419_v33 }
  0x36   : > { %611 = vmatmul.mubr.bf16.vlgmr.msra.gmra.mxu0 %v1398_v28  ;;  %v993_v33 = vrot.slane %v989_v26, %v992_v27 }
  0x37   : > { %1291 = vmatpush3.bf16.msra.mxu0 %v1421_v35 }
  0x38   : > { %750 = vmatmul.mubr.bf16.vlgmr.msra.gmra.mxu1 %v1398_v28  ;;  %1292 = vmatprep.subr.bf16.mxu0 %v1422_v36 }
  0x3b   : > { %1293 = vmatpush3.bf16.msra.mxu0 %v1423_v37 }
  0x3c   : > { %1294 = vmatprep.subr.bf16.mxu0 %v1424_v38 }
  0x3f   : > { %1295 = vmatpush3.bf16.msra.mxu0 %v1425_v39  ;;  %v1283_v39 = vunpack.c.l.bf16 %v1282_v34 }
  0x40   : > { %1296 = vmatprep.subr.bf16.mxu0 %v1426_v40 }
  0x43   : > { %1297 = vmatpush3.bf16.msra.mxu0 %v1427_v41  ;;  %v1284_v41 = vunpack.c.h.bf16 %v1282_v34 }
  0x44   : > { %1298 = vmatprep.subr.bf16.mxu0 %v1428_v42 }
  0x47   : > { %1299 = vmatpush3.bf16.msra.mxu0 %v1429_v43 }
  0x48   : > { %1300 = vmatprep.subr.bf16.mxu0 %v1430_v44 }
  0x4b   : > { %1301 = vmatpush3.bf16.msra.mxu0 %v1431_v45 }
  0x4c   : > { %1302 = vmatprep.subr.bf16.mxu0 %v1432_v46 }
  0x4f   : > { %1303 = vmatpush3.bf16.msra.mxu0 %v1433_v47 }
  0x50   : > { %1304 = vmatprep.subr.bf16.mxu0 %v1434_v48 }
  0x53   : > { %1305 = vmatpush3.bf16.msra.mxu0 %v1435_v49 }
  0xa2   : > { %v979_v28 = vpop.permute.xlu0 %978 }
  0xa6   : > { %v984_v37 = vpop.permute.xlu0 %983 }
  0xf6   : > { %v612_v52 = vpop.f32.mrf.mxu0 }
  0xf7   : > { %v1248_v53 = vmul.f32 -1.442695, %v612_v52 }
  0xf8   : > { %v614_v54 = vpop.f32.mrf.mxu0  ;;  %v751_v4 = vpop.f32.mrf.mxu1 }
  0xf9   : > { %1436 = vpow2.f32 %v1248_v53  ;;  %v1249_v55 = vmul.f32 -1.442695, %v614_v54 }
  0xfa   : > { %v616_v56 = vpop.f32.mrf.mxu0  ;;  %v753_v5 = vpop.f32.mrf.mxu1 }
  0xfb   : > { %1438 = vpow2.f32 %v1249_v55  ;;  %v1250_v57 = vmul.f32 -1.442695, %v616_v56 }
  0xfc   : > { %v618_v58 = vpop.f32.mrf.mxu0  ;;  %v755_v9 = vpop.f32.mrf.mxu1 }
  0xfd   : > { %1440 = vpow2.f32 %v1250_v57  ;;  %v1251_v59 = vmul.f32 -1.442695, %v618_v58 }
  0xfe   : > { %v757_v16 = vpop.f32.mrf.mxu1 }
  0xff   : > { %1442 = vpow2.f32 %v1251_v59 }
 0x106   : > { %v1437_v60 = vpop.eup %1436 }
 0x107   : > { %v772_v62 = vadd.f32 1.0, %v1437_v60 }
 0x108   : > { %v1439_v61 = vpop.eup %1438 }
 0x109   : > { %v773_v63 = vadd.f32 1.0, %v1439_v61 }
 0x10a   : > { %v1441_v0 = vpop.eup %1440 }
 0x10b   : > { %1444 = vrcp.f32 %v773_v63  ;;  %v774_v1 = vadd.f32 1.0, %v1441_v0 }
 0x10c   : > { %v1443_v2 = vpop.eup %1442  ;;  %1446 = vrcp.f32 %v772_v62 }
 0x10d   : > { %1448 = vrcp.f32 %v774_v1  ;;  %v775_v3 = vadd.f32 1.0, %v1443_v2 }
 0x10f   : > { %1450 = vrcp.f32 %v775_v3 }
 0x118   : > { %v1445_v6 = vpop.eup %1444 }
 0x119   : > { %v1447_v7 = vpop.eup %1446  ;;  %v785_v10 = vmul.f32 %v1445_v6, %v614_v54 }
 0x11a   : > { %v1449_v8 = vpop.eup %1448  ;;  %v784_v13 = vmul.f32 %v1447_v7, %v612_v52 }
 0x11b   : > { %v786_v11 = vmul.f32 %v1449_v8, %v616_v56  ;;  %v789_v17 = vmul.f32 %v785_v10, %v753_v5 }
 0x11c   : > { %v1451_v12 = vpop.eup %1450  ;;  %v788_v19 = vmul.f32 %v784_v13, %v751_v4 }
 0x11d   : > { %v787_v14 = vmul.f32 %v1451_v12, %v618_v58  ;;  %v790_v15 = vmul.f32 %v786_v11, %v755_v9 }
 0x11f   : > { %v791_v18 = vmul.f32 %v787_v14, %v757_v16  ;;  %v794_v21 = vpack.c.bf16 %v790_v15, %v788_v19 }
 0x121   : > { %v795_v20 = vpack.c.bf16 %v791_v18, %v789_v17 }
 0x123   : > { %956 = vmatprep.mubr.bf16.mxu0 %v795_v20 }
 0x124   : > { %957 = vmatmul.mubr.bf16.vlgmr.msra.gmra.mxu0 %v794_v21 }
 0x1e4   : > { %v1306_v25 = vpop.f32.mrf.mxu0 }
 0x1e6   : > { %v1307_v29 = vpop.f32.mrf.mxu0 }
 0x1e7   : > { %v1308_v30 = vadd.f32 %v1307_v29, %v1306_v25 }
 0x1e8   : > { %v1309_v31 = vpop.f32.mrf.mxu0 }
 0x1e9   : > { %v986_v32 = vmul.f32 %v1308_v30, %v979_v28 }
 0x1ea   : > { %v1310_v35 = vpop.f32.mrf.mxu0 }
 0x1eb   : > { %v1311_v36 = vadd.f32 %v1310_v35, %v1309_v31  ;;  %v994_v38 = vmul.f32 %v993_v33, %v986_v32 }
 0x1ed   : > { %v987_v40 = vmul.f32 %v1311_v36, %v984_v37  ;;  %v1000_v43 = vadd.f32 %v1283_v39, %v994_v38 }
 0x1ef   : > { %v995_v42 = vmul.f32 %v993_v33, %v987_v40 }
 0x1f1   : > { %v1001_v44 = vadd.f32 %v1284_v41, %v995_v42 }
 0x1f3   : > { %v1288_v45 = vpack.c.bf16 %v1001_v44, %v1000_v43 }
 0x1f5   : > { %1289 = vst [vmem:[%s414_s19] sm:$0xff] %v1288_v45  }
 0x1f6   : > { %1465 = shalt.err (!%p1462_p5)
}
 0x1f7   : > { %s1466_s10 = scalar_lea.hbm %s1804_s22, 128  ;;  %s1470_s8 = scalar_lea.hbm %s1860_s7, 256 }
 0x1f8   : > { %p1467_p6 = scmp.ne.s32.totalorder %s1804_s22, %s1466_s10  ;;  %p1471_p10 = scmp.lt.s32.totalorder %s1804_s22, %s1860_s7 }
 0x1f9   : > { %p1472_p11 = scmp.lt.s32.totalorder %s1470_s8, %s1466_s10 }
 0x1fa   : > { %p1468_p7 = pnand %p1467_p6, %p1614_p4 }
 0x1fb   : > { %p1473_p12 = por %p1472_p11, %p1471_p10 }
 0x1fc   : > { %p1469_p9 = pneg %p1468_p7 }
 0x1fe   : > { %p1474_p13 = pnand %p1473_p12, %p1469_p9 }
 0x200   : > { %1477 = shalt.err (!%p1474_p13)
}
 0x201   : > { %s1532_s21 = smov 64   ;;  %s1533_s30 = smov 4  }
 0x202   : > { %1312 = dma.vmem_to_hbm [thread:$0]  (%p1614_p4), %s1806_s20, 128, %s1804_s22, %s1808_s23, %s1532_s21, %s1532_s21, %s1533_s30  }
 0x203 PF: > { %p1318_p0 = scmp.ge.s32.totalorder %s1528_s29, 2  ;;  %s1043_s27 = sand.u32 1, %s1508_s24  }
 0x204   : > { %s1044_s15 = scalar_lea.sflag [#allocation4], %s1043_s27 }
 0x205   : > { %p1315_p1 = pnand %p1318_p0, %p1621_p8 }
 0x207   : > { %p1316_p2 = pneg %p1315_p1 }
 0x209   : > { %1503 = dma.done.wait (%p1316_p2), %s1044_s15, 128  }
 0x20a   : > { %1505 = vsyncadd (%p1316_p2), %s1044_s15, 4294967168  ;;  %s20_s29 = sadd.s32 1, %s1528_s29   ;;  %s1863_s24 = smov %s1512_s25 }
 0x20b   : > { %p17_p3 = scmp.ge.s32.totalorder %s20_s29, 4   ;;  %s1864_s25 = smov %s1516_s26 }
 0x20c   : > { %s1865_s26 = smov %s1627_s14  ;;  %s1866_s27 = smov %s1524_s28 }
 0x20d   : > { %s1867_s28 = smov %s1869_s9  ;;  %19 = sbr.rel (!%p17_p3) target bundleno = 4 (0x4), region = 109 }
 0x212   :  { %1049 = vsyncpa [#allocation4], 1 }
 0x213   :  { %1051 = vsyncpa [#allocation4 + $0x1], 1 }

// kernel: hidream_block_forward.34
= control target key start
LH: loop header
LB: loop body
LE: loop exit
PB: predicated region body
PF: predicated region fallthrough
CT: control target
= control target key end

     0   :  { %s2119_s24 = smov 0   ;;  %s2121_s25 = smov 0   ;;  %s2482_s0 = inlined_call_operand.vmem [shape: bf16[2,16,128], index: 0, kind: input, shape index: {}]   ;;  %s2483_s1 = inlined_call_operand.vmem [shape: bf16[128,512], index: 1, kind: input, shape index: {}]   ;;  %s2484_s2 = inlined_call_operand.vmem [shape: bf16[128,512], index: 2, kind: input, shape index: {}]   ;;  %s2485_s3 = inlined_call_operand.vmem [shape: bf16[512,128], index: 3, kind: input, shape index: {}]   ;;  %s2486_s4 = inlined_call_operand.vmem [shape: bf16[2,1,128], index: 4, kind: input, shape index: {}]   ;;  %s2487_s5 = inlined_call_operand.vmem [shape: f32[2,16,1], index: 5, kind: input, shape index: {}]   ;;  %s2488_s6 = inlined_call_operand.vmem [shape: bf16[2,16,128], index: 6, kind: input, shape index: {}]   ;;  %s2489_s7 = inlined_call_operand.vmem [shape: bf16[2,16,128], index: 7, kind: output, shape index: {}]  }
   0x1   :  { %s2123_s26 = smov 0  }
   0x2 LB: > { %s36_s27 = sadd.s32 1, %s2072_s25  ;;  %p1690_p0 = scmp.ge.s32.totalorder %s2076_s26, 1  ;;  %s2076_s26 = sphi %s2123_s26, %s17_s26   ;;  %s2072_s25 = sphi %s2121_s25, %s2491_s25   ;;  %s2068_s24 = sphi %s2119_s24, %s2490_s24  }
   0x3   : > { %p38_p1 = scmp.ge.s32.totalorder %s36_s27, 2  ;;  %p340_p2 = scmp.lt.s32.totalorder %s2076_s26, 3 }
   0x5   : > { %s2493_s27 = smov (%p38_p1, %s36_s27), 0  ;;  %p341_p3 = pnand %p1690_p0, %p340_p2 }
   0x6   : > { %p417_p4 = scmp.lt.s32.totalorder (!%p341_p3), %s2068_s24, 1 }
   0x7   : > { %344 = sbr.rel (%p341_p3) target bundleno = 497 (0x1f1), region = 48 }
   0xc   : > { %v1893_v0 = vld [vmem:[%s2483_s1 + $0xe4] ss:$16 sps:$4 sm:$0xff]   ;;  %v1895_v1 = vld [vmem:[%s2483_s1 + $0xec] ss:$16 sps:$4 sm:$0xff]   ;;  %v2078_v2 = vmov 0   ;;  %s2495_s24 = smov (!%p417_p4, %s2068_s24), 1 }
   0xd   : > { %716 = vmatprep.mubr.bf16.mxu0 %v2078_v2  ;;  %759 = vmatprep.mubr.bf16.mxu1 %v2078_v2  ;;  %v1897_v3 = vld [vmem:[%s2483_s1 + $0xe0] ss:$16 sps:$4 sm:$0xff]   ;;  %v1898_v4 = vld [vmem:[%s2483_s1 + $0xe8] ss:$16 sps:$4 sm:$0xff]   ;;  %v1899_v5 = vld [vmem:[%s2483_s1 + $0xc4] ss:$16 sps:$4 sm:$0xff]   ;;  %s446_s30 = scalar_lea.vmem %s2486_s4, %s2495_s24 }
   0xe   : > { %684 = vmatprep.subr.bf16.mxu0 %v1893_v0  ;;  %1892 = vset.pattern.permute.xlu0 %v2078_v2  ;;  %v1901_v6 = vld [vmem:[%s2483_s1 + $0xcc] ss:$16 sps:$4 sm:$0xff]   ;;  %v1903_v7 = vld [vmem:[%s2483_s1 + $0xc0] ss:$16 sps:$4 sm:$0xff]   ;;  %v1904_v8 = vld [vmem:[%s2483_s1 + $0xc8] ss:$16 sps:$4 sm:$0xff]  }
   0xf   : > { %727 = vmatprep.subr.bf16.mxu1 %v1895_v1  ;;  %685 = vmatpush1.bf16.msra.mxu0 %v1897_v3  ;;  %v1905_v9 = vld [vmem:[%s2483_s1 + $0xa4] ss:$16 sps:$4 sm:$0xff]   ;;  %v1907_v10 = vld [vmem:[%s2483_s1 + $0xac] ss:$16 sps:$4 sm:$0xff]   ;;  %v1909_v11 = vld [vmem:[%s2483_s1 + $0xa0] ss:$16 sps:$4 sm:$0xff]  }
  0x10   : > { %728 = vmatpush1.bf16.msra.mxu1 %v1898_v4  ;;  %686 = vmatprep.subr.bf16.mxu0 %v1899_v5  ;;  %v1910_v12 = vld [vmem:[%s2483_s1 + $0xa8] ss:$16 sps:$4 sm:$0xff]   ;;  %v1911_v13 = vld [vmem:[%s2483_s1 + $0x84] ss:$16 sps:$4 sm:$0xff]   ;;  %v1913_v14 = vld [vmem:[%s2483_s1 + $0x8c] ss:$16 sps:$4 sm:$0xff]  }
  0x11   : > { %729 = vmatprep.subr.bf16.mxu1 %v1901_v6  ;;  %v1915_v15 = vld [vmem:[%s2483_s1 + $0x80] ss:$16 sps:$4 sm:$0xff]   ;;  %v1916_v16 = vld [vmem:[%s2483_s1 + $0x88] ss:$16 sps:$4 sm:$0xff]   ;;  %v1917_v17 = vld [vmem:[%s2483_s1 + $0x64] ss:$16 sps:$4 sm:$0xff]  }
  0x12   : > { %v1919_v18 = vld [vmem:[%s2483_s1 + $0x6c] ss:$16 sps:$4 sm:$0xff]   ;;  %v1921_v19 = vld [vmem:[%s2483_s1 + $0x60] ss:$16 sps:$4 sm:$0xff]   ;;  %v1922_v20 = vld [vmem:[%s2483_s1 + $0x68] ss:$16 sps:$4 sm:$0xff]  }
  0x13   : > { %687 = vmatpush1.bf16.msra.mxu0 %v1903_v7  ;;  %v1923_v21 = vld [vmem:[%s2483_s1 + $0x44] ss:$16 sps:$4 sm:$0xff]   ;;  %v1925_v22 = vld [vmem:[%s2483_s1 + $0x4c] ss:$16 sps:$4 sm:$0xff]   ;;  %s2213_s11 = sshll.u32 %s2495_s24, 3  ;;  %s1809_s19 = sshll.u32 %s2495_s24, 4 }
  0x14   : > { %730 = vmatpush1.bf16.msra.mxu1 %v1904_v8  ;;  %688 = vmatprep.subr.bf16.mxu0 %v1905_v9  ;;  %v1927_v23 = vld [vmem:[%s2483_s1 + $0x40] ss:$16 sps:$4 sm:$0xff]   ;;  %v1928_v24 = vld [vmem:[%s2483_s1 + $0x48] ss:$16 sps:$4 sm:$0xff]   ;;  %v1929_v25 = vld [vmem:[%s2483_s1 + $0x24] ss:$16 sps:$4 sm:$0xff]   ;;  %s424_s20 = scalar_lea.vmem %s2482_s0, %s2213_s11  ;;  %s455_s23 = scalar_lea.vmem %s2487_s5, %s1809_s19 }
  0x15   : > { %731 = vmatprep.subr.bf16.mxu1 %v1907_v10  ;;  %v1931_v26 = vld [vmem:[%s2483_s1 + $0x2c] ss:$16 sps:$4 sm:$0xff]   ;;  %v1933_v27 = vld [vmem:[%s2483_s1 + $0x20] ss:$16 sps:$4 sm:$0xff]   ;;  %v1934_v28 = vld [vmem:[%s2483_s1 + $0x28] ss:$16 sps:$4 sm:$0xff]   ;;  %s465_s10 = scalar_lea.vmem %s2488_s6, %s2213_s11  ;;  %s475_s12 = scalar_lea.vmem %s2489_s7, %s2213_s11 }
  0x16   : > { %v1935_v29 = vld [vmem:[%s2483_s1 + $0x4] ss:$16 sps:$4 sm:$0xff]   ;;  %v1937_v30 = vld [vmem:[%s2483_s1 + $0xc] ss:$16 sps:$4 sm:$0xff]   ;;  %v1939_v31 = vld [vmem:[%s2483_s1] ss:$16 sps:$4 sm:$0xff]  }
  0x17   : > { %689 = vmatpush1.bf16.msra.mxu0 %v1909_v11  ;;  %v1940_v32 = vld [vmem:[%s2483_s1 + $0x8] ss:$16 sps:$4 sm:$0xff]   ;;  %v1944_v33 = vld [vmem:[%s2484_s2 + $0xe4] ss:$16 sps:$4 sm:$0xff]   ;;  %v1947_v34 = vld [vmem:[%s2484_s2 + $0xec] ss:$16 sps:$4 sm:$0xff]  }
  0x18   : > { %732 = vmatpush1.bf16.msra.mxu1 %v1910_v12  ;;  %690 = vmatprep.subr.bf16.mxu0 %v1911_v13  ;;  %v2255_v35 = vld [vmem:[%s424_s20] sm:$0xff]   ;;  %v1945_v37 = vld [vmem:[%s2484_s2 + $0xe8] ss:$16 sps:$4 sm:$0xff]   ;;  %v1953_v39 = vld [vmem:[%s2484_s2 + $0xcc] ss:$16 sps:$4 sm:$0xff]  }
  0x19   : > { %733 = vmatprep.subr.bf16.mxu1 %v1913_v14  ;;  %v1942_v36 = vld [vmem:[%s2484_s2 + $0xe0] ss:$16 sps:$4 sm:$0xff]   ;;  %v1950_v38 = vld [vmem:[%s2484_s2 + $0xc4] ss:$16 sps:$4 sm:$0xff]   ;;  %v1951_v41 = vld [vmem:[%s2484_s2 + $0xc8] ss:$16 sps:$4 sm:$0xff]  }
  0x1a   : > { %v1948_v40 = vld [vmem:[%s2484_s2 + $0xc0] ss:$16 sps:$4 sm:$0xff]   ;;  %v1956_v42 = vld [vmem:[%s2484_s2 + $0xa4] ss:$16 sps:$4 sm:$0xff]   ;;  %v1959_v43 = vld [vmem:[%s2484_s2 + $0xac] ss:$16 sps:$4 sm:$0xff]  }
  0x1b   : > { %691 = vmatpush1.bf16.msra.mxu0 %v1915_v15  ;;  %v1954_v44 = vld [vmem:[%s2484_s2 + $0xa0] ss:$16 sps:$4 sm:$0xff]   ;;  %v1957_v45 = vld [vmem:[%s2484_s2 + $0xa8] ss:$16 sps:$4 sm:$0xff]   ;;  %v1962_v46 = vld [vmem:[%s2484_s2 + $0x84] ss:$16 sps:$4 sm:$0xff]  }
  0x1c   : > { %734 = vmatpush1.bf16.msra.mxu1 %v1916_v16  ;;  %692 = vmatprep.subr.bf16.mxu0 %v1917_v17  ;;  %v1965_v47 = vld [vmem:[%s2484_s2 + $0x8c] ss:$16 sps:$4 sm:$0xff]   ;;  %v1960_v48 = vld [vmem:[%s2484_s2 + $0x80] ss:$16 sps:$4 sm:$0xff]   ;;  %v1963_v49 = vld [vmem:[%s2484_s2 + $0x88] ss:$16 sps:$4 sm:$0xff]  }
  0x1d   : > { %735 = vmatprep.subr.bf16.mxu1 %v1919_v18  ;;  %v1968_v50 = vld [vmem:[%s2484_s2 + $0x64] ss:$16 sps:$4 sm:$0xff]   ;;  %v1971_v51 = vld [vmem:[%s2484_s2 + $0x6c] ss:$16 sps:$4 sm:$0xff]   ;;  %v1966_v52 = vld [vmem:[%s2484_s2 + $0x60] ss:$16 sps:$4 sm:$0xff]  }
  0x1e   : > { %v1969_v53 = vld [vmem:[%s2484_s2 + $0x68] ss:$16 sps:$4 sm:$0xff]   ;;  %v1974_v54 = vld [vmem:[%s2484_s2 + $0x44] ss:$16 sps:$4 sm:$0xff]   ;;  %v1977_v55 = vld [vmem:[%s2484_s2 + $0x4c] ss:$16 sps:$4 sm:$0xff]  }
  0x1f   : > { %693 = vmatpush1.bf16.msra.mxu0 %v1921_v19  ;;  %v1972_v56 = vld [vmem:[%s2484_s2 + $0x40] ss:$16 sps:$4 sm:$0xff]   ;;  %v1975_v57 = vld [vmem:[%s2484_s2 + $0x48] ss:$16 sps:$4 sm:$0xff]   ;;  %v1980_v58 = vld [vmem:[%s2484_s2 + $0x24] ss:$16 sps:$4 sm:$0xff]  }
  0x20   : > { %736 = vmatpush1.bf16.msra.mxu1 %v1922_v20  ;;  %694 = vmatprep.subr.bf16.mxu0 %v1923_v21  ;;  %v1983_v59 = vld [vmem:[%s2484_s2 + $0x2c] ss:$16 sps:$4 sm:$0xff]   ;;  %v1978_v60 = vld [vmem:[%s2484_s2 + $0x20] ss:$16 sps:$4 sm:$0xff]   ;;  %v1981_v61 = vld [vmem:[%s2484_s2 + $0x28] ss:$16 sps:$4 sm:$0xff]  }
  0x21   : > { %737 = vmatprep.subr.bf16.mxu1 %v1925_v22  ;;  %v1986_v62 = vld [vmem:[%s2484_s2 + $0x4] ss:$16 sps:$4 sm:$0xff]   ;;  %v1989_v63 = vld [vmem:[%s2484_s2 + $0xc] ss:$16 sps:$4 sm:$0xff]   ;;  %v1984_v0 = vld [vmem:[%s2484_s2] ss:$16 sps:$4 sm:$0xff]  }
  0x22   : > { %v1987_v1 = vld [vmem:[%s2484_s2 + $0x8] ss:$16 sps:$4 sm:$0xff]   ;;  %v1994_v6 = vld [vmem:[%s2485_s3 + $0x70] sm:$0xff]   ;;  %v2002_v14 = vld [vmem:[%s2485_s3 + $0x60] sm:$0xff]  }
  0x23   : > { %695 = vmatpush1.bf16.msra.mxu0 %v1927_v23  ;;  %v1991_v3 = vld [vmem:[%s2485_s3 + $0xf8] sm:$0xff]   ;;  %v1995_v7 = vld [vmem:[%s2485_s3 + $0xf0] sm:$0xff]   ;;  %v1998_v10 = vld [vmem:[%s2485_s3 + $0x68] sm:$0xff]  }
  0x24   : > { %738 = vmatpush1.bf16.msra.mxu1 %v1928_v24  ;;  %696 = vmatprep.subr.bf16.mxu0 %v1929_v25  ;;  %v1992_v4 = vld [vmem:[%s2485_s3 + $0x38] sm:$0xff]   ;;  %v1996_v8 = vld [vmem:[%s2485_s3 + $0x30] sm:$0xff]   ;;  %v1999_v11 = vld [vmem:[%s2485_s3 + $0xe8] sm:$0xff]  }
  0x25   : > { %739 = vmatprep.subr.bf16.mxu1 %v1931_v26  ;;  %v1993_v5 = vld [vmem:[%s2485_s3 + $0xb8] sm:$0xff]   ;;  %v1997_v9 = vld [vmem:[%s2485_s3 + $0xb0] sm:$0xff]   ;;  %v2000_v12 = vld [vmem:[%s2485_s3 + $0x28] sm:$0xff]  }
  0x26   : > { %v2001_v13 = vld [vmem:[%s2485_s3 + $0xa8] sm:$0xff]   ;;  %v2003_v15 = vld [vmem:[%s2485_s3 + $0xe0] sm:$0xff]   ;;  %v2006_v18 = vld [vmem:[%s2485_s3 + $0x58] sm:$0xff]  }
  0x27   : > { %697 = vmatpush1.bf16.msra.mxu0 %v1933_v27  ;;  %v2004_v16 = vld [vmem:[%s2485_s3 + $0x20] sm:$0xff]   ;;  %v2007_v19 = vld [vmem:[%s2485_s3 + $0xd8] sm:$0xff]   ;;  %v2010_v22 = vld [vmem:[%s2485_s3 + $0x50] sm:$0xff]  }
  0x28   : > { %740 = vmatpush1.bf16.msra.mxu1 %v1934_v28  ;;  %698 = vmatprep.subr.bf16.mxu0 %v1935_v29  ;;  %v2005_v17 = vld [vmem:[%s2485_s3 + $0xa0] sm:$0xff]   ;;  %v2008_v20 = vld [vmem:[%s2485_s3 + $0x18] sm:$0xff]   ;;  %v2011_v23 = vld [vmem:[%s2485_s3 + $0xd0] sm:$0xff]  }
  0x29   : > { %741 = vmatprep.subr.bf16.mxu1 %v1937_v30  ;;  %v2009_v21 = vld [vmem:[%s2485_s3 + $0x98] sm:$0xff]   ;;  %v2012_v24 = vld [vmem:[%s2485_s3 + $0x10] sm:$0xff]   ;;  %v2014_v26 = vld [vmem:[%s2485_s3 + $0x48] sm:$0xff]  }
  0x2a   : > { %v2013_v25 = vld [vmem:[%s2485_s3 + $0x90] sm:$0xff]   ;;  %v2015_v27 = vld [vmem:[%s2485_s3 + $0xc8] sm:$0xff]   ;;  %v2018_v30 = vld [vmem:[%s2485_s3 + $0x40] sm:$0xff]  }
  0x2b   : > { %699 = vmatpush1.bf16.msra.mxu0 %v1939_v31  ;;  %v2016_v28 = vld [vmem:[%s2485_s3 + $0x8] sm:$0xff]   ;;  %v2019_v31 = vld [vmem:[%s2485_s3 + $0xc0] sm:$0xff]  }
  0x2c   : > { %742 = vmatpush1.bf16.msra.mxu1 %v1940_v32  ;;  %962 = vmatprep.subr.bf16.mxu0 %v1944_v33  ;;  %v2017_v29 = vld [vmem:[%s2485_s3 + $0x88] sm:$0xff]   ;;  %v2020_v32 = vld [vmem:[%s2485_s3] sm:$0xff]  }
  0x2d   : > { %1005 = vmatprep.subr.bf16.mxu1 %v1947_v34  ;;  %v2021_v33 = vld [vmem:[%s2485_s3 + $0x80] sm:$0xff]  }
  0x2e   : > { %717 = vmatmul.mubr.bf16.vlgmr.msra.gmra.mxu0 %v2255_v35  ;;  %v1465_v34 = vld [vmem:[%s455_s23] sm:$0xff] }
  0x2f   : > { %760 = vmatmul.mubr.bf16.vlgmr.msra.gmra.mxu1 %v2255_v35  ;;  %963 = vmatpush1.bf16.msra.mxu0 %v1942_v36 }
  0x30   : > { %1006 = vmatpush1.bf16.msra.mxu1 %v1945_v37  ;;  %964 = vmatprep.subr.bf16.mxu0 %v1950_v38 }
  0x31   : > { %1007 = vmatprep.subr.bf16.mxu1 %v1953_v39  ;;  %994 = vmatprep.mubr.bf16.mxu0 %v2078_v2 }
  0x32   : > { %1037 = vmatprep.mubr.bf16.mxu1 %v2078_v2  ;;  %v1990_v2 = vld [vmem:[%s2485_s3 + $0x78] sm:$0xff]   ;;  %1469 = vperm.xlu0 %1892, %v1465_v34  }
  0x33   : > { %965 = vmatpush1.bf16.msra.mxu0 %v1948_v40 }
  0x34   : > { %1008 = vmatpush1.bf16.msra.mxu1 %v1951_v41  ;;  %966 = vmatprep.subr.bf16.mxu0 %v1956_v42 }
  0x35   : > { %1009 = vmatprep.subr.bf16.mxu1 %v1959_v43 }
  0x37   : > { %967 = vmatpush1.bf16.msra.mxu0 %v1954_v44 }
  0x38   : > { %1010 = vmatpush1.bf16.msra.mxu1 %v1957_v45  ;;  %968 = vmatprep.subr.bf16.mxu0 %v1962_v46 }
  0x39   : > { %1011 = vmatprep.subr.bf16.mxu1 %v1965_v47 }
  0x3b   : > { %969 = vmatpush1.bf16.msra.mxu0 %v1960_v48 }
  0x3c   : > { %1012 = vmatpush1.bf16.msra.mxu1 %v1963_v49  ;;  %970 = vmatprep.subr.bf16.mxu0 %v1968_v50 }
  0x3d   : > { %1013 = vmatprep.subr.bf16.mxu1 %v1971_v51 }
  0x3f   : > { %971 = vmatpush1.bf16.msra.mxu0 %v1966_v52 }
  0x40   : > { %1014 = vmatpush1.bf16.msra.mxu1 %v1969_v53  ;;  %972 = vmatprep.subr.bf16.mxu0 %v1974_v54 }
  0x41   : > { %1015 = vmatprep.subr.bf16.mxu1 %v1977_v55 }
  0x43   : > { %973 = vmatpush1.bf16.msra.mxu0 %v1972_v56 }
  0x44   : > { %1016 = vmatpush1.bf16.msra.mxu1 %v1975_v57  ;;  %974 = vmatprep.subr.bf16.mxu0 %v1980_v58 }
  0x45   : > { %1017 = vmatprep.subr.bf16.mxu1 %v1983_v59 }
  0x47   : > { %975 = vmatpush1.bf16.msra.mxu0 %v1978_v60 }
  0x48   : > { %1018 = vmatpush1.bf16.msra.mxu1 %v1981_v61  ;;  %976 = vmatprep.subr.bf16.mxu0 %v1986_v62 }
  0x49   : > { %1019 = vmatprep.subr.bf16.mxu1 %v1989_v63 }
  0x4b   : > { %977 = vmatpush1.bf16.msra.mxu0 %v1984_v0 }
  0x4c   : > { %1020 = vmatpush1.bf16.msra.mxu1 %v1987_v1  ;;  %1823 = vmatprep.subr.bf16.mxu0 %v1990_v2 }
  0x4d   : > { %1845 = vmatprep.subr.bf16.mxu1 %v1991_v3 }
  0x4e   : > { %995 = vmatmul.mubr.bf16.vlgmr.msra.gmra.mxu0 %v2255_v35 }
  0x4f   : > { %1038 = vmatmul.mubr.bf16.vlgmr.msra.gmra.mxu1 %v2255_v35  ;;  %1824 = vmatpush3.bf16.msra.mxu0 %v1992_v4  ;;  %v1466_v35 = vld [vmem:[%s455_s23 + $0x8] sm:$0xff] }
  0x50   : > { %1846 = vmatpush3.bf16.msra.mxu1 %v1993_v5  ;;  %1825 = vmatprep.subr.bf16.mxu0 %v1994_v6 }
  0x51   : > { %1847 = vmatprep.subr.bf16.mxu1 %v1995_v7  ;;  %1474 = vperm.xlu0 %1892, %v1466_v35  }
  0x53   : > { %1826 = vmatpush3.bf16.msra.mxu0 %v1996_v8 }
  0x54   : > { %1848 = vmatpush3.bf16.msra.mxu1 %v1997_v9  ;;  %1827 = vmatprep.subr.bf16.mxu0 %v1998_v10 }
  0x55   : > { %1849 = vmatprep.subr.bf16.mxu1 %v1999_v11 }
  0x57   : > { %1828 = vmatpush3.bf16.msra.mxu0 %v2000_v12 }
  0x58   : > { %1850 = vmatpush3.bf16.msra.mxu1 %v2001_v13  ;;  %1829 = vmatprep.subr.bf16.mxu0 %v2002_v14 }
  0x59   : > { %1851 = vmatprep.subr.bf16.mxu1 %v2003_v15 }
  0x5b   : > { %1830 = vmatpush3.bf16.msra.mxu0 %v2004_v16 }
  0x5c   : > { %1852 = vmatpush3.bf16.msra.mxu1 %v2005_v17  ;;  %1831 = vmatprep.subr.bf16.mxu0 %v2006_v18 }
  0x5d   : > { %1853 = vmatprep.subr.bf16.mxu1 %v2007_v19 }
  0x5f   : > { %1832 = vmatpush3.bf16.msra.mxu0 %v2008_v20 }
  0x60   : > { %1854 = vmatpush3.bf16.msra.mxu1 %v2009_v21  ;;  %1833 = vmatprep.subr.bf16.mxu0 %v2010_v22 }
  0x61   : > { %1855 = vmatprep.subr.bf16.mxu1 %v2011_v23 }
  0x63   : > { %1834 = vmatpush3.bf16.msra.mxu0 %v2012_v24 }
  0x64   : > { %1856 = vmatpush3.bf16.msra.mxu1 %v2013_v25  ;;  %1835 = vmatprep.subr.bf16.mxu0 %v2014_v26 }
  0x65   : > { %1857 = vmatprep.subr.bf16.mxu1 %v2015_v27 }
  0x67   : > { %1836 = vmatpush3.bf16.msra.mxu0 %v2016_v28 }
  0x68   : > { %1858 = vmatpush3.bf16.msra.mxu1 %v2017_v29  ;;  %1837 = vmatprep.subr.bf16.mxu0 %v2018_v30 }
  0x69   : > { %1859 = vmatprep.subr.bf16.mxu1 %v2019_v31 }
  0x6b   : > { %1838 = vmatpush3.bf16.msra.mxu0 %v2020_v32 }
  0x6c   : > { %1860 = vmatpush3.bf16.msra.mxu1 %v2021_v33 }
  0xee   : > { %v2453_v36 = vpop.f32.mrf.mxu0 }
  0xef   : > { %v2455_v37 = vpop.f32.mrf.mxu1  ;;  %v1764_v38 = vmul.f32 -1.442695, %v2453_v36 }
  0xf0   : > { %v1766_v39 = vmul.f32 -1.442695, %v2455_v37  ;;  %v720_v40 = vpop.f32.mrf.mxu0 }
  0xf1   : > { %v763_v41 = vpop.f32.mrf.mxu1  ;;  %2022 = vpow2.f32 %v1764_v38  ;;  %v1765_v42 = vmul.f32 -1.442695, %v720_v40 }
  0xf2   : > { %v1767_v43 = vmul.f32 -1.442695, %v763_v41  ;;  %2024 = vpow2.f32 %v1766_v39  ;;  %v722_v44 = vpop.f32.mrf.mxu0 }
  0xf3   : > { %v765_v45 = vpop.f32.mrf.mxu1  ;;  %2026 = vpow2.f32 %v1765_v42  ;;  %v1768_v46 = vmul.f32 -1.442695, %v722_v44 }
  0xf4   : > { %v1770_v47 = vmul.f32 -1.442695, %v765_v45  ;;  %2028 = vpow2.f32 %v1767_v43  ;;  %v724_v48 = vpop.f32.mrf.mxu0 }
  0xf5   : > { %v767_v49 = vpop.f32.mrf.mxu1  ;;  %2030 = vpow2.f32 %v1768_v46  ;;  %v1769_v50 = vmul.f32 -1.442695, %v724_v48 }
  0xf6   : > { %v1771_v51 = vmul.f32 -1.442695, %v767_v49  ;;  %2032 = vpow2.f32 %v1770_v47 }
  0xf7   : > { %2034 = vpow2.f32 %v1769_v50 }
  0xf8   : > { %2036 = vpow2.f32 %v1771_v51 }
  0xfe   : > { %v2023_v52 = vpop.eup %2022 }
  0xff   : > { %v2025_v53 = vpop.eup %2024  ;;  %v1072_v54 = vadd.f32 1.0, %v2023_v52  ;;  %v1470_v52 = vpop.permute.xlu0 %1469 }
 0x100   : > { %v2027_v55 = vpop.eup %2026  ;;  %v1074_v56 = vadd.f32 1.0, %v2025_v53 }
 0x101   : > { %v2029_v57 = vpop.eup %2028  ;;  %2038 = vrcp.f32 %v1072_v54  ;;  %v1073_v58 = vadd.f32 1.0, %v2027_v55 }
 0x102   : > { %v2031_v59 = vpop.eup %2030  ;;  %2040 = vrcp.f32 %v1074_v56  ;;  %v1075_v60 = vadd.f32 1.0, %v2029_v57 }
 0x103   : > { %v2033_v61 = vpop.eup %2032  ;;  %2042 = vrcp.f32 %v1073_v58  ;;  %v1076_v62 = vadd.f32 1.0, %v2031_v59 }
 0x104   : > { %v2035_v63 = vpop.eup %2034  ;;  %2044 = vrcp.f32 %v1075_v60  ;;  %v1078_v0 = vadd.f32 1.0, %v2033_v61  ;;  %v1815_v61 = vld [vmem:[%s465_s10] sm:$0xff]  }
 0x105   : > { %v2037_v1 = vpop.eup %2036  ;;  %2046 = vrcp.f32 %v1076_v62  ;;  %v1077_v2 = vadd.f32 1.0, %v2035_v63  ;;  %v1475_v63 = vpop.permute.xlu0 %1474 }
 0x106   : > { %2048 = vrcp.f32 %v1078_v0  ;;  %v1079_v3 = vadd.f32 1.0, %v2037_v1  ;;  %v1816_v1 = vunpack.c.l.bf16 %v1815_v61 }
 0x107   : > { %2050 = vrcp.f32 %v1077_v2 }
 0x108   : > { %2052 = vrcp.f32 %v1079_v3  ;;  %v1817_v3 = vunpack.c.h.bf16 %v1815_v61 }
 0x10e   : > { %v2039_v4 = vpop.eup %2038  ;;  %v996_v5 = vpop.f32.mrf.mxu0 }
 0x10f   : > { %v1039_v6 = vpop.f32.mrf.mxu1  ;;  %v2041_v7 = vpop.eup %2040  ;;  %v1096_v19 = vmul.f32 %v2039_v4, %v2453_v36 }
 0x110   : > { %v2043_v8 = vpop.eup %2042  ;;  %v998_v9 = vpop.f32.mrf.mxu0  ;;  %v1098_v23 = vmul.f32 %v2041_v7, %v2455_v37  ;;  %v1481_v37 = vlaneseq }
 0x111   : > { %v1041_v10 = vpop.f32.mrf.mxu1  ;;  %v2045_v11 = vpop.eup %2044  ;;  %v1097_v15 = vmul.f32 %v2043_v8, %v720_v40  ;;  %v1104_v32 = vmul.f32 %v1096_v19, %v996_v5 }
 0x112   : > { %v2047_v12 = vpop.eup %2046  ;;  %v1000_v13 = vpop.f32.mrf.mxu0  ;;  %v1099_v20 = vmul.f32 %v2045_v11, %v763_v41  ;;  %v1106_v35 = vmul.f32 %v1098_v23, %v1039_v6  ;;  %v1482_v42 = vshrl.u32 %v1481_v37, 7 }
 0x113   : > { %v2049_v14 = vpop.eup %2048  ;;  %v1100_v16 = vmul.f32 %v2047_v12, %v722_v44  ;;  %v1043_v17 = vpop.f32.mrf.mxu1  ;;  %v1105_v28 = vmul.f32 %v1097_v15, %v998_v9  ;;  %v1479_v44 = vld [vmem:[%s446_s30] sm:$0x1] }
 0x114   : > { %v2051_v18 = vpop.eup %2050  ;;  %v1102_v21 = vmul.f32 %v2049_v14, %v765_v45  ;;  %v1002_v27 = vpop.f32.mrf.mxu0  ;;  %v1107_v33 = vmul.f32 %v1099_v20, %v1041_v10  ;;  %v1483_v50 = vsub.s32 0, %v1482_v42 }
 0x115   : > { %v2053_v22 = vpop.eup %2052  ;;  %v1101_v24 = vmul.f32 %v2051_v18, %v724_v48  ;;  %v1108_v26 = vmul.f32 %v1100_v16, %v1000_v13  ;;  %v1045_v31 = vpop.f32.mrf.mxu1 }
 0x116   : > { %v1103_v25 = vmul.f32 %v2053_v22, %v767_v49  ;;  %v1110_v29 = vmul.f32 %v1102_v21, %v1043_v17  ;;  %v1480_v49 = vunpack.c.l.bf16 %v1479_v44 }
 0x117   : > { %v1109_v30 = vmul.f32 %v1101_v24, %v1002_v27  ;;  %v1114_v36 = vpack.c.bf16 %v1108_v26, %v1104_v32 }
 0x118   : > { %v1111_v34 = vmul.f32 %v1103_v25, %v1045_v31  ;;  %v1116_v40 = vpack.c.bf16 %v1110_v29, %v1106_v35  ;;  %v1484_v59 = vrot.slane %v1480_v49, %v1483_v50 }
 0x119   : > { %v1115_v38 = vpack.c.bf16 %v1109_v30, %v1105_v28 }
 0x11a   : > { %v1117_v39 = vpack.c.bf16 %v1111_v34, %v1107_v33 }
 0x11b   : > { %1406 = vmatprep.mubr.bf16.mxu0 %v1115_v38 }
 0x11c   : > { %1447 = vmatprep.mubr.bf16.mxu1 %v1117_v39  ;;  %1407 = vmatmul.mubr.bf16.vlgmr.msra.gmra.mxu0 %v1114_v36 }
 0x11d   : > { %1448 = vmatmul.mubr.bf16.vlgmr.msra.gmra.mxu1 %v1116_v40 }
 0x1dc   : > { %v1839_v41 = vpop.f32.mrf.mxu0 }
 0x1dd   : > { %v1861_v43 = vpop.f32.mrf.mxu1 }
 0x1de   : > { %v1840_v45 = vpop.f32.mrf.mxu0 }
 0x1df   : > { %v1841_v46 = vadd.f32 %v1840_v45, %v1839_v41  ;;  %v1862_v47 = vpop.f32.mrf.mxu1 }
 0x1e0   : > { %v1863_v48 = vadd.f32 %v1862_v47, %v1861_v43  ;;  %v1842_v51 = vpop.f32.mrf.mxu0 }
 0x1e1   : > { %v1864_v53 = vpop.f32.mrf.mxu1 }
 0x1e2   : > { %v1450_v54 = vadd.f32 %v1863_v48, %v1841_v46  ;;  %v1843_v55 = vpop.f32.mrf.mxu0 }
 0x1e3   : > { %v1844_v56 = vadd.f32 %v1843_v55, %v1842_v51  ;;  %v1865_v57 = vpop.f32.mrf.mxu1 }
 0x1e4   : > { %v1477_v58 = vmul.f32 %v1470_v52, %v1450_v54  ;;  %v1866_v60 = vadd.f32 %v1865_v57, %v1864_v53 }
 0x1e6   : > { %v1453_v62 = vadd.f32 %v1866_v60, %v1844_v56  ;;  %v1485_v0 = vmul.f32 %v1484_v59, %v1477_v58 }
 0x1e8   : > { %v1478_v2 = vmul.f32 %v1475_v63, %v1453_v62  ;;  %v1491_v5 = vadd.f32 %v1816_v1, %v1485_v0 }
 0x1ea   : > { %v1486_v4 = vmul.f32 %v1484_v59, %v1478_v2 }
 0x1ec   : > { %v1492_v6 = vadd.f32 %v1817_v3, %v1486_v4 }
 0x1ee   : > { %v1821_v7 = vpack.c.bf16 %v1492_v6, %v1491_v5 }
 0x1f0   : > { %1822 = vst [vmem:[%s475_s12] sm:$0xff] %v1821_v7  }
 0x1f1 PF: > { %s17_s26 = sadd.s32 1, %s2076_s26   ;;  %s2490_s24 = smov %s2072_s25 }
 0x1f2   : > { %p14_p5 = scmp.ge.s32.totalorder %s17_s26, 4   ;;  %s2491_s25 = smov %s2493_s27 }
 0x1f4   :  { %16 = sbr.rel (!%p14_p5) target bundleno = 2 (0x2), region = 104 }

</bundles_post_ra>
